<compile_context>
chip_gen: v6e
topology: v6e:2x2x1
jax: 0.10.0
libtpu: 0.0.40
codegen_flags: <defaults>
</compile_context>

<pallas_src>
import functools

import jax
import jax.numpy as jnp
from jax.experimental import pallas as pl
from jax.experimental.pallas import tpu as pltpu

# full-f32 matmuls everywhere (reference and kernel) so the numeric check is tight
jax.config.update("jax_default_matmul_precision", "highest")


def _round_up(v, m):
    return ((v + m - 1) // m) * m


def _pick_block_b(B, target=8):
    """Largest Bt <= target dividing B, preferring >= 2 grid steps (v7x has 2 TensorCores)."""
    divisors = [bt for bt in range(1, min(B, target) + 1) if B % bt == 0]
    multi = [bt for bt in divisors if B // bt >= 2]
    return max(multi) if multi else max(divisors)


# ----------------------------- fused Pallas kernel ---------------------------

def fused_gcn_kernel(adj_ref, x_ref, w_ref, scale_ref, fbias_ref, lw_ref, lb_ref,
                     o_ref, *, mm_dtype):
    # adj_ref   : VMEM (Bt, N, N)     pre-contracted adjacency (adj4 @ edgeweight)
    # x_ref     : VMEM (Bt, N, P)     input features zero-padded to P = max(nfeat, hidden)
    # w_ref     : VMEM (depth, P, H)  stacked GCN weights (layer-0 rows >= nfeat are zero)
    # scale_ref : VMEM (depth, N, 1)  eval-BN per-node scale
    # fbias_ref : VMEM (depth, N, H)  scale*b + shift  (BN-folded bias)
    # lw_ref    : VMEM (N*H, Cp)      final linear weight, node-major flatten, class-padded
    # lb_ref    : VMEM (1, Cp)        final linear bias (padded)
    # o_ref     : VMEM (Bt, 1, Cp)    logits (lane-dense store)
    Bt, N, P = x_ref.shape
    depth, _, H = w_ref.shape

    adj = adj_ref[...].astype(mm_dtype)                               # stays on-chip all layers
    h = x_ref[...]                                                    # (Bt, N, P)

    # --- depth x (GraphConvolution + folded eval-BN + ReLU); h and adj never leave VMEM ---
    for l in range(depth):
        fin = P if l == 0 else H
        w_l = w_ref[l, :fin, :]                                       # ref-level static slice
        support = jnp.dot(                                            # (Bt*N, fin) @ (fin, H)
            h.reshape(Bt * N, fin).astype(mm_dtype), w_l.astype(mm_dtype),
            preferred_element_type=jnp.float32).reshape(Bt, N, H)
        z = jnp.einsum("bij,bjh->bih", adj, support.astype(mm_dtype),  # batched adj @ support
                       preferred_element_type=jnp.float32)
        z = z * scale_ref[l] + fbias_ref[l]                           # BN on (N,H), not (N,N)
        h = jnp.maximum(z, 0.0)                                       # ConcatReLU

    # --- Flatten (node-major, == torch .view(B, -1)) + single-matmul ConcatLinear ---
    h_flat = h.reshape(Bt, N * H)                                     # lane-aligned fold (H%128==0)
    logits = jnp.dot(h_flat.astype(mm_dtype), lw_ref[...].astype(mm_dtype),
                     preferred_element_type=jnp.float32) + lb_ref[...]
    o_ref[...] = logits[:, None, :]


# ----------------------------- pallas_call wrapper ---------------------------

def gcn_forward(packed, x, adj4, *, block_b=None, mm_dtype=jnp.float32):
    B, N, F = x.shape
    depth, P, H = packed["w"].shape
    Cp = packed["lw"].shape[-1]
    nclass = packed["nclass"]

    # Edge-weight contraction (== torch.matmul(adj, edgeweight).view(B, N, N)), done once in
    # XLA on the natural (B, N, N, M) layout: adj4 is read from HBM exactly once and the
    # kernel's adjacency input / VMEM block shrinks by M x (no per-call transpose round-trip).
    adj = jnp.einsum("bijm,m->bij", adj4, packed["ew"])

    # zero-pad the feature dim so layer 0 matches the stacked-weight fan-in P
    x_p = x if F == P else jnp.pad(x, ((0, 0), (0, 0), (0, P - F)))

    Bt = _pick_block_b(B) if block_b is None else block_b
    assert B % Bt == 0, "block_b must divide the batch"

    kernel = functools.partial(fused_gcn_kernel, mm_dtype=mm_dtype)

    out = pl.pallas_call(
        kernel,
        out_shape=jax.ShapeDtypeStruct((B, 1, Cp), jnp.float32),
        grid=(B // Bt,),
        in_specs=[
            pl.BlockSpec((Bt, N, N), lambda b: (b, 0, 0)),            # adjacency (pre-contracted)
            pl.BlockSpec((Bt, N, P), lambda b: (b, 0, 0)),            # features (padded)
            pl.BlockSpec((depth, P, H), lambda b: (0, 0, 0)),         # stacked GCN weights
            pl.BlockSpec((depth, N, 1), lambda b: (0, 0, 0)),         # BN scale
            pl.BlockSpec((depth, N, H), lambda b: (0, 0, 0)),         # BN-folded bias
            pl.BlockSpec((N * H, Cp), lambda b: (0, 0)),              # final linear weight (2-D)
            pl.BlockSpec((1, Cp), lambda b: (0, 0)),                  # final linear bias
        ],
        out_specs=pl.BlockSpec((Bt, 1, Cp), lambda b: (b, 0, 0)),
        compiler_params=pltpu.CompilerParams(
            dimension_semantics=("parallel",)),                       # batch sharded over TCs
    )(adj, x_p, packed["w"], packed["scale"], packed["fbias"], packed["lw"], packed["lb"])

    return out[:, 0, :nclass]


# ----------------------------- parameter init / packing ----------------------

def init_params(key, nnode, nfeat, mfeat, hidden1, depth, nclass):
    hidden = [hidden1] * depth
    keys = jax.random.split(key, 2 * depth + 3)
    layers = []
    nin = nfeat
    eps = 1e-5
    for d in range(depth):
        stdv = 1.0 / jnp.sqrt(float(hidden[d]))
        w = jax.random.uniform(keys[2 * d], (nin, hidden[d]), jnp.float32, -stdv, stdv)
        b = jax.random.uniform(keys[2 * d + 1], (hidden[d],), jnp.float32, -stdv, stdv)
        # BatchNorm1d(nnode) defaults, eval mode: gamma=1, beta=0, mean=0, var=1
        gamma = jnp.ones((nnode,), jnp.float32)
        beta = jnp.zeros((nnode,), jnp.float32)
        mean = jnp.zeros((nnode,), jnp.float32)
        var = jnp.ones((nnode,), jnp.float32)
        scale = gamma / jnp.sqrt(var + eps)
        shift = beta - mean * scale
        layers.append(dict(w=w, b=b, scale=scale, shift=shift))
        nin = hidden[d]
    nin_full = hidden[-1] * nnode
    stdv = 1.0 / jnp.sqrt(float(nin_full))
    lin_w = jax.random.uniform(keys[-3], (nin_full, nclass), jnp.float32, -stdv, stdv)
    lin_b = jax.random.uniform(keys[-2], (nclass,), jnp.float32, -stdv, stdv)
    edgeweight = jax.random.uniform(keys[-1], (mfeat, 1), jnp.float32, 0.0, 1.0)  # torch.rand
    return dict(gcn_layers=layers, lin_w=lin_w, lin_b=lin_b, edgeweight=edgeweight)


def pack_params(params, nnode, nfeat):
    """One-time packing into the fused-kernel layout (stacked weights, folded BN, padded dims)."""
    layers = params["gcn_layers"]
    H = layers[0]["w"].shape[1]
    P = max(nfeat, H)
    nclass = params["lin_w"].shape[1]
    Cp = _round_up(nclass, 128)                       # lane-dense final store

    w_stack, scale_stack, fbias_stack = [], [], []
    for layer in layers:
        w = layer["w"]
        fin = w.shape[0]
        w_stack.append(jnp.zeros((P, H), jnp.float32).at[:fin, :].set(w))
        scale = layer["scale"]
        shift = layer["shift"]
        b = layer["b"]
        scale_stack.append(scale.reshape(nnode, 1))
        fbias_stack.append(scale[:, None] * b[None, :] + shift[:, None])   # (N, H)
    w_stack = jnp.stack(w_stack)                      # (depth, P, H)
    scale_stack = jnp.stack(scale_stack)              # (depth, N, 1)
    fbias_stack = jnp.stack(fbias_stack)              # (depth, N, H)

    # final linear weight stays 2-D (node-major flatten order), classes padded to Cp lanes
    lw = jnp.zeros((nnode * H, Cp), jnp.float32).at[:, :nclass].set(params["lin_w"])
    lb = jnp.zeros((1, Cp), jnp.float32).at[0, :nclass].set(params["lin_b"])
    ew = params["edgeweight"].reshape(-1).astype(jnp.float32)               # (M,)

    return dict(ew=ew, w=w_stack, scale=scale_stack, fbias=fbias_stack,
                lw=lw, lb=lb, nclass=nclass)


# ----------------------------- pure-JAX reference -----------------------------

def gcn_forward_reference(params, x, adj4):
    adj = jnp.matmul(adj4, params["edgeweight"]).reshape(adj4.shape[0], adj4.shape[1], -1)
    h = x
    for layer in params["gcn_layers"]:
        z = jnp.einsum("bij,bjh->bih", adj, h @ layer["w"]) + layer["b"]
        z = z * layer["scale"][None, :, None] + layer["shift"][None, :, None]
        h = jnp.maximum(z, 0.0)
    h_flat = h.reshape(h.shape[0], -1)
    return h_flat @ params["lin_w"] + params["lin_b"]


# ----------------------------- main -------------------------------------------

if __name__ == "__main__":
    # hidden1 = 128 so the in-kernel flatten (Bt, N, H) -> (Bt, N*H) is a lane-aligned fold
    B, nnode, nfeat, mfeat = 2, 8, 4, 3
    hidden1, depth, nclass = 128, 2, 5

    key = jax.random.PRNGKey(0)
    kx, ka, kp = jax.random.split(key, 3)
    x = jax.random.normal(kx, (B, nnode, nfeat), jnp.float32)
    adj4 = jax.random.uniform(ka, (B, nnode, nnode, mfeat), jnp.float32)

    params = init_params(kp, nnode, nfeat, mfeat, hidden1, depth, nclass)
    packed = pack_params(params, nnode, nfeat)

    out = jax.block_until_ready(gcn_forward(packed, x, adj4))
    ref = gcn_forward_reference(params, x, adj4)
    assert out.shape == (B, nclass)
    assert jnp.allclose(out, ref, atol=1e-3, rtol=1e-3), float(jnp.max(jnp.abs(out - ref)))
    print("KERNEL_OK")
</pallas_src>

<mosaic_0001>
module attributes {stable_mosaic.version = 11 : i64} {
  func.func @fused_gcn_kernel(%arg0: i32, %arg1: memref<1x8x8xf32, #tpu.memory_space<vmem>>, %arg2: memref<1x8x128xf32, #tpu.memory_space<vmem>>, %arg3: memref<2x128x128xf32, #tpu.memory_space<vmem>>, %arg4: memref<2x8x1xf32, #tpu.memory_space<vmem>>, %arg5: memref<2x8x128xf32, #tpu.memory_space<vmem>>, %arg6: memref<1024x128xf32, #tpu.memory_space<vmem>>, %arg7: memref<1x128xf32, #tpu.memory_space<vmem>>, %arg8: memref<1x1x128xf32, #tpu.memory_space<vmem>>) attributes {dimension_semantics = [#tpu.dimension_semantics<parallel>], iteration_bounds = array<i64: 2>, scalar_prefetch = 0 : i64, scratch_operands = 0 : i64, tpu.core_type = #tpu.core_type<tc>, window_params = [{transform_indices = @transform_0, window_bounds = array<i64: 1, 8, 8>}, {transform_indices = @transform_1, window_bounds = array<i64: 1, 8, 128>}, {pipeline_mode = #tpu.pipeline_mode<synchronous>, transform_indices = @transform_2, window_bounds = array<i64: 2, 128, 128>}, {pipeline_mode = #tpu.pipeline_mode<synchronous>, transform_indices = @transform_3, window_bounds = array<i64: 2, 8, 1>}, {pipeline_mode = #tpu.pipeline_mode<synchronous>, transform_indices = @transform_4, window_bounds = array<i64: 2, 8, 128>}, {pipeline_mode = #tpu.pipeline_mode<synchronous>, transform_indices = @transform_5, window_bounds = array<i64: 1024, 128>}, {pipeline_mode = #tpu.pipeline_mode<synchronous>, transform_indices = @transform_6, window_bounds = array<i64: 1, 128>}, {transform_indices = @transform_7, window_bounds = array<i64: 1, 1, 128>}]} {
    %c0 = arith.constant 0 : index
    %c0_0 = arith.constant 0 : index
    %c0_1 = arith.constant 0 : index
    %0 = vector.load %arg1[%c0, %c0_0, %c0_1] : memref<1x8x8xf32, #tpu.memory_space<vmem>>, vector<1x8x8xf32>
    %c0_2 = arith.constant 0 : index
    %c0_3 = arith.constant 0 : index
    %c0_4 = arith.constant 0 : index
    %1 = vector.load %arg2[%c0_2, %c0_3, %c0_4] : memref<1x8x128xf32, #tpu.memory_space<vmem>>, vector<1x8x128xf32>
    %c0_5 = arith.constant 0 : index
    %c0_6 = arith.constant 0 : index
    %c0_7 = arith.constant 0 : index
    %2 = vector.load %arg3[%c0_5, %c0_6, %c0_7] : memref<2x128x128xf32, #tpu.memory_space<vmem>>, vector<1x128x128xf32>
    %3 = vector.shape_cast %2 : vector<1x128x128xf32> to vector<128x128xf32>
    %4 = vector.shape_cast %1 : vector<1x8x128xf32> to vector<8x128xf32>
    %cst = arith.constant dense<0.000000e+00> : vector<8x128xf32>
    %5 = tpu.matmul %4, %3, %cst {dimension_numbers = #tpu.dot_dimension_numbers<[1], [0], [0], [1], [0, 0, 1, 1], [], []>, precision = #tpu.contract_precision<fp32>} : vector<8x128xf32>, vector<128x128xf32>, vector<8x128xf32> -> vector<8x128xf32>
    %6 = vector.shape_cast %5 : vector<8x128xf32> to vector<1x8x128xf32>
    "tpu.trace_start"() <{level = 10 : i32, message = "bij,bjh->bih"}> : () -> ()
    %cst_8 = arith.constant dense<0.000000e+00> : vector<1x8x128xf32>
    %7 = tpu.matmul %0, %6, %cst_8 {dimension_numbers = #tpu.dot_dimension_numbers<[2], [1], [1], [2], [0, 0, 0, 1, 1, 2], [0], [0]>, precision = #tpu.contract_precision<fp32>} : vector<1x8x8xf32>, vector<1x8x128xf32>, vector<1x8x128xf32> -> vector<1x8x128xf32>
    "tpu.trace_stop"() : () -> ()
    %c0_9 = arith.constant 0 : index
    %c0_10 = arith.constant 0 : index
    %c0_11 = arith.constant 0 : index
    %8 = vector.load %arg4[%c0_9, %c0_10, %c0_11] : memref<2x8x1xf32, #tpu.memory_space<vmem>>, vector<1x8x1xf32>
    %9 = vector.shape_cast %8 : vector<1x8x1xf32> to vector<8x1xf32>
    %10 = vector.shape_cast %9 : vector<8x1xf32> to vector<1x8x1xf32>
    %11 = vector.broadcast %10 : vector<1x8x1xf32> to vector<1x8x128xf32>
    %12 = arith.mulf %7, %11 : vector<1x8x128xf32>
    %c0_12 = arith.constant 0 : index
    %c0_13 = arith.constant 0 : index
    %c0_14 = arith.constant 0 : index
    %13 = vector.load %arg5[%c0_12, %c0_13, %c0_14] : memref<2x8x128xf32, #tpu.memory_space<vmem>>, vector<1x8x128xf32>
    %14 = vector.shape_cast %13 : vector<1x8x128xf32> to vector<8x128xf32>
    %15 = vector.shape_cast %14 : vector<8x128xf32> to vector<1x8x128xf32>
    %16 = arith.addf %12, %15 : vector<1x8x128xf32>
    %cst_15 = arith.constant 0.000000e+00 : f32
    %17 = vector.broadcast %cst_15 : f32 to vector<1x8x128xf32>
    %18 = arith.maximumf %16, %17 : vector<1x8x128xf32>
    %c1 = arith.constant 1 : index
    %c0_16 = arith.constant 0 : index
    %c0_17 = arith.constant 0 : index
    %19 = vector.load %arg3[%c1, %c0_16, %c0_17] : memref<2x128x128xf32, #tpu.memory_space<vmem>>, vector<1x128x128xf32>
    %20 = vector.shape_cast %19 : vector<1x128x128xf32> to vector<128x128xf32>
    %21 = vector.shape_cast %18 : vector<1x8x128xf32> to vector<8x128xf32>
    %cst_18 = arith.constant dense<0.000000e+00> : vector<8x128xf32>
    %22 = tpu.matmul %21, %20, %cst_18 {dimension_numbers = #tpu.dot_dimension_numbers<[1], [0], [0], [1], [0, 0, 1, 1], [], []>, precision = #tpu.contract_precision<fp32>} : vector<8x128xf32>, vector<128x128xf32>, vector<8x128xf32> -> vector<8x128xf32>
    %23 = vector.shape_cast %22 : vector<8x128xf32> to vector<1x8x128xf32>
    "tpu.trace_start"() <{level = 10 : i32, message = "bij,bjh->bih"}> : () -> ()
    %cst_19 = arith.constant dense<0.000000e+00> : vector<1x8x128xf32>
    %24 = tpu.matmul %0, %23, %cst_19 {dimension_numbers = #tpu.dot_dimension_numbers<[2], [1], [1], [2], [0, 0, 0, 1, 1, 2], [0], [0]>, precision = #tpu.contract_precision<fp32>} : vector<1x8x8xf32>, vector<1x8x128xf32>, vector<1x8x128xf32> -> vector<1x8x128xf32>
    "tpu.trace_stop"() : () -> ()
    %c1_20 = arith.constant 1 : index
    %c0_21 = arith.constant 0 : index
    %c0_22 = arith.constant 0 : index
    %25 = vector.load %arg4[%c1_20, %c0_21, %c0_22] : memref<2x8x1xf32, #tpu.memory_space<vmem>>, vector<1x8x1xf32>
    %26 = vector.shape_cast %25 : vector<1x8x1xf32> to vector<8x1xf32>
    %27 = vector.shape_cast %26 : vector<8x1xf32> to vector<1x8x1xf32>
    %28 = vector.broadcast %27 : vector<1x8x1xf32> to vector<1x8x128xf32>
    %29 = arith.mulf %24, %28 : vector<1x8x128xf32>
    %c1_23 = arith.constant 1 : index
    %c0_24 = arith.constant 0 : index
    %c0_25 = arith.constant 0 : index
    %30 = vector.load %arg5[%c1_23, %c0_24, %c0_25] : memref<2x8x128xf32, #tpu.memory_space<vmem>>, vector<1x8x128xf32>
    %31 = vector.shape_cast %30 : vector<1x8x128xf32> to vector<8x128xf32>
    %32 = vector.shape_cast %31 : vector<8x128xf32> to vector<1x8x128xf32>
    %33 = arith.addf %29, %32 : vector<1x8x128xf32>
    %cst_26 = arith.constant 0.000000e+00 : f32
    %34 = vector.broadcast %cst_26 : f32 to vector<1x8x128xf32>
    %35 = arith.maximumf %33, %34 : vector<1x8x128xf32>
    %36 = vector.shape_cast %35 : vector<1x8x128xf32> to vector<1x1024xf32>
    %c0_27 = arith.constant 0 : index
    %c0_28 = arith.constant 0 : index
    %37 = vector.load %arg6[%c0_27, %c0_28] : memref<1024x128xf32, #tpu.memory_space<vmem>>, vector<1024x128xf32>
    %cst_29 = arith.constant dense<0.000000e+00> : vector<1x128xf32>
    %38 = tpu.matmul %36, %37, %cst_29 {dimension_numbers = #tpu.dot_dimension_numbers<[1], [0], [0], [1], [0, 0, 1, 1], [], []>, precision = #tpu.contract_precision<fp32>} : vector<1x1024xf32>, vector<1024x128xf32>, vector<1x128xf32> -> vector<1x128xf32>
    %c0_30 = arith.constant 0 : index
    %c0_31 = arith.constant 0 : index
    %39 = vector.load %arg7[%c0_30, %c0_31] : memref<1x128xf32, #tpu.memory_space<vmem>>, vector<1x128xf32>
    %40 = arith.addf %38, %39 : vector<1x128xf32>
    %41 = vector.shape_cast %40 : vector<1x128xf32> to vector<1x1x128xf32>
    %c0_32 = arith.constant 0 : index
    %c0_33 = arith.constant 0 : index
    %c0_34 = arith.constant 0 : index
    %42 = vector.load %arg8[%c0_32, %c0_33, %c0_34] : memref<1x1x128xf32, #tpu.memory_space<vmem>>, vector<1x1x128xf32>
    tpu.vector_store %arg8[%c0_32, %c0_33, %c0_34], %41 {strides = array<i32>} : memref<1x1x128xf32, #tpu.memory_space<vmem>>, vector<1x1x128xf32>,
    return
  }
  func.func @transform_0(%arg0: i32) -> (i32, i32, i32) {
    %c0_i32 = arith.constant 0 : i32
    %c0_i32_0 = arith.constant 0 : i32
    %c0_i32_1 = arith.constant 0 : i32
    return %arg0, %c0_i32, %c0_i32_0 : i32, i32, i32
  }
  func.func @transform_1(%arg0: i32) -> (i32, i32, i32) {
    %c0_i32 = arith.constant 0 : i32
    %c0_i32_0 = arith.constant 0 : i32
    %c0_i32_1 = arith.constant 0 : i32
    return %arg0, %c0_i32, %c0_i32_0 : i32, i32, i32
  }
  func.func @transform_2(%arg0: i32) -> (i32, i32, i32) {
    %c0_i32 = arith.constant 0 : i32
    %c0_i32_0 = arith.constant 0 : i32
    %c0_i32_1 = arith.constant 0 : i32
    %c0_i32_2 = arith.constant 0 : i32
    return %c0_i32, %c0_i32_0, %c0_i32_1 : i32, i32, i32
  }
  func.func @transform_3(%arg0: i32) -> (i32, i32, i32) {
    %c0_i32 = arith.constant 0 : i32
    %c0_i32_0 = arith.constant 0 : i32
    %c0_i32_1 = arith.constant 0 : i32
    %c0_i32_2 = arith.constant 0 : i32
    return %c0_i32, %c0_i32_0, %c0_i32_1 : i32, i32, i32
  }
  func.func @transform_4(%arg0: i32) -> (i32, i32, i32) {
    %c0_i32 = arith.constant 0 : i32
    %c0_i32_0 = arith.constant 0 : i32
    %c0_i32_1 = arith.constant 0 : i32
    %c0_i32_2 = arith.constant 0 : i32
    return %c0_i32, %c0_i32_0, %c0_i32_1 : i32, i32, i32
  }
  func.func @transform_5(%arg0: i32) -> (i32, i32) {
    %c0_i32 = arith.constant 0 : i32
    %c0_i32_0 = arith.constant 0 : i32
    %c0_i32_1 = arith.constant 0 : i32
    return %c0_i32, %c0_i32_0 : i32, i32
  }
  func.func @transform_6(%arg0: i32) -> (i32, i32) {
    %c0_i32 = arith.constant 0 : i32
    %c0_i32_0 = arith.constant 0 : i32
    %c0_i32_1 = arith.constant 0 : i32
    return %c0_i32, %c0_i32_0 : i32, i32
  }
  func.func @transform_7(%arg0: i32) -> (i32, i32, i32) {
    %c0_i32 = arith.constant 0 : i32
    %c0_i32_0 = arith.constant 0 : i32
    %c0_i32_1 = arith.constant 0 : i32
    return %arg0, %c0_i32, %c0_i32_0 : i32, i32, i32
  }
}

</mosaic_0001>

<bundles_post_ra>
// kernel: tpu_custom_call.1
= control target key start
LH: loop header
LB: loop body
LE: loop exit
PB: predicated region body
PF: predicated region fallthrough
CT: control target
= control target key end

     0   :  { %s11405_s0 = inlined_call_operand.vmem [shape: f32[2,8,8], index: 0, kind: input, shape index: {}]   ;;  %s11406_s1 = inlined_call_operand.hbm [shape: f32[2,8,128], index: 1, kind: input, shape index: {}]   ;;  %s11407_s2 = inlined_call_operand.hbm [shape: f32[2,128,128], index: 2, kind: input, shape index: {}]   ;;  %s11408_s3 = inlined_call_operand.vmem [shape: f32[2,8,1], index: 3, kind: input, shape index: {}]   ;;  %s11409_s4 = inlined_call_operand.hbm [shape: f32[2,8,128], index: 4, kind: input, shape index: {}]   ;;  %s11410_s5 = inlined_call_operand.hbm [shape: f32[1024,128], index: 5, kind: input, shape index: {}]   ;;  %s11411_s6 = inlined_call_operand.vmem [shape: f32[1,128], index: 6, kind: input, shape index: {}]   ;;  %s11412_s7 = inlined_call_operand.hbm [shape: f32[2,1,128], index: 7, kind: output, shape index: {}]  }
   0x1   :  { %11670 = sst [smem:[#allocation43_spill]] %s11407_s2 }
   0x2   :  { %11671 = sst [smem:[#allocation44_spill]] %s11409_s4 }
   0x3   :  { %12 = vsyncpa [#allocation3], 0 }
   0x4   :  { %14 = vsyncpa [#allocation3 + $0x1], 0 }
   0x5   :  { %15 = vsyncpa [#allocation6], 0 }
   0x6   :  { %16 = vsyncpa [#allocation9], 0 }
   0x7   :  { %17 = vsyncpa [#allocation4], 0 }
   0x8   :  { %19 = vsyncpa [#allocation4 + $0x1], 0  ;;  %s8219_s24 = smov 0   ;;  %s8221_s25 = smov 0  }
   0x9   :  { %s8223_s26 = smov 0   ;;  %s8225_s27 = smov 0  }
   0xa LB: > { %s8240_s28 = sadd.s32 4294967295, %s8165_s27   ;;  %s6336_s29 = sadd.s32 4294967294, %s8165_s27   ;;  %s8165_s27 = sphi %s8225_s27, %s12132_s27   ;;  %s8161_s26 = sphi %s8223_s26, %s12131_s26   ;;  %s8157_s25 = sphi %s8221_s25, %s12130_s25   ;;  %s8153_s24 = sphi %s8219_s24, %s12129_s24  }
   0xb   : > { %p71_p0 = scmp.ne.s32.totalorder %s8157_s25, %s8153_s24  ;;  %p11413_p1 = scmp.eq.s32.totalorder %s8240_s28, 0 }
   0xc   : > { %p206_p3 = scmp.eq.s32.totalorder %s6336_s29, 1  ;;  %p6337_p5 = scmp.ge.s32.totalorder %s8165_s27, 1 }
   0xd   : > { %p8249_p4 = por %p11413_p1, %p71_p0  ;;  %p213_p7 = scmp.lt.s32.totalorder %s8165_s27, 3 }
   0xe   : > { %p8254_p6 = por %p206_p3, %p71_p0  ;;  %s8167_s10 = smov [#allocation5]  }
   0xf   : > { %s11672_s30 = scalar_select %p8249_p4, 1, 0 }
  0x10   : > { %s11673_s8 = scalar_select %p8254_p6, 1, 0 }
  0x11   : > { %p8259_p8 = pnand %p6337_p5, %p213_p7  ;;  %s225_s11 = sshll.u32 %s8167_s10, 4  ;;  %s226_s11 = int_to_ptr.vmem [resolvable:$true] %s225_s11 }
  0x12   : > { %s8168_s13 = smov [#allocation7]   ;;  %s8169_s15 = smov [#allocation8]  }
  0x13   : > { %s11674_s9 = scalar_select %p8259_p8, 1, 0 }
  0x14   : > { %p7918_p9 = pneg %p8259_p8  ;;  %s241_s14 = sshll.u32 %s8168_s13, 4  ;;  %s242_s14 = int_to_ptr.vmem [resolvable:$true] %s241_s14 }
  0x15   : > { %s254_s16 = sshll.u32 %s8169_s15, 4  ;;  %s7998_s17 = scalar_lea.vmem %s226_s11, 4096  ;;  %s255_s16 = int_to_ptr.vmem [resolvable:$true] %s254_s16 }
  0x16   : > { %p8268_p11 = pnand %p7918_p9, %p11413_p1  ;;  %p7999_p13 = scmp.ne.s32.totalorder %s226_s11, %s7998_s17 }
  0x17   : > { %p8006_p5 = scmp.lt.s32.totalorder %s226_s11, %s226_s11  ;;  %p8007_p7 = scmp.lt.s32.totalorder %s7998_s17, %s7998_s17 }
  0x18   : > { %p7989_p12 = pneg %p8268_p11 }
  0x19   : > { %p8008_p9 = por %p8007_p7, %p8006_p5 }
  0x1a   : > { %p8001_p0 = pnand %p7999_p13, %p7989_p12 }
  0x1c   : > { %p8002_p3 = pneg %p8001_p0 }
  0x1e   : > { %p8009_p10 = pnand %p8008_p9, %p8002_p3 }
  0x20   : > { %8012 = shalt.err (!%p8009_p10)
}
  0x21   : > { %s8170_s18 = smov 128   ;;  %s8171_s19 = smov 8  }
  0x22   : > { %s11676_s2 = sld [smem:[#allocation43_spill]]  ;;  %s8024_s22 = scalar_lea.vmem %s242_s14, 256 }
  0x23   : > { %p8025_p1 = scmp.ne.s32.totalorder %s242_s14, %s8024_s22  ;;  %p8032_p2 = scmp.lt.s32.totalorder %s242_s14, %s242_s14 }
  0x24   : > { %p8033_p6 = scmp.lt.s32.totalorder %s8024_s22, %s8024_s22 }
  0x25   : > { %p8027_p13 = pnand %p8025_p1, %p7989_p12 }
  0x26   : > { %p8034_p5 = por %p8033_p6, %p8032_p2 }
  0x27   : > { %p8028_p0 = pneg %p8027_p13 }
  0x28   : > { %7921 = dma.hbm_to_vmem [thread:$0]  (!%p8268_p11), %s11676_s2, 4096, %s226_s11, [#allocation6], %s8170_s18, %s8170_s18, %s8171_s19  }
  0x29   : > { %p8035_p3 = pnand %p8034_p5, %p8028_p0 }
  0x2b   : > { %8038 = shalt.err (!%p8035_p3)
}
  0x2c   : > { %s11677_s4 = sld [smem:[#allocation44_spill]]  ;;  %s8050_s10 = scalar_lea.vmem %s255_s16, 16384 }
  0x2d   : > { %p8051_p10 = scmp.ne.s32.totalorder %s255_s16, %s8050_s10  ;;  %p8058_p9 = scmp.lt.s32.totalorder %s255_s16, %s255_s16 }
  0x2e   : > { %p8059_p13 = scmp.lt.s32.totalorder %s8050_s10, %s8050_s10 }
  0x2f   : > { %p8053_p7 = pnand %p8051_p10, %p7989_p12 }
  0x30   : > { %p8060_p4 = por %p8059_p13, %p8058_p9 }
  0x31   : > { %p8054_p1 = pneg %p8053_p7 }
  0x32   : > { %7924 = dma.hbm_to_vmem [thread:$0]  (!%p8268_p11), %s11677_s4, 256, %s242_s14, [#allocation6], %s8170_s18, %s8170_s18, %s8171_s19  }
  0x33   : > { %p8061_p2 = pnand %p8060_p4, %p8054_p1 }
  0x35   : > { %8064 = shalt.err (!%p8061_p2)
}
  0x36   : > { %7927 = dma.hbm_to_vmem [thread:$0]  (!%p8268_p11), %s11410_s5, 16384, %s255_s16, [#allocation9], %s8170_s18, %s8170_s18, %s8171_s19  }
  0x37   : > { %s8299_s14 = sadd.s32 1, %s8165_s27   ;;  %s58_s12 = sadd.s32 1, %s8161_s26 }
  0x38   : > { %s55_s15 = ssub.s32 %s8165_s27, %s8299_s14  ;;  %p65_p6 = scmp.ne.s32.totalorder %s8161_s26, %s8157_s25 }
  0x39   : > { %p56_p4 = scmp.eq.s32.totalorder %s55_s15, 0  ;;  %p66_p12 = scmp.eq.s32.totalorder %s8165_s27, 0 }
  0x3a   : > { %p7939_p0 = scmp.lt.s32.totalorder %s8165_s27, 2  ;;  %p11678_p3 = scmp.eq.s32.totalorder %s8240_s28, 1 }
  0x3b   : > { %s8309_s17 = scalar_select %p56_p4, %s8161_s26, %s58_s12  }
  0x3c   : > { %p67_p5 = por %p66_p12, %p65_p6  ;;  %p8313_p10 = por %p11678_p3, %p65_p6 }
  0x3d   : > { %s278_s21 = sand.u32 1, %s8161_s26   ;;  %s6343_s22 = sshll.u32 %s8165_s27, 7 }
  0x3e   : > { %s11679_s20 = scalar_select %p8313_p10, 1, 0 }
  0x3f   : > { %s6342_s16 = sshll.u32 %s278_s21, 3  ;;  %s8322_s23 = scalar_lea.hbm %s11406_s1, %s6343_s22 }
  0x40   : > { %s282_s29 = scalar_lea.vmem [#allocation2], %s6342_s16  ;;  %p8324_p11 = pnand %p7939_p0, %p67_p5 }
  0x41   : > { %s289_s10 = sshll.u32 %s282_s29, 4  ;;  %s279_s13 = scalar_lea.sflag [#allocation3], %s278_s21  ;;  %s290_s10 = int_to_ptr.vmem [resolvable:$true] %s289_s10 }
  0x42   : > { %s8065_s15 = scalar_lea.hbm %s8322_s23, 128  ;;  %p8067_p1 = pneg %p8324_p11 }
  0x43   : > { %p8066_p7 = scmp.ne.s32.totalorder %s8322_s23, %s8065_s15  ;;  %s8070_s18 = scalar_lea.hbm %s11406_s1, 256 }
  0x44   : > { %p8071_p2 = scmp.lt.s32.totalorder %s8322_s23, %s11406_s1  ;;  %p8072_p4 = scmp.lt.s32.totalorder %s8070_s18, %s8065_s15 }
  0x45   : > { %p8068_p9 = pnand %p8067_p1, %p8066_p7 }
  0x46   : > { %p8073_p6 = por %p8072_p4, %p8071_p2 }
  0x47   : > { %p8069_p13 = pneg %p8068_p9 }
  0x49   : > { %p8074_p12 = pnand %p8073_p6, %p8069_p13 }
  0x4b   : > { %8077 = shalt.err (!%p8074_p12)
}
  0x4c   : > { %s8078_s29 = scalar_lea.vmem %s290_s10, 128  ;;  %s8172_s21 = smov [#allocation2]  }
  0x4d   : > { %p8079_p0 = scmp.ne.s32.totalorder %s290_s10, %s8078_s29  ;;  %s8083_s2 = sshll.u32 %s8172_s21, 4  ;;  %s8084_s2 = int_to_ptr.vmem [resolvable:$false] %s8083_s2 }
  0x4e   : > { %s8085_s4 = scalar_lea.vmem %s8084_s2, 256  ;;  %p8086_p7 = scmp.lt.s32.totalorder %s290_s10, %s8084_s2 }
  0x4f   : > { %p8081_p5 = pnand %p8079_p0, %p8067_p1  ;;  %p8087_p9 = scmp.lt.s32.totalorder %s8085_s4, %s8078_s29 }
  0x51   : > { %p8082_p3 = pneg %p8081_p5  ;;  %p8088_p10 = por %p8087_p9, %p8086_p7 }
  0x53   : > { %p8089_p8 = pnand %p8088_p10, %p8082_p3 }
  0x55   : > { %8092 = shalt.err (!%p8089_p8)
}
  0x56   : > { %7931 = dma.hbm_to_vmem [thread:$0]  (!%p8324_p11), %s8322_s23, 128, %s290_s10, %s279_s13  }
  0x57   : > { %p11681_p13 = scmp.ne.s32.totalorder %s11674_s9, 0 }
  0x59   : > { %298 = sbr.rel (%p11681_p13) target bundleno = 1730 (0x6c2), region = 48 }
  0x5e   : > { %s8345_s15 = sand.u32 1, %s8157_s25   ;;  %p11682_p1 = scmp.ne.s32.totalorder %s11672_s30, 0 }
  0x5f   : > { %s6345_s12 = sshll.u32 %s8345_s15, 3  ;;  %s301_s22 = scalar_lea.sflag [#allocation3], %s8345_s15 }
  0x60   : > { %s8349_s2 = scalar_lea.vmem [#allocation2], %s6345_s12 }
  0x61   : > { %8136 = dma.done.wait (%p11682_p1), %s301_s22, 128  }
  0x62   : > { %8138 = vsyncadd (%p11682_p1), %s301_s22, 4294967168  ;;  %p11683_p8 = scmp.eq.s32.totalorder %s8240_s28, 0 }
  0x64   : > { %8140 = dma.done.wait (%p11683_p8), [#allocation6], 4352   ;;  %p11684_p10 = pmov %p11683_p8 }
  0x65   : > { %p11685_p11 = pmov %p11683_p8 }
  0x66   : > { %8142 = vsyncadd (%p11684_p10), [#allocation6], 4294962944 }
  0x67   : > { %8144 = dma.done.wait (%p11685_p11), [#allocation9], 16384   ;;  %p11686_p2 = pmov %p11683_p8 }
  0x68   : > { %v11450_v0 = vmov 0.0   ;;  %vm8174_vm0 = vmmov 0   ;;  %v371_v1 = vld [vmem:[#allocation5 + $0x78] sm:$0xff]  ;;  %v370_v2 = vld [vmem:[#allocation5 + $0x70] sm:$0xff]  ;;  %v369_v3 = vld [vmem:[#allocation5 + $0x68] sm:$0xff]  ;;  %p350_p4 = scmp.lt.s32.totalorder %s8240_s28, 1 }
  0x69   : > { %8146 = vsyncadd (%p11686_p2), [#allocation9], 4294950912  ;;  %7422 = vmatprep.subr.mxu0 %v11450_v0  ;;  %7457 = vmatprep.subr.mxu1 %v11450_v0  ;;  %v8369_v4 = vand.u32 4294901760, %v371_v1  ;;  %v8371_v5 = vand.u32 4294901760, %v370_v2  ;;  %v8373_v6 = vand.u32 4294901760, %v369_v3  ;;  %v368_v7 = vld [vmem:[#allocation5 + $0x60] sm:$0xff] }
  0x6a   : > { %7454 = vmatprep.mubr.msk.f32.mxu0 %vm8174_vm0, %v11450_v0  ;;  %7489 = vmatprep.mubr.msk.f32.mxu1 %vm8174_vm0, %v11450_v0  ;;  %v367_v8 = vld [vmem:[#allocation5 + $0x58] sm:$0xff]  ;;  %v366_v9 = vld [vmem:[#allocation5 + $0x50] sm:$0xff]  ;;  %v8375_v10 = vand.u32 4294901760, %v368_v7  ;;  %v365_v13 = vld [vmem:[#allocation5 + $0x48] sm:$0xff]  ;;  %s351_s10 = scalar_select %p350_p4, %s8240_s28, 1  ;;  %vm1013_vm1 = vcmask 64512  }
  0x6b   : > { %v8377_v11 = vand.u32 4294901760, %v367_v8  ;;  %v8379_v12 = vand.u32 4294901760, %v366_v9  ;;  %v364_v14 = vld [vmem:[#allocation5 + $0x40] sm:$0xff]  ;;  %7423 = vmatpush3.msra.mxu0 %v8369_v4  ;;  %v8383_v15 = vsub.f32 %v371_v1, %v8369_v4  ;;  %v8386_v16 = vsub.f32 %v370_v2, %v8371_v5  ;;  %v363_v19 = vld [vmem:[#allocation5 + $0x38] sm:$0xff]  ;;  %v362_v26 = vld [vmem:[#allocation5 + $0x30] sm:$0xff]  ;;  %s6351_s21 = sshll.u32 %s8240_s28, 4 }
  0x6c   : > { %v8388_v17 = vand.u32 4294901760, %v365_v13  ;;  %v8391_v18 = vsub.f32 %v369_v3, %v8373_v6  ;;  %7424 = vmatprep.subr.mxu0 %v11450_v0  ;;  %v8395_v20 = vsub.f32 %v368_v7, %v8375_v10  ;;  %v8404_v25 = vand.u32 4294901760, %v364_v14  ;;  %v361_v36 = vld [vmem:[#allocation5 + $0x28] sm:$0xff]  ;;  %v360_v41 = vld [vmem:[#allocation5 + $0x20] sm:$0xff]  ;;  %v359_v49 = vld [vmem:[#allocation5 + $0x18] sm:$0xff]  ;;  %s6349_s11 = sshll.u32 %s351_s10, 3  ;;  %s6227_s30 = scalar_lea.hbm %s11412_s7, %s6351_s21 }
  0x6d   : > { %v8398_v21 = vsub.f32 %v367_v8, %v8377_v11  ;;  %7425 = vmatpush3.msra.mxu0 %v8371_v5  ;;  %v466_v22 = vand.u32 4294901760, %v8383_v15  ;;  %v473_v23 = vand.u32 4294901760, %v8386_v16  ;;  %v8408_v28 = vand.u32 4294901760, %v363_v19  ;;  %v355_v50 = vld [vmem:[%s8349_s2] sm:$0xff]  ;;  %v357_v60 = vld [vmem:[#allocation5 + $0x8] sm:$0xff]  ;;  %v356_v7 = vld [vmem:[#allocation5] sm:$0xff]  ;;  %s353_s19 = scalar_lea.vmem %s11405_s0, %s6349_s11 }
  0x6e   : > { %v480_v24 = vand.u32 4294901760, %v8391_v18  ;;  %7426 = vmatprep.subr.mxu0 %v11450_v0  ;;  %v487_v27 = vand.u32 4294901760, %v8395_v20  ;;  %v8412_v30 = vsub.f32 %v366_v9, %v8379_v12  ;;  %v8425_v34 = vsub.f32 %v365_v13, %v8388_v17  ;;  %v358_v54 = vld [vmem:[#allocation5 + $0x10] sm:$0xff]  ;;  %s349_s12 = scalar_lea.vmem [#allocation10], %s8345_s15  ;;  %s6217_s9 = scalar_lea.sflag [#allocation4], %s8345_s15 }
  0x6f   : > { %v494_v29 = vand.u32 4294901760, %v8398_v21  ;;  %7427 = vmatpush3.msra.mxu0 %v8373_v6  ;;  %v467_v31 = vsub.f32 %v8383_v15, %v466_v22  ;;  %v474_v32 = vsub.f32 %v8386_v16, %v473_v23  ;;  %v8428_v35 = vand.u32 4294901760, %v362_v26  ;;  %s6229_s22 = sshll.u32 %s349_s12, 4  ;;  %p12126_p12 = scmp.ne.s32.totalorder %s11679_s20, 0  ;;  %s6230_s22 = int_to_ptr.vmem [resolvable:$true] %s6229_s22 }
  0x70   : > { %v481_v33 = vsub.f32 %v8391_v18, %v480_v24  ;;  %7428 = vmatprep.subr.mxu0 %v11450_v0  ;;  %v488_v39 = vsub.f32 %v8395_v20, %v487_v27  ;;  %v501_v40 = vand.u32 4294901760, %v8412_v30  ;;  %v8440_v43 = vsub.f32 %v364_v14, %v8404_v25  ;;  %s8093_s23 = scalar_lea.vmem %s6230_s22, 16  ;;  %s8178_s10 = smov [#allocation10]  }
  0x71   : > { %7429 = vmatpush3.msra.mxu0 %v8375_v10  ;;  %v468_v37 = vand.u32 4294901760, %v467_v31  ;;  %v475_v38 = vand.u32 4294901760, %v474_v32  ;;  %v495_v42 = vsub.f32 %v8398_v21, %v494_v29  ;;  %v8443_v45 = vand.u32 4294901760, %v361_v36  ;;  %p8094_p6 = scmp.ne.s32.totalorder %s6230_s22, %s8093_s23  ;;  %s8097_s11 = sshll.u32 %s8178_s10, 4  ;;  %s8098_s11 = int_to_ptr.vmem [resolvable:$false] %s8097_s11 }
  0x72   : > { %7430 = vmatprep.subr.mxu0 %v11450_v0  ;;  %v482_v44 = vand.u32 4294901760, %v481_v33  ;;  %v508_v46 = vand.u32 4294901760, %v8425_v34  ;;  %v8447_v47 = vsub.f32 %v363_v19, %v8408_v28  ;;  %v8451_v48 = vand.u32 4294901760, %v360_v41  ;;  %s8099_s28 = scalar_lea.vmem %s8098_s11, 32  ;;  %p8100_p3 = scmp.lt.s32.totalorder %s6230_s22, %s8098_s11 }
  0x73   : > { %7431 = vmatpush3.msra.mxu0 %v8377_v11  ;;  %7458 = vmatpush3.msra.mxu1 %v468_v37  ;;  %v489_v51 = vand.u32 4294901760, %v488_v39  ;;  %v502_v52 = vsub.f32 %v8412_v30, %v501_v40  ;;  %v515_v53 = vand.u32 4294901760, %v8440_v43  ;;  %v8460_v55 = vsub.f32 %v362_v26, %v8428_v35  ;;  %p8095_p0 = pnand %p8094_p6, %p12126_p12  ;;  %p8101_p7 = scmp.lt.s32.totalorder %s8099_s28, %s8093_s23 }
  0x74   : > { %7432 = vmatprep.subr.mxu0 %v11450_v0  ;;  %7459 = vmatprep.subr.mxu1 %v11450_v0  ;;  %v496_v56 = vand.u32 4294901760, %v495_v42  ;;  %v522_v57 = vand.u32 4294901760, %v8447_v47  ;;  %v509_v58 = vsub.f32 %v8425_v34, %v508_v46  ;;  %v8469_v59 = vand.u32 4294901760, %v359_v49 }
  0x75   : > { %7433 = vmatpush3.msra.mxu0 %v8379_v12  ;;  %7460 = vmatpush3.msra.mxu1 %v475_v38  ;;  %v8472_v61 = vsub.f32 %v361_v36, %v8443_v45  ;;  %v8474_v62 = vand.u32 4294901760, %v355_v50  ;;  %v8478_v63 = vand.u32 4294901760, %v358_v54  ;;  %v503_v1 = vand.u32 4294901760, %v502_v52  ;;  %p8096_p5 = pneg %p8095_p0  ;;  %p8102_p9 = por %p8101_p7, %p8100_p3 }
  0x76   : > { %7434 = vmatprep.subr.mxu0 %v11450_v0  ;;  %7461 = vmatprep.subr.mxu1 %v11450_v0  ;;  %v516_v2 = vsub.f32 %v8440_v43, %v515_v53  ;;  %v529_v3 = vand.u32 4294901760, %v8460_v55  ;;  %v8486_v8 = vsub.f32 %v360_v41, %v8451_v48  ;;  %v523_v9 = vsub.f32 %v8447_v47, %v522_v57 }
  0x77   : > { %7435 = vmatpush3.msra.mxu0 %v8388_v17  ;;  %7462 = vmatpush3.msra.mxu1 %v482_v44  ;;  %v8493_v13 = vand.u32 4294901760, %v357_v60  ;;  %v510_v14 = vand.u32 4294901760, %v509_v58  ;;  %v536_v19 = vand.u32 4294901760, %v8472_v61  ;;  %v8498_v26 = vsub.f32 %v355_v50, %v8474_v62  ;;  %p8103_p13 = pnand %p8102_p9, %p8096_p5 }
  0x78   : > { %7436 = vmatprep.subr.mxu0 %v11450_v0  ;;  %7463 = vmatprep.subr.mxu1 %v11450_v0  ;;  %v8501_v31 = vsub.f32 %v359_v49, %v8469_v59  ;;  %v8505_v32 = vand.u32 4294901760, %v356_v7  ;;  %v517_v33 = vand.u32 4294901760, %v516_v2  ;;  %v530_v36 = vsub.f32 %v8460_v55, %v529_v3 }
  0x79   : > { %7437 = vmatpush3.msra.mxu0 %v8404_v25  ;;  %7464 = vmatpush3.msra.mxu1 %v489_v51  ;;  %v543_v37 = vand.u32 4294901760, %v8486_v8  ;;  %v8513_v38 = vsub.f32 %v358_v54, %v8478_v63  ;;  %v524_v39 = vand.u32 4294901760, %v523_v9  ;;  %v537_v41 = vsub.f32 %v8472_v61, %v536_v19 }
  0x7a   : > { %7438 = vmatprep.subr.mxu0 %v11450_v0  ;;  %7465 = vmatprep.subr.mxu1 %v11450_v0  ;;  %v455_v42 = vand.u32 4294901760, %v8498_v26  ;;  %v550_v44 = vand.u32 4294901760, %v8501_v31  ;;  %v8524_v49 = vsub.f32 %v357_v60, %v8493_v13  ;;  %v531_v50 = vand.u32 4294901760, %v530_v36 }
  0x7b   : > { %7439 = vmatpush3.msra.mxu0 %v8408_v28  ;;  %7466 = vmatpush3.msra.mxu1 %v496_v56  ;;  %v544_v51 = vsub.f32 %v8486_v8, %v543_v37  ;;  %v557_v52 = vand.u32 4294901760, %v8513_v38  ;;  %v8534_v54 = vsub.f32 %v356_v7, %v8505_v32  ;;  %v538_v56 = vand.u32 4294901760, %v537_v41 }
  0x7c   : > { %7440 = vmatprep.subr.mxu0 %v11450_v0  ;;  %7467 = vmatprep.subr.mxu1 %v11450_v0  ;;  %v456_v58 = vsub.f32 %v8498_v26, %v455_v42  ;;  %v551_v60 = vsub.f32 %v8501_v31, %v550_v44 }
  0x7d   : > { %7441 = vmatpush3.msra.mxu0 %v8428_v35  ;;  %7468 = vmatpush3.msra.mxu1 %v503_v1  ;;  %v564_v1 = vand.u32 4294901760, %v8524_v49  ;;  %v545_v2 = vand.u32 4294901760, %v544_v51  ;;  %v558_v7 = vsub.f32 %v8513_v38, %v557_v52  ;;  %v571_v9 = vand.u32 4294901760, %v8534_v54 }
  0x7e   : > { %7442 = vmatprep.subr.mxu0 %v11450_v0  ;;  %7469 = vmatprep.subr.mxu1 %v11450_v0 }
  0x7f   : > { %7443 = vmatpush3.msra.mxu0 %v8443_v45  ;;  %7470 = vmatpush3.msra.mxu1 %v510_v14  ;;  %v457_v14 = vand.u32 4294901760, %v456_v58  ;;  %v565_v36 = vsub.f32 %v8524_v49, %v564_v1  ;;  %v572_v41 = vsub.f32 %v8534_v54, %v571_v9 }
  0x80   : > { %7444 = vmatprep.subr.mxu0 %v11450_v0  ;;  %7471 = vmatprep.subr.mxu1 %v11450_v0 }
  0x81   : > { %7445 = vmatpush3.msra.mxu0 %v8451_v48  ;;  %7472 = vmatpush3.msra.mxu1 %v517_v33  ;;  %v552_v33 = vand.u32 4294901760, %v551_v60  ;;  %v573_v51 = vand.u32 4294901760, %v572_v41 }
  0x82   : > { %7446 = vmatprep.subr.mxu0 %v11450_v0  ;;  %7473 = vmatprep.subr.mxu1 %v11450_v0 }
  0x83   : > { %7447 = vmatpush3.msra.mxu0 %v8469_v59  ;;  %7474 = vmatpush3.msra.mxu1 %v524_v39  ;;  %v559_v39 = vand.u32 4294901760, %v558_v7 }
  0x84   : > { %7448 = vmatprep.subr.mxu0 %v11450_v0  ;;  %7475 = vmatprep.subr.mxu1 %v11450_v0 }
  0x85   : > { %7449 = vmatpush3.msra.mxu0 %v8478_v63  ;;  %7476 = vmatpush3.msra.mxu1 %v531_v50  ;;  %v566_v50 = vand.u32 4294901760, %v565_v36 }
  0x86   : > { %7450 = vmatprep.subr.mxu0 %v11450_v0  ;;  %7477 = vmatprep.subr.mxu1 %v11450_v0 }
  0x87   : > { %7451 = vmatpush3.msra.mxu0 %v8493_v13  ;;  %7478 = vmatpush3.msra.mxu1 %v538_v56 }
  0x88   : > { %7452 = vmatprep.subr.mxu0 %v11450_v0  ;;  %7479 = vmatprep.subr.mxu1 %v11450_v0 }
  0x89   : > { %7453 = vmatpush3.msra.mxu0 %v8505_v32  ;;  %7480 = vmatpush3.msra.mxu1 %v545_v2 }
  0x8a   : > { %7481 = vmatprep.subr.mxu1 %v11450_v0  ;;  %7492 = vmatprep.subr.mxu0 %v11450_v0 }
  0x8b   : > { %7455 = vmatmul.mubr.f32.vlgmr.msra.gmra.mxu0 %v457_v14  ;;  %7482 = vmatpush3.msra.mxu1 %v552_v33 }
  0x8c   : > { %7493 = vmatpush3.msra.mxu0 %v8383_v15  ;;  %7483 = vmatprep.subr.mxu1 %v11450_v0 }
  0x8d   : > { %7494 = vmatprep.subr.mxu0 %v11450_v0  ;;  %7484 = vmatpush3.msra.mxu1 %v559_v39 }
  0x8e   : > { %7495 = vmatpush3.msra.mxu0 %v8386_v16  ;;  %7485 = vmatprep.subr.mxu1 %v11450_v0 }
  0x8f   : > { %7496 = vmatprep.subr.mxu0 %v11450_v0  ;;  %7486 = vmatpush3.msra.mxu1 %v566_v50 }
  0x90   : > { %7497 = vmatpush3.msra.mxu0 %v8391_v18  ;;  %7487 = vmatprep.subr.mxu1 %v11450_v0 }
  0x91   : > { %7498 = vmatprep.subr.mxu0 %v11450_v0  ;;  %7488 = vmatpush3.msra.mxu1 %v573_v51  ;;  %v1484_v51 = vld [vmem:[#allocation5 + $0xd0] sm:$0xff] }
  0x92   : > { %7499 = vmatpush3.msra.mxu0 %v8395_v20  ;;  %7490 = vmatmul.mubr.f32.vlgmr.msra.gmra.mxu1 %v8474_v62 }
  0x93   : > { %7500 = vmatprep.subr.mxu0 %v11450_v0  ;;  %7527 = vmatprep.subr.mxu1 %v11450_v0 }
  0x94   : > { %7501 = vmatpush3.msra.mxu0 %v8398_v21  ;;  %7528 = vmatpush3.msra.mxu1 %v8369_v4  ;;  %v354_v21 = vld [vmem:[%s353_s19] sm:$0xff] }
  0x95   : > { %7502 = vmatprep.subr.mxu0 %v11450_v0  ;;  %7529 = vmatprep.subr.mxu1 %v11450_v0 }
  0x96   : > { %7503 = vmatpush3.msra.mxu0 %v8412_v30  ;;  %7530 = vmatpush3.msra.mxu1 %v8371_v5 }
  0x97   : > { %7504 = vmatprep.subr.mxu0 %v11450_v0  ;;  %7531 = vmatprep.subr.mxu1 %v11450_v0 }
  0x98   : > { %7505 = vmatpush3.msra.mxu0 %v8425_v34  ;;  %7532 = vmatpush3.msra.mxu1 %v8373_v6 }
  0x99   : > { %7506 = vmatprep.subr.mxu0 %v11450_v0  ;;  %7533 = vmatprep.subr.mxu1 %v11450_v0 }
  0x9a   : > { %7507 = vmatpush3.msra.mxu0 %v8440_v43  ;;  %7534 = vmatpush3.msra.mxu1 %v8375_v10 }
  0x9b   : > { %7508 = vmatprep.subr.mxu0 %v11450_v0  ;;  %7535 = vmatprep.subr.mxu1 %v11450_v0 }
  0x9c   : > { %7509 = vmatpush3.msra.mxu0 %v8447_v47  ;;  %7536 = vmatpush3.msra.mxu1 %v8377_v11 }
  0x9d   : > { %7510 = vmatprep.subr.mxu0 %v11450_v0  ;;  %7537 = vmatprep.subr.mxu1 %v11450_v0 }
  0x9e   : > { %7511 = vmatpush3.msra.mxu0 %v8460_v55  ;;  %7538 = vmatpush3.msra.mxu1 %v8379_v12 }
  0x9f   : > { %7512 = vmatprep.subr.mxu0 %v11450_v0  ;;  %7539 = vmatprep.subr.mxu1 %v11450_v0 }
  0xa0   : > { %7513 = vmatpush3.msra.mxu0 %v8472_v61  ;;  %7540 = vmatpush3.msra.mxu1 %v8388_v17 }
  0xa1   : > { %7514 = vmatprep.subr.mxu0 %v11450_v0  ;;  %7541 = vmatprep.subr.mxu1 %v11450_v0 }
  0xa2   : > { %7515 = vmatpush3.msra.mxu0 %v8486_v8  ;;  %7542 = vmatpush3.msra.mxu1 %v8404_v25 }
  0xa3   : > { %7516 = vmatprep.subr.mxu0 %v11450_v0  ;;  %7543 = vmatprep.subr.mxu1 %v11450_v0 }
  0xa4   : > { %7517 = vmatpush3.msra.mxu0 %v8501_v31  ;;  %7544 = vmatpush3.msra.mxu1 %v8408_v28 }
  0xa5   : > { %7518 = vmatprep.subr.mxu0 %v11450_v0  ;;  %7545 = vmatprep.subr.mxu1 %v11450_v0 }
  0xa6   : > { %7519 = vmatpush3.msra.mxu0 %v8513_v38  ;;  %7546 = vmatpush3.msra.mxu1 %v8428_v35 }
  0xa7   : > { %7520 = vmatprep.subr.mxu0 %v11450_v0  ;;  %7547 = vmatprep.subr.mxu1 %v11450_v0 }
  0xa8   : > { %7521 = vmatpush3.msra.mxu0 %v8524_v49  ;;  %7548 = vmatpush3.msra.mxu1 %v8443_v45 }
  0xa9   : > { %7522 = vmatprep.subr.mxu0 %v11450_v0  ;;  %7549 = vmatprep.subr.mxu1 %v11450_v0 }
  0xaa   : > { %7523 = vmatpush3.msra.mxu0 %v8534_v54  ;;  %7524 = vmatprep.mubr.msk.f32.mxu0 %vm8174_vm0, %v11450_v0 }
  0xab   : > { %7550 = vmatpush3.msra.mxu1 %v8451_v48  ;;  %7525 = vmatmul.mubr.f32.vlgmr.msra.gmra.mxu0 %v8498_v26 }
  0xac   : > { %7551 = vmatprep.subr.mxu1 %v11450_v0  ;;  %7562 = vmatprep.subr.mxu0 %v11450_v0 }
  0xad   : > { %7552 = vmatpush3.msra.mxu1 %v8469_v59  ;;  %7563 = vmatpush3.msra.mxu0 %v466_v22  ;;  %v1015_v22 = vsel %vm1013_vm1, %v354_v21, 0 }
  0xae   : > { %7553 = vmatprep.subr.mxu1 %v11450_v0  ;;  %7564 = vmatprep.subr.mxu0 %v11450_v0 }
  0xaf   : > { %7554 = vmatpush3.msra.mxu1 %v8478_v63  ;;  %7565 = vmatpush3.msra.mxu0 %v473_v23  ;;  %v8744_v23 = vand.u32 4294901760, %v1015_v22 }
  0xb0   : > { %7555 = vmatprep.subr.mxu1 %v11450_v0  ;;  %7566 = vmatprep.subr.mxu0 %v11450_v0 }
  0xb1   : > { %7556 = vmatpush3.msra.mxu1 %v8493_v13  ;;  %7567 = vmatpush3.msra.mxu0 %v480_v24  ;;  %v8747_v24 = vsub.f32 %v1015_v22, %v8744_v23 }
  0xb2   : > { %7557 = vmatprep.subr.mxu1 %v11450_v0  ;;  %7568 = vmatprep.subr.mxu0 %v11450_v0 }
  0xb3   : > { %7558 = vmatpush3.msra.mxu1 %v8505_v32  ;;  %7559 = vmatprep.mubr.msk.f32.mxu1 %vm8174_vm0, %v11450_v0 }
  0xb4   : > { %7569 = vmatpush3.msra.mxu0 %v487_v27  ;;  %7560 = vmatmul.mubr.f32.vlgmr.msra.gmra.mxu1 %v455_v42 }
  0xb5   : > { %7570 = vmatprep.subr.mxu0 %v11450_v0  ;;  %7597 = vmatprep.subr.mxu1 %v11450_v0 }
  0xb6   : > { %7571 = vmatpush3.msra.mxu0 %v494_v29  ;;  %7598 = vmatpush3.msra.mxu1 %v8369_v4  ;;  %v1463_v4 = vld [vmem:[%s11408_s3] sm:$0xff]  ;;  %v8750_v29 = vand.u32 4294901760, %v8747_v24 }
  0xb7   : > { %7572 = vmatprep.subr.mxu0 %v11450_v0  ;;  %7599 = vmatprep.subr.mxu1 %v11450_v0 }
  0xb8   : > { %7573 = vmatpush3.msra.mxu0 %v501_v40  ;;  %7600 = vmatpush3.msra.mxu1 %v8371_v5  ;;  %v8175_v5 = vmov 0  }
  0xb9   : > { %7574 = vmatprep.subr.mxu0 %v11450_v0  ;;  %7601 = vmatprep.subr.mxu1 %v11450_v0 }
  0xba   : > { %7575 = vmatpush3.msra.mxu0 %v508_v46  ;;  %7602 = vmatpush3.msra.mxu1 %v8373_v6  ;;  %v6350_v6 = vld [vmem:[%s11408_s3 + $0x8] sm:$0xff] }
  0xbb   : > { %7576 = vmatprep.subr.mxu0 %v11450_v0  ;;  %7603 = vmatprep.subr.mxu1 %v11450_v0 }
  0xbc   : > { %7577 = vmatpush3.msra.mxu0 %v515_v53  ;;  %7604 = vmatpush3.msra.mxu1 %v8375_v10  ;;  %v1488_v53 = vld [vmem:[#allocation5 + $0xf0] sm:$0xff] }
  0xbd   : > { %7578 = vmatprep.subr.mxu0 %v11450_v0  ;;  %7605 = vmatprep.subr.mxu1 %v11450_v0 }
  0xbe   : > { %7579 = vmatpush3.msra.mxu0 %v522_v57  ;;  %7606 = vmatpush3.msra.mxu1 %v8377_v11 }
  0xbf   : > { %7580 = vmatprep.subr.mxu0 %v11450_v0  ;;  %7607 = vmatprep.subr.mxu1 %v11450_v0 }
  0xc0   : > { %7581 = vmatpush3.msra.mxu0 %v529_v3  ;;  %7608 = vmatpush3.msra.mxu1 %v8379_v12 }
  0xc1   : > { %7582 = vmatprep.subr.mxu0 %v11450_v0  ;;  %7609 = vmatprep.subr.mxu1 %v11450_v0 }
  0xc2   : > { %7583 = vmatpush3.msra.mxu0 %v536_v19  ;;  %7610 = vmatpush3.msra.mxu1 %v8388_v17  ;;  %v1485_v19 = vld [vmem:[#allocation5 + $0xd8] sm:$0xff] }
  0xc3   : > { %7584 = vmatprep.subr.mxu0 %v11450_v0  ;;  %7611 = vmatprep.subr.mxu1 %v11450_v0 }
  0xc4   : > { %7585 = vmatpush3.msra.mxu0 %v543_v37  ;;  %7612 = vmatpush3.msra.mxu1 %v8404_v25 }
  0xc5   : > { %7586 = vmatprep.subr.mxu0 %v11450_v0  ;;  %7613 = vmatprep.subr.mxu1 %v11450_v0 }
  0xc6   : > { %7587 = vmatpush3.msra.mxu0 %v550_v44  ;;  %7614 = vmatpush3.msra.mxu1 %v8408_v28  ;;  %v8782_v44 = vand.u32 4294901760, %v1485_v19 }
  0xc7   : > { %7588 = vmatprep.subr.mxu0 %v11450_v0  ;;  %7615 = vmatprep.subr.mxu1 %v11450_v0 }
  0xc8   : > { %7589 = vmatpush3.msra.mxu0 %v557_v52  ;;  %7616 = vmatpush3.msra.mxu1 %v8428_v35  ;;  %v1086_v35 = vsub.f32 %v8747_v24, %v8750_v29  ;;  %v8798_v58 = vsub.f32 %v1485_v19, %v8782_v44 }
  0xc9   : > { %7590 = vmatprep.subr.mxu0 %v11450_v0  ;;  %7617 = vmatprep.subr.mxu1 %v11450_v0 }
  0xca   : > { %7591 = vmatpush3.msra.mxu0 %v564_v1  ;;  %7618 = vmatpush3.msra.mxu1 %v8443_v45  ;;  %v1489_v45 = vld [vmem:[#allocation5 + $0xf8] sm:$0xff] }
  0xcb   : > { %7592 = vmatprep.subr.mxu0 %v11450_v0  ;;  %7619 = vmatprep.subr.mxu1 %v11450_v0  ;;  %v8756_v57 = vand.u32 4294901760, %v1489_v45 }
  0xcc   : > { %7593 = vmatpush3.msra.mxu0 %v571_v9  ;;  %7594 = vmatprep.mubr.msk.f32.mxu0 %vm8174_vm0, %v11450_v0  ;;  %v1612_v9 = vand.u32 4294901760, %v8798_v58 }
  0xcd   : > { %7620 = vmatpush3.msra.mxu1 %v8451_v48  ;;  %7595 = vmatmul.mubr.f32.vlgmr.msra.gmra.mxu0 %v8474_v62  ;;  %v8754_v48 = vand.u32 4294901760, %v1086_v35  ;;  %v8765_v8 = vsub.f32 %v1489_v45, %v8756_v57 }
  0xce   : > { %7621 = vmatprep.subr.mxu1 %v11450_v0  ;;  %7629 = vmatprep.mubr.msk.f32.mxu1 %vm8174_vm0, %v11450_v0  ;;  %v1613_v39 = vsub.f32 %v8798_v58, %v1612_v9 }
  0xcf   : > { %7622 = vmatpush3.msra.mxu1 %v8469_v59  ;;  %7632 = vmatprep.subr.mxu0 %v11450_v0  ;;  %v1487_v59 = vld [vmem:[#allocation5 + $0xe8] sm:$0xff]  ;;  %v1584_v38 = vand.u32 4294901760, %v8765_v8 }
  0xd0   : > { %7623 = vmatprep.subr.mxu1 %v11450_v0  ;;  %7634 = vmatprep.mubr.msk.f32.mxu0 %vm8174_vm0, %v11450_v0  ;;  %v1614_v50 = vand.u32 4294901760, %v1613_v39 }
  0xd1   : > { %7624 = vmatpush3.msra.mxu1 %v8478_v63  ;;  %7986 = vset.pattern.permute.xlu0 %v8175_v5  ;;  %v1486_v63 = vld [vmem:[#allocation5 + $0xe0] sm:$0xff]  ;;  %v1585_v54 = vsub.f32 %v8765_v8, %v1584_v38  ;;  %v1483_v5 = vld [vmem:[#allocation5 + $0xc8] sm:$0xff] }
  0xd2   : > { %7625 = vmatprep.subr.mxu1 %v11450_v0  ;;  %1466 = vperm.xlu0 %7986, %v1463_v4   ;;  %v8840_v4 = vand.u32 4294901760, %v1484_v51 }
  0xd3   : > { %7626 = vmatpush3.msra.mxu1 %v8493_v13  ;;  %v8767_v13 = vand.u32 4294901760, %v1487_v59  ;;  %v1586_v2 = vand.u32 4294901760, %v1585_v54 }
  0xd4   : > { %7627 = vmatprep.subr.mxu1 %v11450_v0 }
  0xd5   : > { %7628 = vmatpush3.msra.mxu1 %v8505_v32  ;;  %v8773_v32 = vand.u32 4294901760, %v1486_v63  ;;  %v8780_v42 = vsub.f32 %v1487_v59, %v8767_v13 }
  0xd6   : > { %7630 = vmatmul.mubr.f32.vlgmr.msra.gmra.mxu1 %v8474_v62  ;;  %7637 = vmatprep.subr.mxu1 %v11450_v0  ;;  %v8758_v62 = vand.u32 4294901760, %v1488_v53 }
  0xd7   : > { %7639 = vmatprep.mubr.msk.f32.mxu1 %vm8174_vm0, %v11450_v0  ;;  %2581 = vperm.xlu0 %7986, %v6350_v6   ;;  %v8787_v52 = vsub.f32 %v1486_v63, %v8773_v32  ;;  %v1598_v56 = vand.u32 4294901760, %v8780_v42  ;;  %v8843_v6 = vsub.f32 %v1484_v51, %v8840_v4  ;;  %v1475_v51 = vld [vmem:[#allocation5 + $0x88] sm:$0xff] }
  0xd8   : > { %v8771_v31 = vsub.f32 %v1488_v53, %v8758_v62 }
  0xd9   : > { %v1605_v1 = vand.u32 4294901760, %v8787_v52  ;;  %v1599_v7 = vsub.f32 %v8780_v42, %v1598_v56 }
  0xda   : > { %v1591_v49 = vand.u32 4294901760, %v8771_v31 }
  0xdb   : > { %v1606_v33 = vsub.f32 %v8787_v52, %v1605_v1  ;;  %v1600_v36 = vand.u32 4294901760, %v1599_v7 }
  0xdc   : > { %v1592_v60 = vsub.f32 %v8771_v31, %v1591_v49 }
  0xdd   : > { %v1607_v41 = vand.u32 4294901760, %v1606_v33 }
  0xde   : > { %v1593_v14 = vand.u32 4294901760, %v1592_v60 }
 0x14b   : > { %v459_v10 = vpop.f32.mrf.mxu0 }
 0x14d   : > { %v7456_v11 = vpop.f32.mrf.mxu0 }
 0x14e   : > { %v1482_v11 = vld [vmem:[#allocation5 + $0xc0] sm:$0xff] }
 0x152   : > { %v610_v12 = vpop.f32.mrf.mxu1 }
 0x153   : > { %v611_v27 = vadd.f32 %v610_v12, %v459_v10  ;;  %v8845_v10 = vand.u32 4294901760, %v1483_v5  ;;  %v11427_v12 = vand.u32 4294901760, %v8843_v6 }
 0x154   : > { %v7491_v15 = vpop.f32.mrf.mxu1 }
 0x155   : > { %v8851_v15 = vsub.f32 %v1483_v5, %v8845_v10 }
 0x16b   : > { %v714_v16 = vpop.f32.mrf.mxu0 }
 0x16c   : > { %v715_v30 = vadd.f32 %v714_v16, %v611_v27  ;;  %v8853_v16 = vand.u32 4294901760, %v1482_v11 }
 0x16d   : > { %v7526_v17 = vpop.f32.mrf.mxu0 }
 0x16e   : > { %v1481_v17 = vld [vmem:[#allocation5 + $0xb8] sm:$0xff]  ;;  %v8862_v21 = vsub.f32 %v1482_v11, %v8853_v16 }
 0x16f   : > { %v8864_v22 = vand.u32 4294901760, %v1481_v17 }
 0x174   : > { %v803_v18 = vpop.f32.mrf.mxu1 }
 0x175   : > { %v804_v34 = vadd.f32 %v803_v18, %v715_v30  ;;  %v1620_v18 = vsub.f32 %v8843_v6, %v11427_v12  ;;  %v11425_v30 = vand.u32 4294901760, %v8862_v21 }
 0x176   : > { %v7561_v20 = vpop.f32.mrf.mxu1 }
 0x177   : > { %v11426_v20 = vand.u32 4294901760, %v8851_v15  ;;  %v1621_v27 = vand.u32 4294901760, %v1620_v18  ;;  %v1634_v45 = vsub.f32 %v8862_v21, %v11425_v30 }
 0x179   : > { %v1635_v59 = vand.u32 4294901760, %v1634_v45 }
 0x18d   : > { %v922_v25 = vpop.f32.mrf.mxu0 }
 0x18e   : > { %v923_v40 = vadd.f32 %v922_v25, %v804_v34  ;;  %v1480_v25 = vld [vmem:[#allocation5 + $0xb0] sm:$0xff]  ;;  %v8873_v34 = vsub.f32 %v1481_v17, %v8864_v22 }
 0x18f   : > { %v7596_v28 = vpop.f32.mrf.mxu0  ;;  %v8876_v35 = vand.u32 4294901760, %v1480_v25 }
 0x190   : > { %v1627_v28 = vsub.f32 %v8851_v15, %v11426_v20 }
 0x191   : > { %v8887_v53 = vsub.f32 %v1480_v25, %v8876_v35  ;;  %v8934_v25 = vand.u32 4294901760, %v1475_v51 }
 0x193   : > { %v11423_v19 = vand.u32 4294901760, %v8887_v53 }
 0x195   : > { %v1648_v7 = vsub.f32 %v8887_v53, %v11423_v19  ;;  %v1467_v19 = vpop.permute.xlu0 %1466 }
 0x196   : > { %v1009_v43 = vpop.f32.mrf.mxu1 }
 0x197   : > { %v1010_v46 = vadd.f32 %v1009_v43, %v923_v40  ;;  %v1479_v40 = vld [vmem:[#allocation5 + $0xa8] sm:$0xff]  ;;  %v1628_v43 = vand.u32 4294901760, %v1627_v28 }
 0x198   : > { %v7631_v47 = vpop.f32.mrf.mxu1 }
 0x199   : > { %v1048_v55 = vand.u32 4294901760, %v1010_v46  ;;  %v8883_v47 = vand.u32 4294901760, %v1479_v40 }
 0x19b   : > { %v1125_v61 = vsub.f32 %v1010_v46, %v1048_v55  ;;  %7633 = vmatpush3.msra.mxu0 %v1048_v55  ;;  %v11424_v46 = vand.u32 4294901760, %v8873_v34  ;;  %v8894_v63 = vsub.f32 %v1479_v40, %v8883_v47 }
 0x19c   : > { %7635 = vmatmul.mubr.f32.vlgmr.msra.gmra.mxu0 %v8754_v48  ;;  %7642 = vmatprep.subr.mxu0 %v11450_v0 }
 0x19d   : > { %v1126_v3 = vand.u32 4294901760, %v1125_v61  ;;  %7643 = vmatpush3.msra.mxu0 %v1125_v61  ;;  %7644 = vmatprep.mubr.msk.f32.mxu0 %vm8174_vm0, %v11450_v0  ;;  %v11422_v54 = vand.u32 4294901760, %v8894_v63 }
 0x19e   : > { %7652 = vmatprep.subr.mxu0 %v11450_v0 }
 0x19f   : > { %v1127_v26 = vsub.f32 %v1125_v61, %v1126_v3  ;;  %v1641_v61 = vsub.f32 %v8873_v34, %v11424_v46  ;;  %v1655_v33 = vsub.f32 %v8894_v63, %v11422_v54 }
 0x1a0   : > { %7645 = vmatmul.mubr.f32.vlgmr.msra.gmra.mxu0 %v8747_v24 }
 0x1a1   : > { %7653 = vmatpush3.msra.mxu0 %v1126_v3  ;;  %v1128_v37 = vand.u32 4294901760, %v1127_v26  ;;  %7654 = vmatprep.mubr.msk.f32.mxu0 %vm8174_vm0, %v11450_v0  ;;  %v1477_v26 = vld [vmem:[#allocation5 + $0x98] sm:$0xff]  ;;  %v1656_v5 = vand.u32 4294901760, %v1655_v33 }
 0x1a2   : > { %7662 = vmatprep.subr.mxu0 %v11450_v0 }
 0x1a3   : > { %7638 = vmatpush3.msra.mxu1 %v1128_v37  ;;  %v1642_v37 = vand.u32 4294901760, %v1641_v61 }
 0x1a4   : > { %7640 = vmatmul.mubr.f32.vlgmr.msra.gmra.mxu1 %v8744_v23  ;;  %7647 = vmatprep.subr.mxu1 %v11450_v0 }
 0x1a5   : > { %7648 = vmatpush3.msra.mxu1 %v1048_v55  ;;  %7649 = vmatprep.mubr.msk.f32.mxu1 %vm8174_vm0, %v11450_v0 }
 0x1a6   : > { %7657 = vmatprep.subr.mxu1 %v11450_v0  ;;  %7655 = vmatmul.mubr.f32.vlgmr.msra.gmra.mxu0 %v8744_v23 }
 0x1a7   : > { %7663 = vmatpush3.msra.mxu0 %v8756_v57  ;;  %7694 = vmatprep.mubr.msk.f32.mxu0 %vm8174_vm0, %v11450_v0 }
 0x1a8   : > { %7650 = vmatmul.mubr.f32.vlgmr.msra.gmra.mxu1 %v8750_v29  ;;  %7664 = vmatprep.subr.mxu0 %v11450_v0 }
 0x1a9   : > { %7658 = vmatpush3.msra.mxu1 %v1048_v55  ;;  %7659 = vmatprep.mubr.msk.f32.mxu1 %vm8174_vm0, %v11450_v0  ;;  %v1478_v55 = vld [vmem:[#allocation5 + $0xa0] sm:$0xff] }
 0x1aa   : > { %7697 = vmatprep.subr.mxu1 %v11450_v0  ;;  %7665 = vmatpush3.msra.mxu0 %v8758_v62  ;;  %v8896_v3 = vand.u32 4294901760, %v1478_v55 }
 0x1ab   : > { %7666 = vmatprep.subr.mxu0 %v11450_v0 }
 0x1ac   : > { %7660 = vmatmul.mubr.f32.vlgmr.msra.gmra.mxu1 %v8744_v23  ;;  %7667 = vmatpush3.msra.mxu0 %v8767_v13  ;;  %v8904_v60 = vsub.f32 %v1478_v55, %v8896_v3  ;;  %v8946_v55 = vsub.f32 %v1475_v51, %v8934_v25 }
 0x1ad   : > { %7698 = vmatpush3.msra.mxu1 %v1586_v2  ;;  %7668 = vmatprep.subr.mxu0 %v11450_v0  ;;  %v8906_v2 = vand.u32 4294901760, %v1477_v26 }
 0x1ae   : > { %7699 = vmatprep.subr.mxu1 %v11450_v0  ;;  %7669 = vmatpush3.msra.mxu0 %v8773_v32 }
 0x1af   : > { %7700 = vmatpush3.msra.mxu1 %v1593_v14  ;;  %7670 = vmatprep.subr.mxu0 %v11450_v0  ;;  %v1476_v14 = vld [vmem:[#allocation5 + $0x90] sm:$0xff]  ;;  %v8919_v39 = vsub.f32 %v1477_v26, %v8906_v2 }
 0x1b0   : > { %7701 = vmatprep.subr.mxu1 %v11450_v0  ;;  %7671 = vmatpush3.msra.mxu0 %v8782_v44 }
 0x1b1   : > { %7702 = vmatpush3.msra.mxu1 %v1600_v36  ;;  %7672 = vmatprep.subr.mxu0 %v11450_v0  ;;  %v11421_v36 = vand.u32 4294901760, %v8904_v60  ;;  %v11420_v17 = vand.u32 4294901760, %v8919_v39 }
 0x1b2   : > { %7703 = vmatprep.subr.mxu1 %v11450_v0  ;;  %7729 = vmatprep.mubr.msk.f32.mxu1 %vm8174_vm0, %v11450_v0 }
 0x1b3   : > { %7704 = vmatpush3.msra.mxu1 %v1607_v41  ;;  %7673 = vmatpush3.msra.mxu0 %v8840_v4  ;;  %v8921_v41 = vand.u32 4294901760, %v1476_v14  ;;  %v1662_v11 = vsub.f32 %v8904_v60, %v11421_v36  ;;  %v1669_v40 = vsub.f32 %v8919_v39, %v11420_v17 }
 0x1b4   : > { %7705 = vmatprep.subr.mxu1 %v11450_v0  ;;  %7674 = vmatprep.subr.mxu0 %v11450_v0 }
 0x1b5   : > { %7706 = vmatpush3.msra.mxu1 %v1614_v50  ;;  %7675 = vmatpush3.msra.mxu0 %v8845_v10  ;;  %v1649_v50 = vand.u32 4294901760, %v1648_v7  ;;  %v8931_v18 = vsub.f32 %v1476_v14, %v8921_v41  ;;  %v1663_v28 = vand.u32 4294901760, %v1662_v11 }
 0x1b6   : > { %7707 = vmatprep.subr.mxu1 %v11450_v0  ;;  %7676 = vmatprep.subr.mxu0 %v11450_v0 }
 0x1b7   : > { %7677 = vmatpush3.msra.mxu0 %v8853_v16  ;;  %7708 = vmatpush3.msra.mxu1 %v1621_v27  ;;  %v1474_v27 = vld [vmem:[#allocation5 + $0x80] sm:$0xff] }
 0x1b8   : > { %7678 = vmatprep.subr.mxu0 %v11450_v0  ;;  %7709 = vmatprep.subr.mxu1 %v11450_v0  ;;  %v8942_v45 = vand.u32 4294901760, %v1474_v27 }
 0x1b9   : > { %7679 = vmatpush3.msra.mxu0 %v8864_v22  ;;  %7710 = vmatpush3.msra.mxu1 %v1628_v43  ;;  %v11418_v43 = vand.u32 4294901760, %v8931_v18 }
 0x1ba   : > { %7680 = vmatprep.subr.mxu0 %v11450_v0  ;;  %7711 = vmatprep.subr.mxu1 %v11450_v0  ;;  %v8954_v26 = vsub.f32 %v1474_v27, %v8942_v45 }
 0x1bb   : > { %7681 = vmatpush3.msra.mxu0 %v8876_v35  ;;  %7712 = vmatpush3.msra.mxu1 %v1635_v59  ;;  %v1670_v59 = vand.u32 4294901760, %v1669_v40  ;;  %v1676_v61 = vsub.f32 %v8931_v18, %v11418_v43 }
 0x1bc   : > { %7682 = vmatprep.subr.mxu0 %v11450_v0  ;;  %7713 = vmatprep.subr.mxu1 %v11450_v0  ;;  %v11419_v14 = vand.u32 4294901760, %v8954_v26 }
 0x1bd   : > { %7683 = vmatpush3.msra.mxu0 %v8883_v47  ;;  %7714 = vmatpush3.msra.mxu1 %v1642_v37  ;;  %v11417_v37 = vand.u32 4294901760, %v8946_v55  ;;  %v1677_v7 = vand.u32 4294901760, %v1676_v61 }
 0x1be   : > { %7684 = vmatprep.subr.mxu0 %v11450_v0  ;;  %7715 = vmatprep.subr.mxu1 %v11450_v0 }
 0x1bf   : > { %7685 = vmatpush3.msra.mxu0 %v8896_v3  ;;  %7716 = vmatpush3.msra.mxu1 %v1649_v50  ;;  %v1683_v33 = vsub.f32 %v8946_v55, %v11417_v37  ;;  %v1690_v50 = vsub.f32 %v8954_v26, %v11419_v14 }
 0x1c0   : > { %7686 = vmatprep.subr.mxu0 %v11450_v0  ;;  %7717 = vmatprep.subr.mxu1 %v11450_v0 }
 0x1c1   : > { %7687 = vmatpush3.msra.mxu0 %v8906_v2  ;;  %7718 = vmatpush3.msra.mxu1 %v1656_v5  ;;  %v1684_v51 = vand.u32 4294901760, %v1683_v33  ;;  %v1691_v5 = vand.u32 4294901760, %v1690_v50 }
 0x1c2   : > { %7688 = vmatprep.subr.mxu0 %v11450_v0  ;;  %7719 = vmatprep.subr.mxu1 %v11450_v0 }
 0x1c3   : > { %7689 = vmatpush3.msra.mxu0 %v8921_v41  ;;  %7720 = vmatpush3.msra.mxu1 %v1663_v28 }
 0x1c4   : > { %7690 = vmatprep.subr.mxu0 %v11450_v0  ;;  %7721 = vmatprep.subr.mxu1 %v11450_v0 }
 0x1c5   : > { %7691 = vmatpush3.msra.mxu0 %v8934_v25  ;;  %7722 = vmatpush3.msra.mxu1 %v1670_v59 }
 0x1c6   : > { %7692 = vmatprep.subr.mxu0 %v11450_v0  ;;  %7723 = vmatprep.subr.mxu1 %v11450_v0 }
 0x1c7   : > { %7693 = vmatpush3.msra.mxu0 %v8942_v45  ;;  %7724 = vmatpush3.msra.mxu1 %v1677_v7 }
 0x1c8   : > { %7732 = vmatprep.subr.mxu0 %v11450_v0  ;;  %7725 = vmatprep.subr.mxu1 %v11450_v0 }
 0x1c9   : > { %7726 = vmatpush3.msra.mxu1 %v1684_v51 }
 0x1ca   : > { %7727 = vmatprep.subr.mxu1 %v11450_v0 }
 0x1cb   : > { %7728 = vmatpush3.msra.mxu1 %v1691_v5  ;;  %v1470_v5 = vld [vmem:[#allocation7] sm:$0xff] }
 0x1cc   : > { %7767 = vmatprep.subr.mxu1 %v11450_v0 }
 0x25c   : > { %v1089_v11 = vpop.f32.mrf.mxu0 }
 0x25e   : > { %v7636_v27 = vpop.f32.mrf.mxu0 }
 0x260   : > { %v1239_v28 = vpop.f32.mrf.mxu0 }
 0x262   : > { %v7646_v40 = vpop.f32.mrf.mxu0 }
 0x264   : > { %v1165_v59 = vpop.f32.mrf.mxu1 }
 0x265   : > { %v1166_v61 = vadd.f32 %v1165_v59, %v1089_v11 }
 0x266   : > { %v7641_v37 = vpop.f32.mrf.mxu1  ;;  %v1387_v43 = vpop.f32.mrf.mxu0 }
 0x267   : > { %v1240_v14 = vadd.f32 %v1239_v28, %v1166_v61 }
 0x268   : > { %v1313_v7 = vpop.f32.mrf.mxu1  ;;  %v7656_v33 = vpop.f32.mrf.mxu0 }
 0x269   : > { %v1314_v17 = vadd.f32 %v1313_v7, %v1240_v14 }
 0x26a   : > { %v7651_v36 = vpop.f32.mrf.mxu1 }
 0x26b   : > { %v1388_v50 = vadd.f32 %v1387_v43, %v1314_v17 }
 0x26c   : > { %v1459_v51 = vpop.f32.mrf.mxu1 }
 0x26d   : > { %v1460_v54 = vadd.f32 %v1459_v51, %v1388_v50 }
 0x26e   : > { %v7661_v46 = vpop.f32.mrf.mxu1 }
 0x26f   : > { %v1469_v30 = vmul.f32 %v1467_v19, %v1460_v54  ;;  %v2669_v46 = vld [vmem:[#allocation8 + $0xf8] sm:$0xff]  ;;  %v2668_v54 = vld [vmem:[#allocation8 + $0xf0] sm:$0xff] }
 0x271   : > { %v1471_v20 = vadd.f32 %v1470_v5, %v1469_v30 }
 0x273   : > { %v1472_v27 = vmax.f32 %v1471_v20, 0.0 }
 0x275   : > { %v8972_v12 = vand.u32 4294901760, %v1472_v27 }
 0x277   : > { %v8975_v11 = vsub.f32 %v1472_v27, %v8972_v12  ;;  %7730 = vmatmul.mubr.f32.vlgmr.msra.gmra.mxu1 %v8972_v12 }
 0x278   : > { %7768 = vmatpush3.msra.mxu1 %v8756_v57  ;;  %7799 = vmatprep.mubr.msk.f32.mxu1 %vm8174_vm0, %v11450_v0 }
 0x279   : > { %7769 = vmatprep.subr.mxu1 %v11450_v0  ;;  %v1573_v36 = vand.u32 4294901760, %v8975_v11 }
 0x27a   : > { %7770 = vmatpush3.msra.mxu1 %v8758_v62 }
 0x27b   : > { %7771 = vmatprep.subr.mxu1 %v11450_v0  ;;  %v1574_v20 = vsub.f32 %v8975_v11, %v1573_v36 }
 0x27c   : > { %7772 = vmatpush3.msra.mxu1 %v8767_v13 }
 0x27d   : > { %7773 = vmatprep.subr.mxu1 %v11450_v0  ;;  %v1575_v30 = vand.u32 4294901760, %v1574_v20 }
 0x27e   : > { %7774 = vmatpush3.msra.mxu1 %v8773_v32 }
 0x27f   : > { %7775 = vmatprep.subr.mxu1 %v11450_v0  ;;  %7695 = vmatmul.mubr.f32.vlgmr.msra.gmra.mxu0 %v1575_v30 }
 0x280   : > { %7733 = vmatpush3.msra.mxu0 %v8765_v8  ;;  %7776 = vmatpush3.msra.mxu1 %v8782_v44  ;;  %v11689_v8 = vand.u32 4294901760, %v8862_v21 }
 0x281   : > { %7734 = vmatprep.subr.mxu0 %v11450_v0  ;;  %7777 = vmatprep.subr.mxu1 %v11450_v0 }
 0x282   : > { %7735 = vmatpush3.msra.mxu0 %v8771_v31  ;;  %7778 = vmatpush3.msra.mxu1 %v8840_v4  ;;  %v11691_v31 = vand.u32 4294901760, %v8887_v53 }
 0x283   : > { %7736 = vmatprep.subr.mxu0 %v11450_v0  ;;  %7779 = vmatprep.subr.mxu1 %v11450_v0 }
 0x284   : > { %7737 = vmatpush3.msra.mxu0 %v8780_v42  ;;  %7780 = vmatpush3.msra.mxu1 %v8845_v10  ;;  %v11694_v42 = vand.u32 4294901760, %v8919_v39 }
 0x285   : > { %7738 = vmatprep.subr.mxu0 %v11450_v0  ;;  %7781 = vmatprep.subr.mxu1 %v11450_v0 }
 0x286   : > { %7739 = vmatpush3.msra.mxu0 %v8787_v52  ;;  %7782 = vmatpush3.msra.mxu1 %v8853_v16  ;;  %v11697_v52 = vand.u32 4294901760, %v8954_v26 }
 0x287   : > { %7740 = vmatprep.subr.mxu0 %v11450_v0  ;;  %7783 = vmatprep.subr.mxu1 %v11450_v0 }
 0x288   : > { %7741 = vmatpush3.msra.mxu0 %v8798_v58  ;;  %7784 = vmatpush3.msra.mxu1 %v8864_v22 }
 0x289   : > { %7742 = vmatprep.subr.mxu0 %v11450_v0  ;;  %7785 = vmatprep.subr.mxu1 %v11450_v0 }
 0x28a   : > { %7743 = vmatpush3.msra.mxu0 %v8843_v6  ;;  %7786 = vmatpush3.msra.mxu1 %v8876_v35 }
 0x28b   : > { %7744 = vmatprep.subr.mxu0 %v11450_v0  ;;  %7787 = vmatprep.subr.mxu1 %v11450_v0 }
 0x28c   : > { %7745 = vmatpush3.msra.mxu0 %v8851_v15  ;;  %7788 = vmatpush3.msra.mxu1 %v8883_v47 }
 0x28d   : > { %7746 = vmatprep.subr.mxu0 %v11450_v0  ;;  %7789 = vmatprep.subr.mxu1 %v11450_v0 }
 0x28e   : > { %7747 = vmatpush3.msra.mxu0 %v8862_v21  ;;  %7790 = vmatpush3.msra.mxu1 %v8896_v3 }
 0x28f   : > { %7748 = vmatprep.subr.mxu0 %v11450_v0  ;;  %7791 = vmatprep.subr.mxu1 %v11450_v0 }
 0x290   : > { %7749 = vmatpush3.msra.mxu0 %v8873_v34  ;;  %7792 = vmatpush3.msra.mxu1 %v8906_v2 }
 0x291   : > { %7750 = vmatprep.subr.mxu0 %v11450_v0  ;;  %7793 = vmatprep.subr.mxu1 %v11450_v0 }
 0x292   : > { %7751 = vmatpush3.msra.mxu0 %v8887_v53  ;;  %7794 = vmatpush3.msra.mxu1 %v8921_v41 }
 0x293   : > { %7752 = vmatprep.subr.mxu0 %v11450_v0  ;;  %7795 = vmatprep.subr.mxu1 %v11450_v0 }
 0x294   : > { %7753 = vmatpush3.msra.mxu0 %v8894_v63  ;;  %7796 = vmatpush3.msra.mxu1 %v8934_v25 }
 0x295   : > { %7754 = vmatprep.subr.mxu0 %v11450_v0  ;;  %7797 = vmatprep.subr.mxu1 %v11450_v0 }
 0x296   : > { %7755 = vmatpush3.msra.mxu0 %v8904_v60  ;;  %7798 = vmatpush3.msra.mxu1 %v8942_v45 }
 0x297   : > { %7756 = vmatprep.subr.mxu0 %v11450_v0  ;;  %7800 = vmatmul.mubr.f32.vlgmr.msra.gmra.mxu1 %v1573_v36 }
 0x298   : > { %7837 = vmatprep.subr.mxu1 %v11450_v0  ;;  %7757 = vmatpush3.msra.mxu0 %v8919_v39 }
 0x299   : > { %7838 = vmatpush3.msra.mxu1 %v8756_v57  ;;  %7758 = vmatprep.subr.mxu0 %v11450_v0  ;;  %v11687_v57 = vand.u32 4294901760, %v8843_v6 }
 0x29a   : > { %7839 = vmatprep.subr.mxu1 %v11450_v0  ;;  %7759 = vmatpush3.msra.mxu0 %v8931_v18 }
 0x29b   : > { %7840 = vmatpush3.msra.mxu1 %v8758_v62  ;;  %7760 = vmatprep.subr.mxu0 %v11450_v0  ;;  %v11688_v62 = vand.u32 4294901760, %v8851_v15 }
 0x29c   : > { %7841 = vmatprep.subr.mxu1 %v11450_v0  ;;  %7761 = vmatpush3.msra.mxu0 %v8946_v55 }
 0x29d   : > { %7842 = vmatpush3.msra.mxu1 %v8767_v13  ;;  %7762 = vmatprep.subr.mxu0 %v11450_v0  ;;  %v11690_v13 = vand.u32 4294901760, %v8873_v34 }
 0x29e   : > { %7843 = vmatprep.subr.mxu1 %v11450_v0  ;;  %7763 = vmatpush3.msra.mxu0 %v8954_v26 }
 0x29f   : > { %7764 = vmatprep.mubr.msk.f32.mxu0 %vm8174_vm0, %v11450_v0  ;;  %7844 = vmatpush3.msra.mxu1 %v8773_v32  ;;  %v11692_v32 = vand.u32 4294901760, %v8894_v63  ;;  %v9139_v63 = vand.u32 4294901760, %v2669_v46 }
 0x2a0   : > { %7765 = vmatmul.mubr.f32.vlgmr.msra.gmra.mxu0 %v8975_v11  ;;  %7802 = vmatprep.subr.mxu0 %v11450_v0 }
 0x2a1   : > { %7845 = vmatprep.subr.mxu1 %v11450_v0  ;;  %7803 = vmatpush3.msra.mxu0 %v1584_v38  ;;  %v11693_v38 = vand.u32 4294901760, %v8904_v60  ;;  %11698 = vst [vmem:[#allocation15_spill] sm:$0xff] %v9139_v63  ;;  %v2652_v60 = vld [vmem:[#allocation8 + $0x70] sm:$0xff]  ;;  %v9144_v17 = vsub.f32 %v2669_v46, %v9139_v63 }
 0x2a2   : > { %7846 = vmatpush3.msra.mxu1 %v8782_v44  ;;  %7804 = vmatprep.subr.mxu0 %v11450_v0  ;;  %v11695_v44 = vand.u32 4294901760, %v8931_v18  ;;  %v9146_v18 = vand.u32 4294901760, %v2668_v54  ;;  %v9148_v43 = vand.u32 4294901760, %v2652_v60 }
 0x2a3   : > { %7847 = vmatprep.subr.mxu1 %v11450_v0  ;;  %7805 = vmatpush3.msra.mxu0 %v1591_v49  ;;  %v11696_v49 = vand.u32 4294901760, %v8946_v55  ;;  %11699 = vst [vmem:[#allocation16_spill] sm:$0xff] %v9144_v17  ;;  %v11448_v37 = vand.u32 4294901760, %v9144_v17 }
 0x2a4   : > { %7848 = vmatpush3.msra.mxu1 %v8840_v4  ;;  %7806 = vmatprep.subr.mxu0 %v11450_v0  ;;  %v9162_v14 = vsub.f32 %v2668_v54, %v9146_v18  ;;  %v9165_v28 = vsub.f32 %v2652_v60, %v9148_v43 }
 0x2a5   : > { %7849 = vmatprep.subr.mxu1 %v11450_v0  ;;  %7807 = vmatpush3.msra.mxu0 %v1598_v56  ;;  %v2995_v7 = vsub.f32 %v9144_v17, %v11448_v37  ;;  %v2655_v37 = vld [vmem:[#allocation8 + $0x88] sm:$0xff] }
 0x2a6   : > { %7850 = vmatpush3.msra.mxu1 %v8845_v10  ;;  %7808 = vmatprep.subr.mxu0 %v11450_v0  ;;  %v11446_v33 = vand.u32 4294901760, %v9162_v14 }
 0x2a7   : > { %7851 = vmatprep.subr.mxu1 %v11450_v0  ;;  %7809 = vmatpush3.msra.mxu0 %v1605_v1  ;;  %v2996_v5 = vand.u32 4294901760, %v2995_v7  ;;  %v2646_v7 = vld [vmem:[#allocation8 + $0x40] sm:$0xff] }
 0x2a8   : > { %7852 = vmatpush3.msra.mxu1 %v8853_v16  ;;  %7810 = vmatprep.subr.mxu0 %v11450_v0  ;;  %v3002_v27 = vsub.f32 %v9162_v14, %v11446_v33 }
 0x2a9   : > { %7853 = vmatprep.subr.mxu1 %v11450_v0  ;;  %7811 = vmatpush3.msra.mxu0 %v1612_v9 }
 0x2aa   : > { %7854 = vmatpush3.msra.mxu1 %v8864_v22  ;;  %7812 = vmatprep.subr.mxu0 %v11450_v0  ;;  %v3003_v30 = vand.u32 4294901760, %v3002_v27 }
 0x2ab   : > { %7855 = vmatprep.subr.mxu1 %v11450_v0  ;;  %7813 = vmatpush3.msra.mxu0 %v11687_v57 }
 0x2ac   : > { %7856 = vmatpush3.msra.mxu1 %v8876_v35  ;;  %7814 = vmatprep.subr.mxu0 %v11450_v0 }
 0x2ad   : > { %7857 = vmatprep.subr.mxu1 %v11450_v0  ;;  %7815 = vmatpush3.msra.mxu0 %v11688_v62  ;;  %v2651_v62 = vld [vmem:[#allocation8 + $0x68] sm:$0xff] }
 0x2ae   : > { %7858 = vmatpush3.msra.mxu1 %v8883_v47  ;;  %7816 = vmatprep.subr.mxu0 %v11450_v0 }
 0x2af   : > { %7859 = vmatprep.subr.mxu1 %v11450_v0  ;;  %7817 = vmatpush3.msra.mxu0 %v11689_v8  ;;  %v9207_v8 = vand.u32 4294901760, %v2651_v62 }
 0x2b0   : > { %7860 = vmatpush3.msra.mxu1 %v8896_v3  ;;  %7818 = vmatprep.subr.mxu0 %v11450_v0  ;;  %v2653_v3 = vld [vmem:[#allocation8 + $0x78] sm:$0xff] }
 0x2b1   : > { %7861 = vmatprep.subr.mxu1 %v11450_v0  ;;  %7819 = vmatpush3.msra.mxu0 %v11690_v13  ;;  %v9141_v39 = vand.u32 4294901760, %v2653_v3  ;;  %v2666_v13 = vld [vmem:[#allocation8 + $0xe0] sm:$0xff] }
 0x2b2   : > { %7862 = vmatpush3.msra.mxu1 %v8906_v2  ;;  %7820 = vmatprep.subr.mxu0 %v11450_v0 }
 0x2b3   : > { %7863 = vmatprep.subr.mxu1 %v11450_v0  ;;  %7821 = vmatpush3.msra.mxu0 %v11691_v31  ;;  %v9157_v26 = vsub.f32 %v2653_v3, %v9141_v39  ;;  %v9209_v31 = vand.u32 4294901760, %v2666_v13  ;;  %v2647_v3 = vld [vmem:[#allocation8 + $0x48] sm:$0xff] }
 0x2b4   : > { %7864 = vmatpush3.msra.mxu1 %v8921_v41  ;;  %7822 = vmatprep.subr.mxu0 %v11450_v0  ;;  %v2667_v41 = vld [vmem:[#allocation8 + $0xe8] sm:$0xff] }
 0x2b5   : > { %7865 = vmatprep.subr.mxu1 %v11450_v0  ;;  %7823 = vmatpush3.msra.mxu0 %v11692_v32  ;;  %v11447_v61 = vand.u32 4294901760, %v9157_v26  ;;  %v2650_v32 = vld [vmem:[#allocation8 + $0x60] sm:$0xff] }
 0x2b6   : > { %7866 = vmatpush3.msra.mxu1 %v8934_v25  ;;  %7824 = vmatprep.subr.mxu0 %v11450_v0 }
 0x2b7   : > { %7867 = vmatprep.subr.mxu1 %v11450_v0  ;;  %7825 = vmatpush3.msra.mxu0 %v11693_v38  ;;  %v2883_v51 = vsub.f32 %v9157_v26, %v11447_v61  ;;  %v9212_v38 = vsub.f32 %v2651_v62, %v9207_v8  ;;  %v2645_v62 = vld [vmem:[#allocation8 + $0x38] sm:$0xff] }
 0x2b8   : > { %7868 = vmatpush3.msra.mxu1 %v8942_v45  ;;  %7869 = vmatprep.mubr.msk.f32.mxu1 %vm8174_vm0, %v11450_v0  ;;  %v9152_v45 = vand.u32 4294901760, %v2667_v41 }
 0x2b9   : > { %7826 = vmatprep.subr.mxu0 %v11450_v0  ;;  %7870 = vmatmul.mubr.f32.vlgmr.msra.gmra.mxu1 %v8972_v12  ;;  %v2884_v20 = vand.u32 4294901760, %v2883_v51 }
 0x2ba   : > { %7827 = vmatpush3.msra.mxu0 %v11694_v42  ;;  %7834 = vmatprep.mubr.msk.f32.mxu0 %vm8174_vm0, %v11450_v0  ;;  %v9169_v40 = vsub.f32 %v2667_v41, %v9152_v45  ;;  %v9214_v42 = vand.u32 4294901760, %v2650_v32  ;;  %v2662_v41 = vld [vmem:[#allocation8 + $0xc0] sm:$0xff] }
 0x2bb   : > { %7828 = vmatprep.subr.mxu0 %v11450_v0  ;;  %7877 = vmatprep.subr.mxu1 %v11450_v0 }
 0x2bc   : > { %7829 = vmatpush3.msra.mxu0 %v11695_v44  ;;  %7879 = vmatprep.mubr.msk.f32.mxu1 %vm8174_vm0, %v11450_v0  ;;  %v11442_v50 = vand.u32 4294901760, %v9169_v40  ;;  %v2665_v44 = vld [vmem:[#allocation8 + $0xd8] sm:$0xff] }
 0x2bd   : > { %7830 = vmatprep.subr.mxu0 %v11450_v0 }
 0x2be   : > { %7831 = vmatpush3.msra.mxu0 %v11696_v49  ;;  %v3009_v36 = vsub.f32 %v9169_v40, %v11442_v50  ;;  %v9220_v49 = vand.u32 4294901760, %v2665_v44  ;;  %v2657_v50 = vld [vmem:[#allocation8 + $0x98] sm:$0xff] }
 0x2bf   : > { %7832 = vmatprep.subr.mxu0 %v11450_v0 }
 0x2c0   : > { %7833 = vmatpush3.msra.mxu0 %v11697_v52  ;;  %v2649_v52 = vld [vmem:[#allocation8 + $0x58] sm:$0xff] }
 0x2c1   : > { %7835 = vmatmul.mubr.f32.vlgmr.msra.gmra.mxu0 %v8972_v12  ;;  %7872 = vmatprep.subr.mxu0 %v11450_v0 }
 0x2c2   : > { %7874 = vmatprep.mubr.msk.f32.mxu0 %vm8174_vm0, %v11450_v0 }
 0x337   : > { %v1728_v56 = vpop.f32.mrf.mxu1 }
 0x339   : > { %v7731_v58 = vpop.f32.mrf.mxu1 }
 0x33a   : > { %v9225_v58 = vsub.f32 %v2650_v32, %v9214_v42 }
 0x33f   : > { %v1577_v1 = vpop.f32.mrf.mxu0 }
 0x340   : > { %v1729_v21 = vadd.f32 %v1728_v56, %v1577_v1  ;;  %v11439_v56 = vand.u32 4294901760, %v9212_v38  ;;  %v9227_v1 = vand.u32 4294901760, %v2649_v52 }
 0x341   : > { %v7696_v9 = vpop.f32.mrf.mxu0 }
 0x342   : > { %v2664_v9 = vld [vmem:[#allocation8 + $0xd0] sm:$0xff] }
 0x357   : > { %v1921_v4 = vpop.f32.mrf.mxu1 }
 0x359   : > { %v7801_v6 = vpop.f32.mrf.mxu1 }
 0x35a   : > { %v9232_v6 = vsub.f32 %v2665_v44, %v9220_v49 }
 0x360   : > { %v1832_v10 = vpop.f32.mrf.mxu0 }
 0x361   : > { %v1833_v34 = vadd.f32 %v1832_v10, %v1729_v21  ;;  %v9234_v10 = vand.u32 4294901760, %v2664_v9  ;;  %v11436_v21 = vand.u32 4294901760, %v9225_v58 }
 0x362   : > { %v7766_v15 = vpop.f32.mrf.mxu0 }
 0x363   : > { %v1922_v35 = vadd.f32 %v1921_v4, %v1833_v34  ;;  %v2648_v15 = vld [vmem:[#allocation8 + $0x50] sm:$0xff]  ;;  %v2904_v54 = vsub.f32 %v9225_v58, %v11436_v21 }
 0x364   : > { %v9244_v34 = vand.u32 4294901760, %v2648_v15 }
 0x365   : > { %v2905_v51 = vand.u32 4294901760, %v2904_v54 }
 0x379   : > { %v2127_v16 = vpop.f32.mrf.mxu1 }
 0x37b   : > { %v7871_v22 = vpop.f32.mrf.mxu1 }
 0x37c   : > { %v9242_v22 = vsub.f32 %v2649_v52, %v9227_v1  ;;  %v9291_v52 = vand.u32 4294901760, %v2646_v7 }
 0x37e   : > { %v11433_v60 = vand.u32 4294901760, %v9242_v22 }
 0x381   : > { %v2040_v12 = vpop.f32.mrf.mxu0 }
 0x382   : > { %v2041_v47 = vadd.f32 %v2040_v12, %v1922_v35  ;;  %v2663_v35 = vld [vmem:[#allocation8 + $0xc8] sm:$0xff]  ;;  %v11434_v12 = vand.u32 4294901760, %v9232_v6 }
 0x383   : > { %v7836_v53 = vpop.f32.mrf.mxu0 }
 0x384   : > { %v2128_v19 = vadd.f32 %v2127_v16, %v2041_v47  ;;  %v2897_v16 = vsub.f32 %v9212_v38, %v11439_v56  ;;  %v9252_v47 = vsub.f32 %v2664_v9, %v9234_v10  ;;  %v9254_v53 = vand.u32 4294901760, %v2663_v35  ;;  %v2660_v9 = vld [vmem:[#allocation8 + $0xb0] sm:$0xff] }
 0x386   : > { %v2162_v2 = vand.u32 4294901760, %v2128_v19 }
 0x388   : > { %v2239_v25 = vsub.f32 %v2128_v19, %v2162_v2  ;;  %7873 = vmatpush3.msra.mxu0 %v2162_v2  ;;  %v2898_v19 = vand.u32 4294901760, %v2897_v16 }
 0x389   : > { %7875 = vmatmul.mubr.f32.vlgmr.msra.gmra.mxu0 %v8754_v48  ;;  %7882 = vmatprep.subr.mxu0 %v11450_v0 }
 0x38a   : > { %7883 = vmatpush3.msra.mxu0 %v2239_v25  ;;  %7884 = vmatprep.mubr.msk.f32.mxu0 %vm8174_vm0, %v11450_v0  ;;  %v2240_v55 = vand.u32 4294901760, %v2239_v25 }
 0x38b   : > { %7892 = vmatprep.subr.mxu0 %v11450_v0 }
 0x38c   : > { %v2241_v48 = vsub.f32 %v2239_v25, %v2240_v55 }
 0x38d   : > { %7885 = vmatmul.mubr.f32.vlgmr.msra.gmra.mxu0 %v8747_v24  ;;  %v11444_v24 = vand.u32 4294901760, %v9165_v28 }
 0x38e   : > { %7893 = vmatpush3.msra.mxu0 %v2240_v55  ;;  %v2242_v59 = vand.u32 4294901760, %v2241_v48  ;;  %7894 = vmatprep.mubr.msk.f32.mxu0 %vm8174_vm0, %v11450_v0  ;;  %v3023_v55 = vsub.f32 %v9232_v6, %v11434_v12  ;;  %v11431_v48 = vand.u32 4294901760, %v9252_v47 }
 0x38f   : > { %6582 = vmatprep.subr.mxu0 %v9139_v63  ;;  %v2890_v11 = vsub.f32 %v9165_v28, %v11444_v24  ;;  %v2656_v24 = vld [vmem:[#allocation8 + $0x90] sm:$0xff] }
 0x390   : > { %7878 = vmatpush3.msra.mxu1 %v2242_v59  ;;  %v9270_v59 = vsub.f32 %v2663_v35, %v9254_v53 }
 0x391   : > { %7880 = vmatmul.mubr.f32.vlgmr.msra.gmra.mxu1 %v8744_v23  ;;  %7887 = vmatprep.subr.mxu1 %v11450_v0  ;;  %v2891_v57 = vand.u32 4294901760, %v2890_v11  ;;  %v9277_v11 = vand.u32 4294901760, %v2647_v3 }
 0x392   : > { %7888 = vmatpush3.msra.mxu1 %v2162_v2  ;;  %7889 = vmatprep.mubr.msk.f32.mxu1 %vm8174_vm0, %v11450_v0 }
 0x393   : > { %7897 = vmatprep.subr.mxu1 %v11450_v0  ;;  %7895 = vmatmul.mubr.f32.vlgmr.msra.gmra.mxu0 %v8744_v23  ;;  %v9289_v44 = vsub.f32 %v2647_v3, %v9277_v11 }
 0x394   : > { %6583 = vmatpush3.msra.mxu0 %v9141_v39 }
 0x395   : > { %7890 = vmatmul.mubr.f32.vlgmr.msra.gmra.mxu1 %v8750_v29  ;;  %6584 = vmatprep.subr.mxu0 %v9146_v18  ;;  %v3010_v29 = vand.u32 4294901760, %v3009_v36  ;;  %v2661_v36 = vld [vmem:[#allocation8 + $0xb8] sm:$0xff]  ;;  %v11428_v54 = vand.u32 4294901760, %v9289_v44 }
 0x396   : > { %7898 = vmatpush3.msra.mxu1 %v2162_v2  ;;  %7899 = vmatprep.mubr.msk.f32.mxu1 %vm8174_vm0, %v11450_v0  ;;  %v9262_v2 = vsub.f32 %v2648_v15, %v9244_v34  ;;  %v2639_v0 = vld [vmem:[#allocation8 + $0x8] sm:$0xff] }
 0x397   : > { %6617 = vmatprep.subr.mxu1 %v2996_v5  ;;  %6585 = vmatpush3.msra.mxu0 %v9148_v43  ;;  %v2911_v5 = vsub.f32 %v9242_v22, %v11433_v60 }
 0x398   : > { %6586 = vmatprep.subr.mxu0 %v9152_v45  ;;  %v11430_v27 = vand.u32 4294901760, %v9262_v2 }
 0x399   : > { %7900 = vmatmul.mubr.f32.vlgmr.msra.gmra.mxu1 %v8744_v23  ;;  %6587 = vmatpush3.msra.mxu0 %v9207_v8  ;;  %v9218_v23 = vsub.f32 %v2666_v13, %v9209_v31  ;;  %v2912_v13 = vand.u32 4294901760, %v2911_v5 }
 0x39a   : > { %6618 = vmatpush3.msra.mxu1 %v2884_v20  ;;  %6588 = vmatprep.subr.mxu0 %v9209_v31  ;;  %v3024_v20 = vand.u32 4294901760, %v3023_v55  ;;  %v2918_v32 = vsub.f32 %v9262_v2, %v11430_v27  ;;  %v9307_v55 = vand.u32 4294901760, %v2645_v62 }
 0x39b   : > { %6619 = vmatprep.subr.mxu1 %v3003_v30  ;;  %6589 = vmatpush3.msra.mxu0 %v9214_v42  ;;  %v11437_v4 = vand.u32 4294901760, %v9218_v23  ;;  %v3030_v30 = vsub.f32 %v9252_v47, %v11431_v48 }
 0x39c   : > { %6620 = vmatpush3.msra.mxu1 %v2891_v57  ;;  %6590 = vmatprep.subr.mxu0 %v9220_v49  ;;  %v11429_v57 = vand.u32 4294901760, %v9270_v59  ;;  %v2919_v3 = vand.u32 4294901760, %v2918_v32  ;;  %v9322_v32 = vsub.f32 %v2645_v62, %v9307_v55 }
 0x39d   : > { %6621 = vmatprep.subr.mxu1 %v3010_v29  ;;  %6591 = vmatpush3.msra.mxu0 %v9227_v1  ;;  %v3016_v46 = vsub.f32 %v9218_v23, %v11437_v4  ;;  %v9283_v29 = vand.u32 4294901760, %v2662_v41  ;;  %v3031_v15 = vand.u32 4294901760, %v3030_v30  ;;  %v9314_v30 = vand.u32 4294901760, %v2660_v9 }
 0x39e   : > { %6592 = vmatprep.subr.mxu0 %v9234_v10  ;;  %6622 = vmatpush3.msra.mxu1 %v2898_v19  ;;  %v3037_v16 = vsub.f32 %v9270_v59, %v11429_v57  ;;  %v2644_v19 = vld [vmem:[#allocation8 + $0x30] sm:$0xff]  ;;  %11700 = vst [vmem:[#allocation17_spill] sm:$0xff] %v9322_v32  ;;  %v2643_v57 = vld [vmem:[#allocation8 + $0x28] sm:$0xff] }
 0x39f   : > { %6593 = vmatpush3.msra.mxu0 %v9244_v34  ;;  %v3017_v25 = vand.u32 4294901760, %v3016_v46  ;;  %v9298_v35 = vsub.f32 %v2662_v41, %v9283_v29  ;;  %v9300_v46 = vand.u32 4294901760, %v2661_v36 }
 0x3a0   : > { %6594 = vmatprep.subr.mxu0 %v9254_v53  ;;  %v3038_v41 = vand.u32 4294901760, %v3037_v16 }
 0x3a1   : > { %6623 = vmatprep.subr.mxu1 %v3017_v25  ;;  %6595 = vmatpush3.msra.mxu0 %v9277_v11  ;;  %v9305_v25 = vsub.f32 %v2646_v7, %v9291_v52  ;;  %v11432_v5 = vand.u32 4294901760, %v9298_v35  ;;  %v2925_v7 = vsub.f32 %v9289_v44, %v11428_v54 }
 0x3a2   : > { %6624 = vmatpush3.msra.mxu1 %v2905_v51  ;;  %6596 = vmatprep.subr.mxu0 %v9283_v29  ;;  %v2659_v51 = vld [vmem:[#allocation8 + $0xa8] sm:$0xff] }
 0x3a3   : > { %6625 = vmatprep.subr.mxu1 %v3024_v20  ;;  %6597 = vmatpush3.msra.mxu0 %v9291_v52  ;;  %v9312_v20 = vsub.f32 %v2661_v36, %v9300_v46  ;;  %v3044_v36 = vsub.f32 %v9298_v35, %v11432_v5  ;;  %v9334_v54 = vand.u32 4294901760, %v2659_v51  ;;  %v2926_v62 = vand.u32 4294901760, %v2925_v7  ;;  %v2658_v5 = vld [vmem:[#allocation8 + $0xa0] sm:$0xff] }
 0x3a4   : > { %6626 = vmatpush3.msra.mxu1 %v2912_v13  ;;  %6598 = vmatprep.subr.mxu0 %v9300_v46  ;;  %v11435_v13 = vand.u32 4294901760, %v9305_v25  ;;  %v9363_v56 = vand.u32 4294901760, %v2658_v5 }
 0x3a5   : > { %6627 = vmatprep.subr.mxu1 %v3031_v15  ;;  %v9324_v15 = vand.u32 4294901760, %v2644_v19  ;;  %6599 = vmatpush3.msra.mxu0 %v9307_v55  ;;  %v11438_v16 = vand.u32 4294901760, %v9312_v20  ;;  %v9350_v7 = vsub.f32 %v2659_v51, %v9334_v54 }
 0x3a6   : > { %6628 = vmatpush3.msra.mxu1 %v2919_v3  ;;  %v9332_v3 = vsub.f32 %v2660_v9, %v9314_v30  ;;  %6600 = vmatprep.subr.mxu0 %v9314_v30  ;;  %v2932_v27 = vsub.f32 %v9305_v25, %v11435_v13  ;;  %v3045_v9 = vand.u32 4294901760, %v3044_v36  ;;  %v9357_v36 = vand.u32 4294901760, %v2643_v57 }
 0x3a7   : > { %6629 = vmatprep.subr.mxu1 %v3038_v41  ;;  %v11440_v41 = vand.u32 4294901760, %v9322_v32  ;;  %v9342_v48 = vsub.f32 %v2644_v19, %v9324_v15  ;;  %6601 = vmatpush3.msra.mxu0 %v9324_v15  ;;  %v3051_v60 = vsub.f32 %v9312_v20, %v11438_v16  ;;  %11703 = vst [vmem:[#allocation20_spill] sm:$0xff] %v9350_v7  ;;  %v11445_v51 = vand.u32 4294901760, %v9350_v7 }
 0x3a8   : > { %11701 = vst [vmem:[#allocation18_spill] sm:$0xff] %v9332_v3  ;;  %v11441_v12 = vand.u32 4294901760, %v9332_v3  ;;  %6602 = vmatprep.subr.mxu0 %v9334_v54  ;;  %6630 = vmatpush3.msra.mxu1 %v2926_v62  ;;  %v2933_v13 = vand.u32 4294901760, %v2932_v27 }
 0x3a9   : > { %11702 = vst [vmem:[#allocation19_spill] sm:$0xff] %v9342_v48  ;;  %v2939_v19 = vsub.f32 %v9322_v32, %v11440_v41  ;;  %v11443_v21 = vand.u32 4294901760, %v9342_v48  ;;  %6631 = vmatprep.subr.mxu1 %v3045_v9  ;;  %v3052_v4 = vand.u32 4294901760, %v3051_v60  ;;  %v9369_v41 = vsub.f32 %v2643_v57, %v9357_v36  ;;  %6603 = vmatpush3.msra.mxu0 %v9357_v36  ;;  %v2641_v57 = vld [vmem:[#allocation8 + $0x18] sm:$0xff] }
 0x3aa   : > { %v3058_v16 = vsub.f32 %v9332_v3, %v11441_v12  ;;  %6632 = vmatpush3.msra.mxu1 %v2933_v13  ;;  %v3065_v9 = vsub.f32 %v9350_v7, %v11445_v51  ;;  %v2642_v12 = vld [vmem:[#allocation8 + $0x20] sm:$0xff]  ;;  %6604 = vmatprep.subr.mxu0 %v9363_v56  ;;  %v9388_v61 = vand.u32 4294901760, %v2641_v57  ;;  %v9421_v3 = vand.u32 4294901760, %v2639_v0 }
 0x3ab   : > { %v2940_v27 = vand.u32 4294901760, %v2939_v19  ;;  %v2946_v62 = vsub.f32 %v9342_v48, %v11443_v21  ;;  %11704 = vst [vmem:[#allocation21_spill] sm:$0xff] %v9369_v41  ;;  %6633 = vmatprep.subr.mxu1 %v3052_v4  ;;  %v11449_v19 = vand.u32 4294901760, %v9369_v41  ;;  %v9378_v21 = vsub.f32 %v2658_v5, %v9363_v56  ;;  %v2654_v7 = vld [vmem:[#allocation8 + $0x80] sm:$0xff] }
 0x3ac   : > { %v3059_v60 = vand.u32 4294901760, %v3058_v16  ;;  %v3066_v4 = vand.u32 4294901760, %v3065_v9  ;;  %v9384_v33 = vand.u32 4294901760, %v2642_v12  ;;  %11706 = vst [vmem:[#allocation23_spill] sm:$0xff] %v9388_v61  ;;  %v9390_v5 = vand.u32 4294901760, %v2656_v24  ;;  %11715 = vst [vmem:[#allocation32_spill] sm:$0xff] %v9421_v3 }
 0x3ad   : > { %6634 = vmatpush3.msra.mxu1 %v2940_v27  ;;  %v2947_v13 = vand.u32 4294901760, %v2946_v62  ;;  %11705 = vst [vmem:[#allocation22_spill] sm:$0xff] %v9378_v21  ;;  %v2953_v16 = vsub.f32 %v9369_v41, %v11449_v19  ;;  %v11456_v51 = vand.u32 4294901760, %v9378_v21  ;;  %v9386_v27 = vand.u32 4294901760, %v2657_v50  ;;  %v2640_v62 = vld [vmem:[#allocation8 + $0x10] sm:$0xff] }
 0x3ae   : > { %6635 = vmatprep.subr.mxu1 %v3059_v60  ;;  %11707 = vst [vmem:[#allocation24_spill] sm:$0xff] %v9390_v5  ;;  %6605 = vmatpush3.msra.mxu0 %v9384_v33  ;;  %v9406_v41 = vsub.f32 %v2656_v24, %v9390_v5  ;;  %v9433_v24 = vand.u32 4294901760, %v2654_v7 }
 0x3af   : > { %6636 = vmatpush3.msra.mxu1 %v2947_v13  ;;  %v2954_v60 = vand.u32 4294901760, %v2953_v16  ;;  %v3072_v9 = vsub.f32 %v9378_v21, %v11456_v51  ;;  %v9396_v13 = vsub.f32 %v2642_v12, %v9384_v33  ;;  %v9399_v19 = vsub.f32 %v2657_v50, %v9386_v27  ;;  %6606 = vmatprep.subr.mxu0 %v9386_v27 }
 0x3b0   : > { %6637 = vmatprep.subr.mxu1 %v3066_v4  ;;  %v9403_v4 = vsub.f32 %v2641_v57, %v9388_v61  ;;  %11711 = vst [vmem:[#allocation28_spill] sm:$0xff] %v9406_v41  ;;  %v9408_v16 = vand.u32 4294901760, %v2640_v62  ;;  %v9413_v21 = vand.u32 4294901760, %v2655_v37  ;;  %6607 = vmatpush3.msra.mxu0 %v9388_v61  ;;  %11717 = vst [vmem:[#allocation34_spill] sm:$0xff] %v9433_v24 }
 0x3b1   : > { %11708 = vst [vmem:[#allocation25_spill] sm:$0xff] %v9396_v13  ;;  %11709 = vst [vmem:[#allocation26_spill] sm:$0xff] %v9399_v19  ;;  %6638 = vmatpush3.msra.mxu1 %v2954_v60  ;;  %v3073_v12 = vand.u32 4294901760, %v3072_v9  ;;  %v11467_v51 = vand.u32 4294901760, %v9396_v13  ;;  %v11470_v50 = vand.u32 4294901760, %v9399_v19  ;;  %6608 = vmatprep.subr.mxu0 %v9390_v5  ;;  %v9449_v32 = vsub.f32 %v2654_v7, %v9433_v24 }
 0x3b2   : > { %11710 = vst [vmem:[#allocation27_spill] sm:$0xff] %v9403_v4  ;;  %11712 = vst [vmem:[#allocation29_spill] sm:$0xff] %v9408_v16  ;;  %v9419_v48 = vsub.f32 %v2640_v62, %v9408_v16  ;;  %v9431_v57 = vsub.f32 %v2655_v37, %v9413_v21  ;;  %6609 = vmatpush3.msra.mxu0 %v9408_v16  ;;  %v11718_v62 = vand.u32 4294901760, %v9403_v4 }
 0x3b3   : > { %11713 = vst [vmem:[#allocation30_spill] sm:$0xff] %v9413_v21  ;;  %6639 = vmatprep.subr.mxu1 %v3073_v12  ;;  %v2960_v60 = vsub.f32 %v9396_v13, %v11467_v51  ;;  %v3079_v9 = vsub.f32 %v9399_v19, %v11470_v50  ;;  %v11719_v12 = vand.u32 4294901760, %v9406_v41  ;;  %v9444_v13 = vsub.f32 %v2639_v0, %v9421_v3  ;;  %v2638_v50 = vld [vmem:[#allocation8] sm:$0xff] }
 0x3b4   : > { %11714 = vst [vmem:[#allocation31_spill] sm:$0xff] %v9419_v48  ;;  %11716 = vst [vmem:[#allocation33_spill] sm:$0xff] %v9431_v57  ;;  %v2967_v5 = vsub.f32 %v9403_v4, %v11718_v62  ;;  %v11479_v51 = vand.u32 4294901760, %v9419_v48  ;;  %6610 = vmatprep.subr.mxu0 %v9413_v21  ;;  %v11482_v16 = vand.u32 4294901760, %v9431_v57  ;;  %v11483_v7 = vand.u32 4294901760, %v9449_v32 }
 0x3b5   : > { %v3086_v61 = vsub.f32 %v9406_v41, %v11719_v12  ;;  %11720 = vst [vmem:[#allocation35_spill] sm:$0xff] %v9444_v13  ;;  %v2961_v37 = vand.u32 4294901760, %v2960_v60  ;;  %v3080_v19 = vand.u32 4294901760, %v3079_v9  ;;  %11721 = vst [vmem:[#allocation36_spill] sm:$0xff] %v9449_v32  ;;  %6611 = vmatpush3.msra.mxu0 %v9421_v3  ;;  %v11484_v0 = vand.u32 4294901760, %v9444_v13  ;;  %v2586_v3 = vld [vmem:[#allocation7 + $0x8] sm:$0xff] }
 0x3b6   : > { %v2968_v62 = vand.u32 4294901760, %v2967_v5  ;;  %v2974_v12 = vsub.f32 %v9419_v48, %v11479_v51  ;;  %6612 = vmatprep.subr.mxu0 %v9433_v24  ;;  %v3093_v60 = vsub.f32 %v9431_v57, %v11482_v16  ;;  %v9461_v9 = vand.u32 4294901760, %v2638_v50 }
 0x3b7   : > { %v3087_v4 = vand.u32 4294901760, %v3086_v61  ;;  %6640 = vmatpush3.msra.mxu1 %v2961_v37  ;;  %v2981_v61 = vsub.f32 %v9444_v13, %v11484_v0  ;;  %v3100_v37 = vsub.f32 %v9449_v32, %v11483_v7  ;;  %v8176_v57 = vmov 1983009808  }
 0x3b8   : > { %11722 = vst [vmem:[#allocation37_spill] sm:$0xff] %v9461_v9  ;;  %6641 = vmatprep.subr.mxu1 %v3080_v19  ;;  %v2975_v5 = vand.u32 4294901760, %v2974_v12  ;;  %v3094_v51 = vand.u32 4294901760, %v3093_v60  ;;  %v9470_v48 = vsub.f32 %v2638_v50, %v9461_v9  ;;  %6613 = vmatpush3.msra.mxu0 %v9461_v9  ;;  %v2591_v41 = vunpack.c.l.s4 %v8176_v57 }
 0x3b9   : > { %6642 = vmatpush3.msra.mxu1 %v2968_v62  ;;  %v2982_v16 = vand.u32 4294901760, %v2981_v61  ;;  %6652 = vmatprep.subr.mxu0 %v9144_v17  ;;  %v3101_v19 = vand.u32 4294901760, %v3100_v37 }
 0x3ba   : > { %11723 = vst [vmem:[#allocation38_spill] sm:$0xff] %v9470_v48  ;;  %6643 = vmatprep.subr.mxu1 %v3087_v4  ;;  %v11494_v12 = vand.u32 4294901760, %v9470_v48 }
 0x3bb   : > { %6644 = vmatpush3.msra.mxu1 %v2975_v5 }
 0x3bc   : > { %6645 = vmatprep.subr.mxu1 %v3094_v51  ;;  %v2988_v62 = vsub.f32 %v9470_v48, %v11494_v12  ;;  %v2593_v12 = vlaneseq }
 0x3bd   : > { %6646 = vmatpush3.msra.mxu1 %v2982_v16 }
 0x3be   : > { %6647 = vmatprep.subr.mxu1 %v3101_v19  ;;  %v2989_v60 = vand.u32 4294901760, %v2988_v62  ;;  %v2594_v24 = vshrl.u32 %v2593_v12, 7 }
 0x3c0   : > { %6648 = vmatpush3.msra.mxu1 %v2989_v60  ;;  %v8177_v60 = vmov 1934713408  }
 0x3c1   : > { %6687 = vmatprep.subr.mxu1 %v9139_v63  ;;  %v2606_v48 = vunpack.c.l.s4 %v8177_v60 }
 0x449   : > { %v2203_v50 = vpop.f32.mrf.mxu0 }
 0x44b   : > { %v7876_v4 = vpop.f32.mrf.mxu0 }
 0x44c   : > { %v2592_v4 = vunpack.c.0.s8 %v2591_v41 }
 0x44d   : > { %v2353_v61 = vpop.f32.mrf.mxu0 }
 0x44f   : > { %v7886_v7 = vpop.f32.mrf.mxu0 }
 0x450   : > { %v2582_v7 = vpop.permute.xlu0 %2581 }
 0x451   : > { %v2279_v0 = vpop.f32.mrf.mxu1 }
 0x452   : > { %v2280_v5 = vadd.f32 %v2279_v0, %v2203_v50 }
 0x453   : > { %v7881_v37 = vpop.f32.mrf.mxu1  ;;  %v2501_v17 = vpop.f32.mrf.mxu0 }
 0x454   : > { %v2354_v32 = vadd.f32 %v2353_v61, %v2280_v5  ;;  %v2607_v37 = vunpack.c.0.s8 %v2606_v48  ;;  %v2595_v5 = vsub.s32 %v2592_v4, %v2594_v24 }
 0x455   : > { %v2427_v51 = vpop.f32.mrf.mxu1  ;;  %v7896_v16 = vpop.f32.mrf.mxu0 }
 0x456   : > { %v2428_v13 = vadd.f32 %v2427_v51, %v2354_v32  ;;  %v2610_v32 = vsub.s32 %v2607_v37, %v2594_v24  ;;  %v11724_v51 = vmov 0.0  }
 0x457   : > { %v7891_v19 = vpop.f32.mrf.mxu1 }
 0x458   : > { %v2502_v62 = vadd.f32 %v2501_v17, %v2428_v13 }
 0x459   : > { %v2573_v63 = vpop.f32.mrf.mxu1 }
 0x45a   : > { %v2574_v9 = vadd.f32 %v2573_v63, %v2502_v62 }
 0x45b   : > { %v7901_v0 = vpop.f32.mrf.mxu1 }
 0x45c   : > { %v2584_v50 = vmul.f32 %v2582_v7, %v2574_v9 }
 0x45e   : > { %v2587_v61 = vadd.f32 %v2586_v3, %v2584_v50 }
 0x460   : > { %v2588_v16 = vmax.f32 %v2587_v61, 0.0  ;;  %v11728_v61 = vld [vmem:[#allocation17_spill] sm:$0xff] }
 0x462   : > { %v2589_v57 = vcombine.high %v2588_v16, %v11724_v51  ;;  %v2596_v21 = vrot.slane %v2588_v16, %v2595_v5  ;;  %v11730_v16 = vld [vmem:[#allocation18_spill] sm:$0xff] }
 0x464   : > { %v2603_v19 = vrot.slane %v2589_v57, %v2595_v5  ;;  %v2604_v17 = vcombine.high %v2596_v21, %v11724_v51  ;;  %v2611_v13 = vrot.slane %v2596_v21, %v2610_v32  ;;  %v11729_v5 = vld [vmem:[#allocation23_spill] sm:$0xff] }
 0x465   : > { %v11732_v57 = vld [vmem:[#allocation19_spill] sm:$0xff] }
 0x466   : > { %v9481_v60 = vrot.slane %v2604_v17, %v2610_v32  ;;  %v2619_v63 = vcombine.high %v2603_v19, %v11724_v51  ;;  %v9484_v41 = vrot.slane %v2603_v19, %v2610_v32  ;;  %v2634_v9 = vcombine.high %v2611_v13, %v11724_v51  ;;  %v11733_v19 = vld [vmem:[#allocation29_spill] sm:$0xff]  ;;  %v11734_v17 = vld [vmem:[#allocation20_spill] sm:$0xff] }
 0x467   : > { %v9487_v48 = vand.u32 4294901760, %v2611_v13 }
 0x468   : > { %11725 = vst [vmem:[#allocation39_spill] sm:$0xff] %v9484_v41  ;;  %v9489_v3 = vrot.slane %v2619_v63, %v2610_v32  ;;  %v9491_v24 = vand.u32 4294901760, %v2634_v9  ;;  %v11731_v32 = vld [vmem:[#allocation24_spill] sm:$0xff]  ;;  %v11736_v63 = vld [vmem:[#allocation21_spill] sm:$0xff] }
 0x469   : > { %11726 = vst [vmem:[#allocation40_spill] sm:$0xff] %v9487_v48  ;;  %v9494_v12 = vsub.f32 %v2611_v13, %v9487_v48  ;;  %v11735_v13 = vld [vmem:[#allocation30_spill] sm:$0xff]  ;;  %v11745_v41 = vld [vmem:[#allocation28_spill] sm:$0xff] }
 0x46a   : > { %11727 = vst [vmem:[#allocation41_spill] sm:$0xff] %v9489_v3  ;;  %3104 = vmatprep.mubr.f32.mxu1 %v9491_v24  ;;  %v2864_v21 = vsub.f32 %v2634_v9, %v9491_v24  ;;  %v11737_v9 = vld [vmem:[#allocation32_spill] sm:$0xff]  ;;  %v11744_v3 = vld [vmem:[#allocation27_spill] sm:$0xff] }
 0x46b   : > { %3106 = vmatmul.mubr.f32.vlgmr.msra.gmra.mxu1 %v9487_v48  ;;  %v2871_v62 = vand.u32 4294901760, %v9494_v12  ;;  %v11746_v48 = vld [vmem:[#allocation31_spill] sm:$0xff] }
 0x46c   : > { %6688 = vmatpush3.msra.mxu1 %v9141_v39  ;;  %v2865_v4 = vand.u32 4294901760, %v2864_v21 }
 0x46d   : > { %6689 = vmatprep.subr.mxu1 %v9146_v18  ;;  %v2872_v7 = vsub.f32 %v9494_v12, %v2871_v62 }
 0x46e   : > { %6690 = vmatpush3.msra.mxu1 %v9148_v43  ;;  %3348 = vmatprep.mubr.f32.mxu1 %v2865_v4  ;;  %v2866_v0 = vsub.f32 %v2864_v21, %v2865_v4  ;;  %v11739_v4 = vld [vmem:[#allocation34_spill] sm:$0xff] }
 0x46f   : > { %6691 = vmatprep.subr.mxu1 %v9152_v45  ;;  %v2873_v37 = vand.u32 4294901760, %v2872_v7  ;;  %v11740_v7 = vld [vmem:[#allocation25_spill] sm:$0xff] }
 0x470   : > { %6692 = vmatpush3.msra.mxu1 %v9207_v8  ;;  %v2867_v50 = vand.u32 4294901760, %v2866_v0  ;;  %v11741_v0 = vld [vmem:[#allocation37_spill] sm:$0xff] }
 0x471   : > { %6693 = vmatprep.subr.mxu1 %v9209_v31 }
 0x472   : > { %6694 = vmatpush3.msra.mxu1 %v9214_v42  ;;  %2868 = vmatprep.mubr.f32.mxu0 %v2867_v50  ;;  %v11742_v50 = vld [vmem:[#allocation26_spill] sm:$0xff] }
 0x473   : > { %6695 = vmatprep.subr.mxu1 %v9220_v49  ;;  %2874 = vmatmul.mubr.f32.vlgmr.msra.gmra.mxu0 %v2873_v37  ;;  %v11743_v37 = vld [vmem:[#allocation15_spill] sm:$0xff] }
 0x474   : > { %6653 = vmatpush3.msra.mxu0 %v9157_v26  ;;  %6696 = vmatpush3.msra.mxu1 %v9227_v1 }
 0x475   : > { %6654 = vmatprep.subr.mxu0 %v9162_v14  ;;  %3241 = vmatprep.mubr.f32.mxu0 %v2864_v21  ;;  %v11738_v21 = vld [vmem:[#allocation22_spill] sm:$0xff] }
 0x476   : > { %6697 = vmatprep.subr.mxu1 %v9234_v10  ;;  %6655 = vmatpush3.msra.mxu0 %v9165_v28 }
 0x477   : > { %6698 = vmatpush3.msra.mxu1 %v9244_v34  ;;  %6656 = vmatprep.subr.mxu0 %v9169_v40 }
 0x478   : > { %6699 = vmatprep.subr.mxu1 %v9254_v53  ;;  %6657 = vmatpush3.msra.mxu0 %v9212_v38 }
 0x479   : > { %6700 = vmatpush3.msra.mxu1 %v9277_v11  ;;  %6658 = vmatprep.subr.mxu0 %v9218_v23 }
 0x47a   : > { %6701 = vmatprep.subr.mxu1 %v9283_v29  ;;  %6659 = vmatpush3.msra.mxu0 %v9225_v58 }
 0x47b   : > { %6702 = vmatpush3.msra.mxu1 %v9291_v52  ;;  %6660 = vmatprep.subr.mxu0 %v9232_v6 }
 0x47c   : > { %6703 = vmatprep.subr.mxu1 %v9300_v46  ;;  %6661 = vmatpush3.msra.mxu0 %v9242_v22 }
 0x47d   : > { %6704 = vmatpush3.msra.mxu1 %v9307_v55  ;;  %6662 = vmatprep.subr.mxu0 %v9252_v47 }
 0x47e   : > { %6705 = vmatprep.subr.mxu1 %v9314_v30  ;;  %6663 = vmatpush3.msra.mxu0 %v9262_v2 }
 0x47f   : > { %6706 = vmatpush3.msra.mxu1 %v9324_v15  ;;  %6664 = vmatprep.subr.mxu0 %v9270_v59 }
 0x480   : > { %6707 = vmatprep.subr.mxu1 %v9334_v54  ;;  %6665 = vmatpush3.msra.mxu0 %v9289_v44 }
 0x481   : > { %6708 = vmatpush3.msra.mxu1 %v9357_v36  ;;  %6666 = vmatprep.subr.mxu0 %v9298_v35 }
 0x482   : > { %6709 = vmatprep.subr.mxu1 %v9363_v56  ;;  %6667 = vmatpush3.msra.mxu0 %v9305_v25 }
 0x483   : > { %6710 = vmatpush3.msra.mxu1 %v9384_v33  ;;  %6668 = vmatprep.subr.mxu0 %v9312_v20 }
 0x484   : > { %6711 = vmatprep.subr.mxu1 %v9386_v27  ;;  %6669 = vmatpush3.msra.mxu0 %v11728_v61 }
 0x485   : > { %6712 = vmatpush3.msra.mxu1 %v11729_v5  ;;  %6670 = vmatprep.subr.mxu0 %v11730_v16 }
 0x486   : > { %6713 = vmatprep.subr.mxu1 %v11731_v32  ;;  %6671 = vmatpush3.msra.mxu0 %v11732_v57 }
 0x487   : > { %6714 = vmatpush3.msra.mxu1 %v11733_v19  ;;  %6672 = vmatprep.subr.mxu0 %v11734_v17 }
 0x488   : > { %6715 = vmatprep.subr.mxu1 %v11735_v13  ;;  %6673 = vmatpush3.msra.mxu0 %v11736_v63 }
 0x489   : > { %6716 = vmatpush3.msra.mxu1 %v11737_v9  ;;  %6674 = vmatprep.subr.mxu0 %v11738_v21 }
 0x48a   : > { %6717 = vmatprep.subr.mxu1 %v11739_v4  ;;  %6675 = vmatpush3.msra.mxu0 %v11740_v7 }
 0x48b   : > { %6718 = vmatpush3.msra.mxu1 %v11741_v0  ;;  %6676 = vmatprep.subr.mxu0 %v11742_v50  ;;  %v11747_v50 = vld [vmem:[#allocation33_spill] sm:$0xff] }
 0x48c   : > { %3352 = vmatmul.mubr.f32.vlgmr.msra.gmra.mxu1 %v2871_v62  ;;  %6757 = vmatprep.subr.mxu1 %v11743_v37  ;;  %v11748_v62 = vld [vmem:[#allocation35_spill] sm:$0xff]  ;;  %v2701_v37 = vld [vmem:[#allocation8 + $0x1f8] sm:$0xff] }
 0x48d   : > { %6677 = vmatpush3.msra.mxu0 %v11744_v3  ;;  %6758 = vmatpush3.msra.mxu1 %v9141_v39  ;;  %v11749_v39 = vld [vmem:[#allocation36_spill] sm:$0xff] }
 0x48e   : > { %3622 = vmatprep.mubr.f32.mxu1 %v9491_v24  ;;  %6678 = vmatprep.subr.mxu0 %v11745_v41  ;;  %v11750_v41 = vld [vmem:[#allocation38_spill] sm:$0xff] }
 0x48f   : > { %6759 = vmatprep.subr.mxu1 %v9146_v18  ;;  %6679 = vmatpush3.msra.mxu0 %v11746_v48  ;;  %v9577_v18 = vand.u32 4294901760, %v2701_v37 }
 0x490   : > { %6760 = vmatpush3.msra.mxu1 %v9148_v43  ;;  %6680 = vmatprep.subr.mxu0 %v11747_v50  ;;  %v2685_v43 = vld [vmem:[#allocation8 + $0x178] sm:$0xff]  ;;  %v11751_v50 = vld [vmem:[#allocation16_spill] sm:$0xff] }
 0x491   : > { %6761 = vmatprep.subr.mxu1 %v9152_v45  ;;  %6681 = vmatpush3.msra.mxu0 %v11748_v62  ;;  %v11752_v45 = vand.u32 4294901760, %v11751_v50  ;;  %v11755_v50 = vand.u32 4294901760, %v9165_v28  ;;  %v2698_v28 = vld [vmem:[#allocation8 + $0x1e0] sm:$0xff] }
 0x492   : > { %6762 = vmatpush3.msra.mxu1 %v9207_v8  ;;  %6682 = vmatprep.subr.mxu0 %v11749_v39  ;;  %v11753_v8 = vand.u32 4294901760, %v9157_v26  ;;  %v2699_v26 = vld [vmem:[#allocation8 + $0x1e8] sm:$0xff] }
 0x493   : > { %6763 = vmatprep.subr.mxu1 %v9209_v31  ;;  %6683 = vmatpush3.msra.mxu0 %v11750_v41  ;;  %v2700_v31 = vld [vmem:[#allocation8 + $0x1f0] sm:$0xff] }
 0x494   : > { %6764 = vmatpush3.msra.mxu1 %v9214_v42  ;;  %3244 = vmatmul.mubr.f32.vlgmr.msra.gmra.mxu0 %v9494_v12  ;;  %v11754_v42 = vand.u32 4294901760, %v9162_v14  ;;  %v9588_v12 = vand.u32 4294901760, %v2685_v43  ;;  %v2684_v41 = vld [vmem:[#allocation8 + $0x170] sm:$0xff]  ;;  %v2683_v14 = vld [vmem:[#allocation8 + $0x168] sm:$0xff] }
 0x495   : > { %6722 = vmatprep.subr.mxu0 %v11752_v45  ;;  %6765 = vmatprep.subr.mxu1 %v9220_v49  ;;  %v9594_v49 = vsub.f32 %v2701_v37, %v9577_v18  ;;  %v11757_v45 = vand.u32 4294901760, %v9212_v38  ;;  %v11758_v37 = vand.u32 4294901760, %v9218_v23  ;;  %v11761_v23 = vand.u32 4294901760, %v9232_v6 }
 0x496   : > { %6723 = vmatpush3.msra.mxu0 %v11753_v8  ;;  %3518 = vmatprep.mubr.f32.mxu0 %v9491_v24  ;;  %v11756_v24 = vand.u32 4294901760, %v9169_v40  ;;  %v9612_v40 = vand.u32 4294901760, %v2699_v26  ;;  %v2682_v8 = vld [vmem:[#allocation8 + $0x160] sm:$0xff]  ;;  %v11765_v6 = vand.u32 4294901760, %v9252_v47 }
 0x497   : > { %6766 = vmatpush3.msra.mxu1 %v9227_v1  ;;  %6724 = vmatprep.subr.mxu0 %v11754_v42  ;;  %v9599_v1 = vand.u32 4294901760, %v2700_v31  ;;  %v11510_v38 = vand.u32 4294901760, %v9594_v49  ;;  %v9618_v42 = vand.u32 4294901760, %v2683_v14 }
 0x498   : > { %6767 = vmatprep.subr.mxu1 %v9234_v10  ;;  %6725 = vmatpush3.msra.mxu0 %v11755_v50  ;;  %v9604_v10 = vand.u32 4294901760, %v2684_v41  ;;  %v2697_v50 = vld [vmem:[#allocation8 + $0x1d8] sm:$0xff] }
 0x499   : > { %6768 = vmatpush3.msra.mxu1 %v9244_v34  ;;  %6726 = vmatprep.subr.mxu0 %v11756_v24  ;;  %v9610_v34 = vsub.f32 %v2685_v43, %v9588_v12  ;;  %v9626_v43 = vand.u32 4294901760, %v2698_v28  ;;  %v2681_v24 = vld [vmem:[#allocation8 + $0x158] sm:$0xff]  ;;  %v9654_v47 = vsub.f32 %v2683_v14, %v9618_v42  ;;  %v11771_v14 = vand.u32 4294901760, %v9289_v44 }
 0x49a   : > { %6769 = vmatprep.subr.mxu1 %v9254_v53  ;;  %6727 = vmatpush3.msra.mxu0 %v11757_v45  ;;  %v11760_v53 = vand.u32 4294901760, %v9225_v58  ;;  %v11763_v58 = vand.u32 4294901760, %v9242_v22  ;;  %v9634_v45 = vand.u32 4294901760, %v2682_v8  ;;  %v2680_v22 = vld [vmem:[#allocation8 + $0x150] sm:$0xff] }
 0x49b   : > { %6770 = vmatpush3.msra.mxu1 %v9277_v11  ;;  %6728 = vmatprep.subr.mxu0 %v11758_v37  ;;  %11759 = vst [vmem:[#allocation17_spill] sm:$0xff] %v9610_v34  ;;  %v9624_v11 = vsub.f32 %v2700_v31, %v9599_v1  ;;  %v11511_v31 = vand.u32 4294901760, %v9610_v34  ;;  %v9641_v37 = vsub.f32 %v2699_v26, %v9612_v40  ;;  %11768 = vst [vmem:[#allocation19_spill] sm:$0xff] %v9654_v47  ;;  %v2695_v26 = vld [vmem:[#allocation8 + $0x1c8] sm:$0xff] }
 0x49c   : > { %6771 = vmatprep.subr.mxu1 %v9283_v29  ;;  %6729 = vmatpush3.msra.mxu0 %v11760_v53  ;;  %v9632_v29 = vsub.f32 %v2684_v41, %v9604_v10  ;;  %v11767_v41 = vand.u32 4294901760, %v9262_v2  ;;  %v9656_v53 = vand.u32 4294901760, %v2681_v24  ;;  %v9663_v2 = vsub.f32 %v2698_v28, %v9626_v43  ;;  %v2694_v28 = vld [vmem:[#allocation8 + $0x1c0] sm:$0xff] }
 0x49d   : > { %6772 = vmatpush3.msra.mxu1 %v9291_v52  ;;  %6730 = vmatprep.subr.mxu0 %v11761_v23  ;;  %11762 = vst [vmem:[#allocation23_spill] sm:$0xff] %v9624_v11  ;;  %v2696_v52 = vld [vmem:[#allocation8 + $0x1d0] sm:$0xff]  ;;  %11766 = vst [vmem:[#allocation24_spill] sm:$0xff] %v9641_v37  ;;  %v11769_v23 = vand.u32 4294901760, %v9270_v59  ;;  %v9674_v59 = vsub.f32 %v2682_v8, %v9634_v45  ;;  %v9684_v44 = vsub.f32 %v9610_v34, %v11511_v31 }
 0x49e   : > { %6773 = vmatprep.subr.mxu1 %v9300_v46  ;;  %6731 = vmatpush3.msra.mxu0 %v11763_v58  ;;  %11764 = vst [vmem:[#allocation18_spill] sm:$0xff] %v9632_v29  ;;  %v9643_v46 = vand.u32 4294901760, %v2697_v50  ;;  %11770 = vst [vmem:[#allocation29_spill] sm:$0xff] %v9663_v2  ;;  %v9665_v58 = vand.u32 4294901760, %v2696_v52  ;;  %v9690_v8 = vand.u32 4294901760, %v2695_v26 }
 0x49f   : > { %6774 = vmatpush3.msra.mxu1 %v9307_v55  ;;  %6732 = vmatprep.subr.mxu0 %v11765_v6  ;;  %v9651_v55 = vsub.f32 %v9594_v49, %v11510_v38  ;;  %v2679_v6 = vld [vmem:[#allocation8 + $0x148] sm:$0xff]  ;;  %11772 = vst [vmem:[#allocation20_spill] sm:$0xff] %v9674_v59  ;;  %v11773_v38 = vand.u32 4294901760, %v9298_v35  ;;  %v11779_v35 = vand.u32 4294901760, %v11728_v61 }
 0x4a0   : > { %6775 = vmatprep.subr.mxu1 %v9314_v30  ;;  %6733 = vmatpush3.msra.mxu0 %v11767_v41  ;;  %v11512_v30 = vand.u32 4294901760, %v9624_v11  ;;  %v2635_v41 = vcombine.high %v9481_v60, %v11724_v51  ;;  %v9700_v31 = vand.u32 4294901760, %v2679_v6  ;;  %v11801_v51 = vld [vmem:[#allocation40_spill] sm:$0xff] }
 0x4a1   : > { %6776 = vmatpush3.msra.mxu1 %v9324_v15  ;;  %6734 = vmatprep.subr.mxu0 %v11769_v23  ;;  %v9676_v23 = vand.u32 4294901760, %v2680_v22  ;;  %v11775_v15 = vand.u32 4294901760, %v9305_v25 }
 0x4a2   : > { %6777 = vmatprep.subr.mxu1 %v9334_v54  ;;  %6735 = vmatpush3.msra.mxu0 %v11771_v14  ;;  %v9688_v14 = vsub.f32 %v2697_v50, %v9643_v46  ;;  %v2678_v54 = vld [vmem:[#allocation8 + $0x140] sm:$0xff]  ;;  %v11777_v50 = vand.u32 4294901760, %v9312_v20  ;;  %v11781_v20 = vand.u32 4294901760, %v9632_v29 }
 0x4a3   : > { %6778 = vmatpush3.msra.mxu1 %v9357_v36  ;;  %6736 = vmatprep.subr.mxu0 %v11773_v38  ;;  %v9698_v38 = vsub.f32 %v2681_v24, %v9656_v53  ;;  %v9714_v24 = vand.u32 4294901760, %v2694_v28  ;;  %v9728_v25 = vsub.f32 %v2680_v22, %v9676_v23  ;;  %v9742_v36 = vand.u32 4294901760, %v2678_v54 }
 0x4a4   : > { %11774 = vst [vmem:[#allocation30_spill] sm:$0xff] %v9688_v14  ;;  %6779 = vmatprep.subr.mxu1 %v9363_v56  ;;  %6737 = vmatpush3.msra.mxu0 %v11775_v15  ;;  %v9708_v56 = vsub.f32 %v9624_v11, %v11512_v30  ;;  %v9712_v15 = vsub.f32 %v2696_v52, %v9665_v58  ;;  %v11513_v30 = vand.u32 4294901760, %v9674_v59  ;;  %v11783_v52 = vand.u32 4294901760, %v11730_v16 }
 0x4a5   : > { %11776 = vst [vmem:[#allocation21_spill] sm:$0xff] %v9698_v38  ;;  %6780 = vmatpush3.msra.mxu1 %v9384_v33  ;;  %6738 = vmatprep.subr.mxu0 %v11777_v50  ;;  %v9719_v33 = vand.u32 4294901760, %v2635_v41  ;;  %v9724_v50 = vsub.f32 %v9632_v29, %v11781_v20  ;;  %11782 = vst [vmem:[#allocation34_spill] sm:$0xff] %v9728_v25  ;;  %v9740_v20 = vsub.f32 %v2695_v26, %v9690_v8 }
 0x4a6   : > { %11778 = vst [vmem:[#allocation32_spill] sm:$0xff] %v9712_v15  ;;  %6781 = vmatprep.subr.mxu1 %v9386_v27  ;;  %6739 = vmatpush3.msra.mxu0 %v11779_v35  ;;  %v11784_v27 = vand.u32 4294901760, %v9641_v37  ;;  %v11786_v22 = vand.u32 4294901760, %v11732_v57  ;;  %v11787_v16 = vand.u32 4294901760, %v9654_v47  ;;  %v9755_v35 = vsub.f32 %v2679_v6, %v9700_v31 }
 0x4a7   : > { %11780 = vst [vmem:[#allocation22_spill] sm:$0xff] %v9719_v33  ;;  %6782 = vmatpush3.msra.mxu1 %v11729_v5  ;;  %6740 = vmatprep.subr.mxu0 %v11783_v52  ;;  %11785 = vst [vmem:[#allocation25_spill] sm:$0xff] %v9740_v20  ;;  %v3746_v5 = vand.u32 4294901760, %v9684_v44  ;;  %v11789_v26 = vand.u32 4294901760, %v11734_v17  ;;  %v11790_v57 = vand.u32 4294901760, %v9663_v2  ;;  %v3753_v17 = vand.u32 4294901760, %v9724_v50 }
 0x4a8   : > { %v9736_v61 = vsub.f32 %v9641_v37, %v11784_v27  ;;  %6783 = vmatprep.subr.mxu1 %v11731_v32  ;;  %6741 = vmatpush3.msra.mxu0 %v11786_v22  ;;  %v9751_v52 = vsub.f32 %v9654_v47, %v11787_v16  ;;  %11788 = vst [vmem:[#allocation37_spill] sm:$0xff] %v9755_v35  ;;  %v3865_v32 = vand.u32 4294901760, %v9708_v56  ;;  %v2693_v27 = vld [vmem:[#allocation8 + $0x1b8] sm:$0xff]  ;;  %v11794_v50 = vand.u32 4294901760, %v9688_v14 }
 0x4a9   : > { %6784 = vmatpush3.msra.mxu1 %v11733_v19  ;;  %6742 = vmatprep.subr.mxu0 %v11789_v26  ;;  %v9764_v44 = vsub.f32 %v9663_v2, %v11790_v57  ;;  %v9768_v16 = vsub.f32 %v2694_v28, %v9714_v24  ;;  %v11792_v19 = vand.u32 4294901760, %v11736_v63  ;;  %v9777_v6 = vsub.f32 %v9674_v59, %v11513_v30  ;;  %v2677_v28 = vld [vmem:[#allocation8 + $0x138] sm:$0xff]  ;;  %v2692_v30 = vld [vmem:[#allocation8 + $0x1b0] sm:$0xff] }
 0x4aa   : > { %6785 = vmatprep.subr.mxu1 %v11735_v13  ;;  %v9780_v56 = vsub.f32 %v2635_v41, %v9719_v33  ;;  %v11793_v13 = vand.u32 4294901760, %v11738_v21  ;;  %v3872_v63 = vand.u32 4294901760, %v9736_v61  ;;  %v9790_v57 = vsub.f32 %v9688_v14, %v11794_v50  ;;  %v2691_v50 = vld [vmem:[#allocation8 + $0x1a8] sm:$0xff] }
 0x4ab   : > { %11791 = vst [vmem:[#allocation15_spill] sm:$0xff] %v9768_v16  ;;  %6743 = vmatpush3.msra.mxu0 %v11792_v19  ;;  %6786 = vmatpush3.msra.mxu1 %v11737_v9  ;;  %v9794_v41 = vsub.f32 %v2678_v54, %v9742_v36  ;;  %v11796_v9 = vand.u32 4294901760, %v11740_v7  ;;  %v3760_v21 = vand.u32 4294901760, %v9751_v52  ;;  %v11797_v61 = vand.u32 4294901760, %v9698_v38  ;;  %v2676_v19 = vld [vmem:[#allocation8 + $0x130] sm:$0xff]  ;;  %v11798_v54 = vld [vmem:[#allocation26_spill] sm:$0xff] }
 0x4ac   : > { %6744 = vmatprep.subr.mxu0 %v11793_v13  ;;  %6787 = vmatprep.subr.mxu1 %v11739_v4  ;;  %v9806_v26 = vand.u32 4294901760, %v2693_v27  ;;  %v11799_v22 = vand.u32 4294901760, %v11798_v54  ;;  %v3879_v4 = vand.u32 4294901760, %v9764_v44  ;;  %v11800_v7 = vand.u32 4294901760, %v9712_v15 }
 0x4ad   : > { %11795 = vst [vmem:[#allocation27_spill] sm:$0xff] %v9794_v41  ;;  %6745 = vmatpush3.msra.mxu0 %v11796_v9  ;;  %v9803_v13 = vsub.f32 %v9698_v38, %v11797_v61  ;;  %6788 = vmatpush3.msra.mxu1 %v11741_v0  ;;  %v9818_v61 = vand.u32 4294901760, %v2677_v28  ;;  %v11802_v38 = vand.u32 4294901760, %v9651_v55  ;;  %v3767_v0 = vand.u32 4294901760, %v9777_v6  ;;  %v2675_v9 = vld [vmem:[#allocation8 + $0x128] sm:$0xff]  ;;  %v2674_v6 = vld [vmem:[#allocation8 + $0x120] sm:$0xff] }
 0x4ae   : > { %6746 = vmatprep.subr.mxu0 %v11799_v22  ;;  %v9815_v52 = vsub.f32 %v9712_v15, %v11800_v7  ;;  %3624 = vmatmul.mubr.f32.vlgmr.msra.gmra.mxu1 %v11801_v51  ;;  %v11803_v44 = vand.u32 4294901760, %v9728_v25  ;;  %v9830_v7 = vand.u32 4294901760, %v2692_v30  ;;  %v11804_v15 = vand.u32 4294901760, %v11744_v3 }
 0x4af   : > { %6827 = vmatprep.subr.mxu1 %v11802_v38  ;;  %v3886_v14 = vand.u32 4294901760, %v9790_v57  ;;  %v11805_v55 = vand.u32 4294901760, %v9740_v20  ;;  %v9841_v22 = vand.u32 4294901760, %v2676_v19  ;;  %3966 = vmatprep.mubr.f32.mxu1 %v9719_v33  ;;  %v3774_v3 = vand.u32 4294901760, %v9803_v13 }
 0x4b0   : > { %v9828_v54 = vsub.f32 %v9728_v25, %v11803_v44  ;;  %6747 = vmatpush3.msra.mxu0 %v11804_v15  ;;  %6828 = vmatpush3.msra.mxu1 %v3746_v5  ;;  %v2690_v44 = vld [vmem:[#allocation8 + $0x1a0] sm:$0xff]  ;;  %v11806_v25 = vld [vmem:[#allocation28_spill] sm:$0xff]  ;;  %v11808_v15 = vand.u32 4294901760, %v9755_v35  ;;  %v9853_v57 = vsub.f32 %v2693_v27, %v9806_v26  ;;  %v9868_v33 = vand.u32 4294901760, %v2675_v9  ;;  %v2689_v27 = vld [vmem:[#allocation8 + $0x198] sm:$0xff] }
 0x4b1   : > { %v9838_v38 = vsub.f32 %v9740_v20, %v11805_v55  ;;  %v11807_v59 = vand.u32 4294901760, %v11806_v25  ;;  %v9855_v55 = vand.u32 4294901760, %v2691_v50  ;;  %6829 = vmatprep.subr.mxu1 %v3865_v32  ;;  %v11811_v20 = vand.u32 4294901760, %v11746_v48 }
 0x4b2   : > { %v9850_v5 = vsub.f32 %v9755_v35, %v11808_v15  ;;  %11809 = vst [vmem:[#allocation31_spill] sm:$0xff] %v9853_v57  ;;  %v3893_v25 = vand.u32 4294901760, %v9815_v52  ;;  %v9866_v15 = vsub.f32 %v2677_v28, %v9818_v61  ;;  %6830 = vmatpush3.msra.mxu1 %v3753_v17  ;;  %v11814_v35 = vld [vmem:[#allocation33_spill] sm:$0xff]  ;;  %v11816_v48 = vand.u32 4294901760, %v9780_v56 }
 0x4b3   : > { %6748 = vmatprep.subr.mxu0 %v11807_v59  ;;  %11810 = vst [vmem:[#allocation35_spill] sm:$0xff] %v9855_v55  ;;  %v11812_v59 = vand.u32 4294901760, %v9768_v16  ;;  %v11815_v2 = vand.u32 4294901760, %v11814_v35  ;;  %v3781_v32 = vand.u32 4294901760, %v9828_v54  ;;  %v9877_v52 = vsub.f32 %v2692_v30, %v9830_v7  ;;  %v2673_v28 = vld [vmem:[#allocation8 + $0x118] sm:$0xff]  ;;  %6831 = vmatprep.subr.mxu1 %v3872_v63  ;;  %v2688_v30 = vld [vmem:[#allocation8 + $0x190] sm:$0xff] }
 0x4b4   : > { %6749 = vmatpush3.msra.mxu0 %v11811_v20  ;;  %11813 = vst [vmem:[#allocation36_spill] sm:$0xff] %v9866_v15  ;;  %v3728_v20 = vsub.f32 %v9780_v56, %v11816_v48  ;;  %v3900_v17 = vand.u32 4294901760, %v9838_v38  ;;  %v9890_v48 = vsub.f32 %v2676_v19, %v9841_v22  ;;  %v9892_v54 = vand.u32 4294901760, %v2674_v6  ;;  %6832 = vmatpush3.msra.mxu1 %v3760_v21  ;;  %v11821_v19 = vld [vmem:[#allocation38_spill] sm:$0xff] }
 0x4b5   : > { %v9863_v13 = vsub.f32 %v9768_v16, %v11812_v59  ;;  %6750 = vmatprep.subr.mxu0 %v11815_v2  ;;  %11817 = vst [vmem:[#allocation16_spill] sm:$0xff] %v9877_v52  ;;  %v9879_v59 = vand.u32 4294901760, %v2690_v44  ;;  %v11818_v16 = vand.u32 4294901760, %v11748_v62  ;;  %v11819_v2 = vand.u32 4294901760, %v9794_v41  ;;  %6833 = vmatprep.subr.mxu1 %v3879_v4 }
 0x4b6   : > { %v11820_v47 = vand.u32 4294901760, %v11749_v39  ;;  %v3788_v62 = vand.u32 4294901760, %v9850_v5  ;;  %v9899_v63 = vsub.f32 %v2691_v50, %v9855_v55  ;;  %v9901_v38 = vand.u32 4294901760, %v2689_v27  ;;  %v2687_v5 = vld [vmem:[#allocation8 + $0x188] sm:$0xff]  ;;  %6834 = vmatpush3.msra.mxu1 %v3767_v0 }
 0x4b7   : > { %6751 = vmatpush3.msra.mxu0 %v11818_v16  ;;  %v9887_v35 = vsub.f32 %v9794_v41, %v11819_v2  ;;  %v2672_v2 = vld [vmem:[#allocation8 + $0x110] sm:$0xff]  ;;  %v11822_v41 = vand.u32 4294901760, %v11821_v19  ;;  %v3907_v37 = vand.u32 4294901760, %v9863_v13  ;;  %v9908_v39 = vsub.f32 %v2675_v9, %v9868_v33  ;;  %v2671_v13 = vld [vmem:[#allocation8 + $0x108] sm:$0xff]  ;;  %6835 = vmatprep.subr.mxu1 %v3886_v14  ;;  %v2670_v19 = vld [vmem:[#allocation8 + $0x100] sm:$0xff] }
 0x4b8   : > { %6752 = vmatprep.subr.mxu0 %v11820_v47  ;;  %v9910_v47 = vand.u32 4294901760, %v2673_v28  ;;  %v3729_v50 = vand.u32 4294901760, %v3728_v20  ;;  %v9915_v4 = vsub.f32 %v2690_v44, %v9879_v59  ;;  %v9923_v0 = vsub.f32 %v2674_v6, %v9892_v54  ;;  %v2686_v20 = vld [vmem:[#allocation8 + $0x180] sm:$0xff]  ;;  %6836 = vmatpush3.msra.mxu1 %v3774_v3 }
 0x4b9   : > { %6753 = vmatpush3.msra.mxu0 %v11822_v41  ;;  %v9917_v41 = vand.u32 4294901760, %v2688_v30  ;;  %v3795_v9 = vand.u32 4294901760, %v9887_v35  ;;  %v11825_v44 = vand.u32 4294901760, %v9853_v57  ;;  %v9933_v14 = vsub.f32 %v2689_v27, %v9901_v38  ;;  %6837 = vmatprep.subr.mxu1 %v3893_v25 }
 0x4ba   : > { %3520 = vmatmul.mubr.f32.vlgmr.msra.gmra.mxu0 %v11801_v51  ;;  %6792 = vmatprep.subr.mxu0 %v9577_v18  ;;  %11823 = vst [vmem:[#allocation26_spill] sm:$0xff] %v9923_v0  ;;  %v9925_v51 = vand.u32 4294901760, %v2672_v2  ;;  %v9935_v35 = vand.u32 4294901760, %v2687_v5  ;;  %v11827_v6 = vand.u32 4294901760, %v9866_v15  ;;  %v9943_v11 = vsub.f32 %v2673_v28, %v9910_v47 }
 0x4bb   : > { %6793 = vmatpush3.msra.mxu0 %v9588_v12  ;;  %3730 = vmatprep.mubr.f32.mxu0 %v3729_v50  ;;  %v3913_v16 = vsub.f32 %v9853_v57, %v11825_v44  ;;  %11826 = vst [vmem:[#allocation28_spill] sm:$0xff] %v9933_v14  ;;  %v9945_v44 = vand.u32 4294901760, %v2671_v13  ;;  %v11829_v27 = vand.u32 4294901760, %v9877_v52  ;;  %v9953_v57 = vsub.f32 %v2688_v30, %v9917_v41 }
 0x4bc   : > { %11824 = vst [vmem:[#allocation40_spill] sm:$0xff] %v9925_v51  ;;  %6794 = vmatprep.subr.mxu0 %v9599_v1  ;;  %v3801_v29 = vsub.f32 %v9866_v15, %v11827_v6  ;;  %v9955_v6 = vand.u32 4294901760, %v2686_v20  ;;  %6838 = vmatpush3.msra.mxu1 %v3781_v32  ;;  %v11830_v28 = vand.u32 4294901760, %v9890_v48  ;;  %v9963_v15 = vsub.f32 %v2672_v2, %v9925_v51 }
 0x4bd   : > { %11828 = vst [vmem:[#allocation33_spill] sm:$0xff] %v9945_v44  ;;  %6795 = vmatpush3.msra.mxu0 %v9604_v10  ;;  %v3920_v3 = vsub.f32 %v9877_v52, %v11829_v27  ;;  %v9965_v27 = vand.u32 4294901760, %v2670_v19  ;;  %6839 = vmatprep.subr.mxu1 %v3900_v17  ;;  %v3914_v30 = vand.u32 4294901760, %v3913_v16  ;;  %v11832_v21 = vand.u32 4294901760, %v9899_v63 }
 0x4be   : > { %6796 = vmatprep.subr.mxu0 %v9612_v40  ;;  %v3808_v25 = vsub.f32 %v9890_v48, %v11830_v28  ;;  %v9973_v34 = vsub.f32 %v2687_v5, %v9935_v35  ;;  %6840 = vmatpush3.msra.mxu1 %v3788_v62  ;;  %v3802_v2 = vand.u32 4294901760, %v3801_v29  ;;  %v11833_v28 = vand.u32 4294901760, %v9908_v39 }
 0x4bf   : > { %11831 = vst [vmem:[#allocation38_spill] sm:$0xff] %v9965_v27  ;;  %6797 = vmatpush3.msra.mxu0 %v9618_v42  ;;  %v3927_v32 = vsub.f32 %v9899_v63, %v11832_v21  ;;  %v9981_v16 = vsub.f32 %v2671_v13, %v9945_v44  ;;  %6841 = vmatprep.subr.mxu1 %v3907_v37  ;;  %v3921_v21 = vand.u32 4294901760, %v3920_v3  ;;  %v11834_v5 = vand.u32 4294901760, %v9915_v4 }
 0x4c0   : > { %6798 = vmatprep.subr.mxu0 %v9626_v43  ;;  %v3815_v17 = vsub.f32 %v9908_v39, %v11833_v28  ;;  %v9989_v29 = vsub.f32 %v2686_v20, %v9955_v6  ;;  %6842 = vmatpush3.msra.mxu1 %v3795_v9  ;;  %v3809_v28 = vand.u32 4294901760, %v3808_v25  ;;  %v11835_v13 = vand.u32 4294901760, %v9923_v0 }
 0x4c1   : > { %6799 = vmatpush3.msra.mxu0 %v9634_v45  ;;  %v3934_v62 = vsub.f32 %v9915_v4, %v11834_v5  ;;  %v9997_v3 = vsub.f32 %v2670_v19, %v9965_v27  ;;  %6843 = vmatprep.subr.mxu1 %v3914_v30  ;;  %v3928_v5 = vand.u32 4294901760, %v3927_v32  ;;  %v11836_v20 = vand.u32 4294901760, %v9933_v14 }
 0x4c2   : > { %6800 = vmatprep.subr.mxu0 %v9643_v46  ;;  %v3822_v37 = vsub.f32 %v9923_v0, %v11835_v13  ;;  %6844 = vmatpush3.msra.mxu1 %v3802_v2  ;;  %v3816_v25 = vand.u32 4294901760, %v3815_v17  ;;  %v11837_v13 = vand.u32 4294901760, %v9943_v11  ;;  %v11838_v32 = vand.u32 4294901760, %v9953_v57 }
 0x4c3   : > { %6801 = vmatpush3.msra.mxu0 %v9656_v53  ;;  %v3941_v9 = vsub.f32 %v9933_v14, %v11836_v20  ;;  %6845 = vmatprep.subr.mxu1 %v3921_v21  ;;  %v3935_v30 = vand.u32 4294901760, %v3934_v62  ;;  %v11839_v17 = vand.u32 4294901760, %v9963_v15  ;;  %v11840_v62 = vand.u32 4294901760, %v9973_v34 }
 0x4c4   : > { %6802 = vmatprep.subr.mxu0 %v9665_v58  ;;  %v3829_v50 = vsub.f32 %v9943_v11, %v11837_v13  ;;  %v3948_v20 = vsub.f32 %v9953_v57, %v11838_v32  ;;  %6846 = vmatpush3.msra.mxu1 %v3809_v28  ;;  %v3823_v2 = vand.u32 4294901760, %v3822_v37  ;;  %v11841_v37 = vand.u32 4294901760, %v9981_v16 }
 0x4c5   : > { %6803 = vmatpush3.msra.mxu0 %v9676_v23  ;;  %v3836_v13 = vsub.f32 %v9963_v15, %v11839_v17  ;;  %6847 = vmatprep.subr.mxu1 %v3928_v5  ;;  %v3942_v21 = vand.u32 4294901760, %v3941_v9  ;;  %v3955_v32 = vsub.f32 %v9973_v34, %v11840_v62  ;;  %v11842_v5 = vand.u32 4294901760, %v9989_v29 }
 0x4c6   : > { %6804 = vmatprep.subr.mxu0 %v9690_v8  ;;  %6848 = vmatpush3.msra.mxu1 %v3816_v25  ;;  %v3830_v28 = vand.u32 4294901760, %v3829_v50  ;;  %v3843_v52 = vsub.f32 %v9981_v16, %v11841_v37  ;;  %v3949_v17 = vand.u32 4294901760, %v3948_v20  ;;  %v10032_v19 = vand.u32 4294901760, %v9481_v60 }
 0x4c7   : > { %6805 = vmatpush3.msra.mxu0 %v9700_v31  ;;  %6849 = vmatprep.subr.mxu1 %v3935_v30  ;;  %v3962_v9 = vsub.f32 %v9989_v29, %v11842_v5  ;;  %v3837_v25 = vand.u32 4294901760, %v3836_v13  ;;  %v11844_v50 = vand.u32 4294901760, %v9997_v3  ;;  %v3956_v30 = vand.u32 4294901760, %v3955_v32  ;;  %v11848_v5 = vld [vmem:[#allocation18_spill] sm:$0xff] }
 0x4c8   : > { %6806 = vmatprep.subr.mxu0 %v9714_v24  ;;  %11843 = vst [vmem:[#allocation42_spill] sm:$0xff] %v10032_v19  ;;  %6850 = vmatpush3.msra.mxu1 %v3823_v2  ;;  %v3844_v20 = vand.u32 4294901760, %v3843_v52  ;;  %v10043_v2 = vsub.f32 %v9481_v60, %v10032_v19  ;;  %v11845_v60 = vand.u32 4294901760, %v9780_v56 }
 0x4c9   : > { %6807 = vmatpush3.msra.mxu0 %v9742_v36  ;;  %v3850_v62 = vsub.f32 %v9997_v3, %v11844_v50  ;;  %6851 = vmatprep.subr.mxu1 %v3942_v21  ;;  %v3963_v37 = vand.u32 4294901760, %v3962_v9  ;;  %v11849_v9 = vld [vmem:[#allocation24_spill] sm:$0xff]  ;;  %v11851_v50 = vld [vmem:[#allocation29_spill] sm:$0xff] }
 0x4ca   : > { %6808 = vmatprep.subr.mxu0 %v9806_v26  ;;  %6852 = vmatpush3.msra.mxu1 %v3830_v28  ;;  %v11553_v52 = vand.u32 4294901760, %v10043_v2  ;;  %v11846_v28 = vld [vmem:[#allocation17_spill] sm:$0xff] }
 0x4cb   : > { %6809 = vmatpush3.msra.mxu0 %v9818_v61  ;;  %6853 = vmatprep.subr.mxu1 %v3949_v17  ;;  %v3851_v13 = vand.u32 4294901760, %v3850_v62  ;;  %v11847_v17 = vld [vmem:[#allocation23_spill] sm:$0xff]  ;;  %v11853_v62 = vld [vmem:[#allocation30_spill] sm:$0xff] }
 0x4cc   : > { %6810 = vmatprep.subr.mxu0 %v9830_v7  ;;  %6854 = vmatpush3.msra.mxu1 %v3837_v25  ;;  %v3734_v21 = vsub.f32 %v10043_v2, %v11553_v52  ;;  %v11850_v25 = vld [vmem:[#allocation19_spill] sm:$0xff] }
 0x4cd   : > { %6811 = vmatpush3.msra.mxu0 %v9841_v22  ;;  %6855 = vmatprep.subr.mxu1 %v3956_v30  ;;  %v11854_v30 = vld [vmem:[#allocation21_spill] sm:$0xff]  ;;  %v11861_v52 = vld [vmem:[#allocation31_spill] sm:$0xff] }
 0x4ce   : > { %6812 = vmatprep.subr.mxu0 %v9855_v55  ;;  %6856 = vmatpush3.msra.mxu1 %v3844_v20  ;;  %v3735_v32 = vand.u32 4294901760, %v3734_v21  ;;  %v11855_v20 = vld [vmem:[#allocation32_spill] sm:$0xff]  ;;  %v11859_v21 = vld [vmem:[#allocation15_spill] sm:$0xff] }
 0x4cf   : > { %6813 = vmatpush3.msra.mxu0 %v9868_v33  ;;  %6857 = vmatprep.subr.mxu1 %v3963_v37  ;;  %v11856_v37 = vld [vmem:[#allocation34_spill] sm:$0xff] }
 0x4d0   : > { %6814 = vmatprep.subr.mxu0 %v9879_v59  ;;  %6858 = vmatpush3.msra.mxu1 %v3851_v13  ;;  %v11857_v13 = vld [vmem:[#allocation25_spill] sm:$0xff] }
 0x4d1   : > { %6815 = vmatpush3.msra.mxu0 %v9892_v54  ;;  %3968 = vmatmul.mubr.f32.vlgmr.msra.gmra.mxu1 %v10032_v19  ;;  %v11862_v19 = vld [vmem:[#allocation36_spill] sm:$0xff] }
 0x4d2   : > { %6816 = vmatprep.subr.mxu0 %v9901_v38  ;;  %6897 = vmatprep.subr.mxu1 %v9577_v18 }
 0x4d3   : > { %6817 = vmatpush3.msra.mxu0 %v9910_v47  ;;  %6898 = vmatpush3.msra.mxu1 %v9588_v12 }
 0x4d4   : > { %4210 = vmatprep.mubr.f32.mxu1 %v11845_v60  ;;  %6818 = vmatprep.subr.mxu0 %v9917_v41  ;;  %v11858_v60 = vld [vmem:[#allocation37_spill] sm:$0xff] }
 0x4d5   : > { %6899 = vmatprep.subr.mxu1 %v9599_v1  ;;  %6819 = vmatpush3.msra.mxu0 %v9925_v51 }
 0x4d6   : > { %6900 = vmatpush3.msra.mxu1 %v9604_v10  ;;  %6820 = vmatprep.subr.mxu0 %v9935_v35 }
 0x4d7   : > { %6901 = vmatprep.subr.mxu1 %v9612_v40  ;;  %6821 = vmatpush3.msra.mxu0 %v9945_v44 }
 0x4d8   : > { %6902 = vmatpush3.msra.mxu1 %v9618_v42  ;;  %6822 = vmatprep.subr.mxu0 %v9955_v6 }
 0x4d9   : > { %6903 = vmatprep.subr.mxu1 %v9626_v43  ;;  %6823 = vmatpush3.msra.mxu0 %v9965_v27 }
 0x4da   : > { %6904 = vmatpush3.msra.mxu1 %v9634_v45  ;;  %3736 = vmatmul.mubr.f32.vlgmr.msra.gmra.mxu0 %v3735_v32  ;;  %v11860_v32 = vld [vmem:[#allocation27_spill] sm:$0xff] }
 0x4db   : > { %6862 = vmatprep.subr.mxu0 %v9594_v49  ;;  %6905 = vmatprep.subr.mxu1 %v9643_v46 }
 0x4dc   : > { %6863 = vmatpush3.msra.mxu0 %v11846_v28  ;;  %4103 = vmatprep.mubr.f32.mxu0 %v9780_v56  ;;  %v11852_v56 = vld [vmem:[#allocation20_spill] sm:$0xff] }
 0x4dd   : > { %6906 = vmatpush3.msra.mxu1 %v9656_v53  ;;  %6864 = vmatprep.subr.mxu0 %v11847_v17 }
 0x4de   : > { %6907 = vmatprep.subr.mxu1 %v9665_v58  ;;  %6865 = vmatpush3.msra.mxu0 %v11848_v5 }
 0x4df   : > { %6908 = vmatpush3.msra.mxu1 %v9676_v23  ;;  %6866 = vmatprep.subr.mxu0 %v11849_v9 }
 0x4e0   : > { %6909 = vmatprep.subr.mxu1 %v9690_v8  ;;  %6867 = vmatpush3.msra.mxu0 %v11850_v25 }
 0x4e1   : > { %6910 = vmatpush3.msra.mxu1 %v9700_v31  ;;  %6868 = vmatprep.subr.mxu0 %v11851_v50 }
 0x4e2   : > { %6911 = vmatprep.subr.mxu1 %v9714_v24  ;;  %6869 = vmatpush3.msra.mxu0 %v11852_v56 }
 0x4e3   : > { %6912 = vmatpush3.msra.mxu1 %v9742_v36  ;;  %6870 = vmatprep.subr.mxu0 %v11853_v62 }
 0x4e4   : > { %6913 = vmatprep.subr.mxu1 %v9806_v26  ;;  %6871 = vmatpush3.msra.mxu0 %v11854_v30 }
 0x4e5   : > { %6914 = vmatpush3.msra.mxu1 %v9818_v61  ;;  %6872 = vmatprep.subr.mxu0 %v11855_v20 }
 0x4e6   : > { %6915 = vmatprep.subr.mxu1 %v9830_v7  ;;  %6873 = vmatpush3.msra.mxu0 %v11856_v37 }
 0x4e7   : > { %6916 = vmatpush3.msra.mxu1 %v9841_v22  ;;  %6874 = vmatprep.subr.mxu0 %v11857_v13 }
 0x4e8   : > { %6917 = vmatprep.subr.mxu1 %v9855_v55  ;;  %6875 = vmatpush3.msra.mxu0 %v11858_v60  ;;  %v11863_v55 = vld [vmem:[#allocation16_spill] sm:$0xff] }
 0x4e9   : > { %6918 = vmatpush3.msra.mxu1 %v9868_v33  ;;  %6876 = vmatprep.subr.mxu0 %v11859_v21 }
 0x4ea   : > { %6919 = vmatprep.subr.mxu1 %v9879_v59  ;;  %6877 = vmatpush3.msra.mxu0 %v11860_v32 }
 0x4eb   : > { %6920 = vmatpush3.msra.mxu1 %v9892_v54  ;;  %6878 = vmatprep.subr.mxu0 %v11861_v52 }
 0x4ec   : > { %6921 = vmatprep.subr.mxu1 %v9901_v38  ;;  %6879 = vmatpush3.msra.mxu0 %v11862_v19 }
 0x4ed   : > { %6922 = vmatpush3.msra.mxu1 %v9910_v47  ;;  %6880 = vmatprep.subr.mxu0 %v11863_v55 }
 0x4ee   : > { %6923 = vmatprep.subr.mxu1 %v9917_v41  ;;  %6881 = vmatpush3.msra.mxu0 %v9890_v48 }
 0x4ef   : > { %6924 = vmatpush3.msra.mxu1 %v9925_v51  ;;  %6882 = vmatprep.subr.mxu0 %v9899_v63  ;;  %v11864_v51 = vand.u32 4294901760, %v10043_v2 }
 0x4f0   : > { %6925 = vmatprep.subr.mxu1 %v9935_v35  ;;  %6883 = vmatpush3.msra.mxu0 %v9908_v39 }
 0x4f1   : > { %6926 = vmatpush3.msra.mxu1 %v9945_v44  ;;  %6884 = vmatprep.subr.mxu0 %v9915_v4  ;;  %v11865_v44 = vld [vmem:[#allocation22_spill] sm:$0xff] }
 0x4f2   : > { %6927 = vmatprep.subr.mxu1 %v9955_v6  ;;  %6885 = vmatpush3.msra.mxu0 %v9923_v0  ;;  %v11867_v0 = vld [vmem:[#allocation39_spill] sm:$0xff] }
 0x4f3   : > { %6928 = vmatpush3.msra.mxu1 %v9965_v27  ;;  %6886 = vmatprep.subr.mxu0 %v9933_v14  ;;  %v11866_v27 = vmov 0.0  }
 0x4f4   : > { %4214 = vmatmul.mubr.f32.vlgmr.msra.gmra.mxu1 %v11864_v51  ;;  %6967 = vmatprep.subr.mxu1 %v9577_v18  ;;  %v2636_v14 = vcombine.high %v11867_v0, %v11866_v27  ;;  %v2716_v51 = vld [vmem:[#allocation8 + $0x270] sm:$0xff] }
 0x4f5   : > { %6887 = vmatpush3.msra.mxu0 %v9943_v11  ;;  %6968 = vmatpush3.msra.mxu1 %v9588_v12  ;;  %v11869_v12 = vand.u32 4294901760, %v9594_v49  ;;  %v11872_v49 = vand.u32 4294901760, %v11848_v5  ;;  %v2730_v5 = vld [vmem:[#allocation8 + $0x2e0] sm:$0xff] }
 0x4f6   : > { %4484 = vmatprep.mubr.f32.mxu1 %v11865_v44  ;;  %6888 = vmatprep.subr.mxu0 %v9953_v57  ;;  %v10141_v18 = vand.u32 4294901760, %v2636_v14 }
 0x4f7   : > { %6969 = vmatprep.subr.mxu1 %v9599_v1  ;;  %6889 = vmatpush3.msra.mxu0 %v9963_v15  ;;  %v2733_v1 = vld [vmem:[#allocation8 + $0x2f8] sm:$0xff] }
 0x4f8   : > { %6970 = vmatpush3.msra.mxu1 %v9604_v10  ;;  %6890 = vmatprep.subr.mxu0 %v9973_v34  ;;  %11868 = vst [vmem:[#allocation17_spill] sm:$0xff] %v10141_v18  ;;  %v11870_v10 = vand.u32 4294901760, %v11846_v28  ;;  %v2715_v28 = vld [vmem:[#allocation8 + $0x268] sm:$0xff] }
 0x4f9   : > { %6971 = vmatprep.subr.mxu1 %v9612_v40  ;;  %6891 = vmatpush3.msra.mxu0 %v9981_v16  ;;  %v2717_v40 = vld [vmem:[#allocation8 + $0x278] sm:$0xff] }
 0x4fa   : > { %6972 = vmatpush3.msra.mxu1 %v9618_v42  ;;  %6892 = vmatprep.subr.mxu0 %v9989_v29  ;;  %v11871_v42 = vand.u32 4294901760, %v11847_v17  ;;  %v11875_v17 = vand.u32 4294901760, %v11851_v50 }
 0x4fb   : > { %6973 = vmatprep.subr.mxu1 %v9626_v43  ;;  %6893 = vmatpush3.msra.mxu0 %v9997_v3  ;;  %v2732_v43 = vld [vmem:[#allocation8 + $0x2f0] sm:$0xff] }
 0x4fc   : > { %6974 = vmatpush3.msra.mxu1 %v9634_v45  ;;  %4106 = vmatmul.mubr.f32.vlgmr.msra.gmra.mxu0 %v10043_v2  ;;  %v10155_v45 = vsub.f32 %v2636_v14, %v10141_v18  ;;  %v2731_v2 = vld [vmem:[#allocation8 + $0x2e8] sm:$0xff]  ;;  %v11874_v14 = vand.u32 4294901760, %v11850_v25 }
 0x4fd   : > { %6932 = vmatprep.subr.mxu0 %v11869_v12  ;;  %6975 = vmatprep.subr.mxu1 %v9643_v46  ;;  %v10160_v46 = vand.u32 4294901760, %v2733_v1  ;;  %v10184_v12 = vand.u32 4294901760, %v2731_v2 }
 0x4fe   : > { %6933 = vmatpush3.msra.mxu0 %v11870_v10  ;;  %4380 = vmatprep.mubr.f32.mxu0 %v11865_v44  ;;  %v11873_v44 = vand.u32 4294901760, %v11849_v9  ;;  %v11562_v9 = vand.u32 4294901760, %v10155_v45  ;;  %v2714_v10 = vld [vmem:[#allocation8 + $0x260] sm:$0xff] }
 0x4ff   : > { %6976 = vmatpush3.msra.mxu1 %v9656_v53  ;;  %6934 = vmatprep.subr.mxu0 %v11871_v42  ;;  %v10165_v53 = vand.u32 4294901760, %v2717_v40  ;;  %v10182_v25 = vsub.f32 %v2733_v1, %v10160_v46  ;;  %v10192_v42 = vand.u32 4294901760, %v2715_v28 }
 0x500   : > { %6977 = vmatprep.subr.mxu1 %v9665_v58  ;;  %6935 = vmatpush3.msra.mxu0 %v11872_v49  ;;  %v10170_v58 = vand.u32 4294901760, %v2732_v43  ;;  %v10200_v49 = vand.u32 4294901760, %v2730_v5 }
 0x501   : > { %6978 = vmatpush3.msra.mxu1 %v9676_v23  ;;  %6936 = vmatprep.subr.mxu0 %v11873_v44  ;;  %v10175_v23 = vand.u32 4294901760, %v2716_v51  ;;  %v10190_v50 = vsub.f32 %v2717_v40, %v10165_v53  ;;  %v10208_v44 = vand.u32 4294901760, %v2714_v10 }
 0x502   : > { %6979 = vmatprep.subr.mxu1 %v9690_v8  ;;  %6937 = vmatpush3.msra.mxu0 %v11874_v14  ;;  %v11876_v8 = vand.u32 4294901760, %v11852_v56  ;;  %v11879_v56 = vand.u32 4294901760, %v11854_v30  ;;  %v10198_v1 = vsub.f32 %v2732_v43, %v10170_v58  ;;  %v2728_v30 = vld [vmem:[#allocation8 + $0x2d0] sm:$0xff]  ;;  %v11883_v43 = vand.u32 4294901760, %v11856_v37 }
 0x503   : > { %6980 = vmatpush3.msra.mxu1 %v9700_v31  ;;  %6938 = vmatprep.subr.mxu0 %v11875_v17  ;;  %v11877_v31 = vand.u32 4294901760, %v11853_v62  ;;  %11878 = vst [vmem:[#allocation23_spill] sm:$0xff] %v10190_v50  ;;  %v11881_v62 = vand.u32 4294901760, %v11855_v20  ;;  %v10206_v40 = vsub.f32 %v2716_v51, %v10175_v23  ;;  %v10220_v20 = vsub.f32 %v2731_v2, %v10184_v12  ;;  %v2712_v14 = vld [vmem:[#allocation8 + $0x250] sm:$0xff] }
 0x504   : > { %6981 = vmatprep.subr.mxu1 %v9714_v24  ;;  %6939 = vmatpush3.msra.mxu0 %v11876_v8  ;;  %v2729_v24 = vld [vmem:[#allocation8 + $0x2d8] sm:$0xff]  ;;  %11880 = vst [vmem:[#allocation18_spill] sm:$0xff] %v10198_v1  ;;  %v11885_v17 = vand.u32 4294901760, %v11857_v13  ;;  %v11564_v8 = vand.u32 4294901760, %v10190_v50  ;;  %v11888_v2 = vand.u32 4294901760, %v11858_v60  ;;  %v10240_v13 = vand.u32 4294901760, %v2728_v30 }
 0x505   : > { %6982 = vmatpush3.msra.mxu1 %v9742_v36  ;;  %6940 = vmatprep.subr.mxu0 %v11877_v31  ;;  %v2713_v36 = vld [vmem:[#allocation8 + $0x258] sm:$0xff]  ;;  %11882 = vst [vmem:[#allocation24_spill] sm:$0xff] %v10206_v40  ;;  %11884 = vst [vmem:[#allocation19_spill] sm:$0xff] %v10220_v20  ;;  %v10222_v51 = vand.u32 4294901760, %v2729_v24  ;;  %v2727_v31 = vld [vmem:[#allocation8 + $0x2c8] sm:$0xff] }
 0x506   : > { %6983 = vmatprep.subr.mxu1 %v9806_v26  ;;  %6941 = vmatpush3.msra.mxu0 %v11879_v56  ;;  %v10213_v26 = vsub.f32 %v10155_v45, %v11562_v9  ;;  %v10231_v37 = vand.u32 4294901760, %v2713_v36  ;;  %v11887_v56 = vld [vmem:[#allocation35_spill] sm:$0xff] }
 0x507   : > { %6984 = vmatpush3.msra.mxu1 %v9818_v61  ;;  %6942 = vmatprep.subr.mxu0 %v11881_v62  ;;  %v11563_v61 = vand.u32 4294901760, %v10182_v25  ;;  %v11565_v62 = vand.u32 4294901760, %v10198_v1  ;;  %v2726_v9 = vld [vmem:[#allocation8 + $0x2c0] sm:$0xff] }
 0x508   : > { %6985 = vmatprep.subr.mxu1 %v9830_v7  ;;  %6943 = vmatpush3.msra.mxu0 %v11883_v43  ;;  %v10229_v7 = vsub.f32 %v2715_v28, %v10192_v42  ;;  %v2711_v43 = vld [vmem:[#allocation8 + $0x248] sm:$0xff]  ;;  %v11890_v28 = vand.u32 4294901760, %v11859_v21  ;;  %v2710_v60 = vld [vmem:[#allocation8 + $0x240] sm:$0xff]  ;;  %v11896_v21 = vand.u32 4294901760, %v11862_v19 }
 0x509   : > { %6986 = vmatpush3.msra.mxu1 %v9841_v22  ;;  %6944 = vmatprep.subr.mxu0 %v11885_v17  ;;  %v10238_v22 = vsub.f32 %v2730_v5, %v10200_v49  ;;  %v11566_v17 = vand.u32 4294901760, %v10206_v40  ;;  %v11892_v5 = vand.u32 4294901760, %v11860_v32  ;;  %v10272_v32 = vsub.f32 %v10190_v50, %v11564_v8 }
 0x50a   : > { %11886 = vst [vmem:[#allocation29_spill] sm:$0xff] %v10229_v7  ;;  %6987 = vmatprep.subr.mxu1 %v11887_v56  ;;  %6945 = vmatpush3.msra.mxu0 %v11888_v2  ;;  %v10247_v56 = vsub.f32 %v2714_v10, %v10208_v44  ;;  %v10250_v2 = vand.u32 4294901760, %v2712_v14  ;;  %v10262_v10 = vsub.f32 %v2729_v24, %v10222_v51  ;;  %v10278_v24 = vand.u32 4294901760, %v2711_v43 }
 0x50b   : > { %11889 = vst [vmem:[#allocation20_spill] sm:$0xff] %v10238_v22  ;;  %6988 = vmatpush3.msra.mxu1 %v9868_v33  ;;  %6946 = vmatprep.subr.mxu0 %v11890_v28  ;;  %v10258_v33 = vsub.f32 %v10182_v25, %v11563_v61  ;;  %v10264_v28 = vand.u32 4294901760, %v2727_v31  ;;  %v10276_v61 = vsub.f32 %v2713_v36, %v10231_v37  ;;  %v10292_v8 = vand.u32 4294901760, %v2726_v9 }
 0x50c   : > { %11891 = vst [vmem:[#allocation30_spill] sm:$0xff] %v10247_v56  ;;  %6989 = vmatprep.subr.mxu1 %v9879_v59  ;;  %6947 = vmatpush3.msra.mxu0 %v11892_v5  ;;  %11893 = vst [vmem:[#allocation21_spill] sm:$0xff] %v10262_v10  ;;  %v11894_v59 = vand.u32 4294901760, %v11861_v52  ;;  %v11567_v5 = vand.u32 4294901760, %v10229_v7  ;;  %v11898_v36 = vand.u32 4294901760, %v11863_v55  ;;  %v11904_v52 = vand.u32 4294901760, %v9899_v63 }
 0x50d   : > { %6990 = vmatpush3.msra.mxu1 %v9892_v54  ;;  %11895 = vst [vmem:[#allocation32_spill] sm:$0xff] %v10276_v61  ;;  %v10286_v54 = vsub.f32 %v10198_v1, %v11565_v62  ;;  %v10306_v62 = vand.u32 4294901760, %v2710_v60  ;;  %v4720_v55 = vand.u32 4294901760, %v10258_v33  ;;  %v10319_v19 = vsub.f32 %v2727_v31, %v10264_v28  ;;  %v11909_v33 = vld [vmem:[#allocation33_spill] sm:$0xff] }
 0x50e   : > { %6948 = vmatprep.subr.mxu0 %v11894_v59  ;;  %6991 = vmatprep.subr.mxu1 %v9901_v38  ;;  %v10290_v59 = vsub.f32 %v2728_v30, %v10240_v13  ;;  %v10300_v38 = vsub.f32 %v10206_v40, %v11566_v17  ;;  %v11900_v30 = vand.u32 4294901760, %v9890_v48  ;;  %v4608_v48 = vand.u32 4294901760, %v10272_v32  ;;  %v11913_v17 = vld [vmem:[#allocation26_spill] sm:$0xff] }
 0x50f   : > { %6949 = vmatpush3.msra.mxu0 %v11896_v21  ;;  %6992 = vmatpush3.msra.mxu1 %v9910_v47  ;;  %v10304_v21 = vsub.f32 %v2712_v14, %v10250_v2  ;;  %v11901_v47 = vand.u32 4294901760, %v10220_v20  ;;  %11902 = vst [vmem:[#allocation37_spill] sm:$0xff] %v10319_v19  ;;  %v11903_v14 = vld [vmem:[#allocation40_spill] sm:$0xff]  ;;  %v11906_v31 = vand.u32 4294901760, %v9908_v39  ;;  %v4727_v63 = vand.u32 4294901760, %v10286_v54 }
 0x510   : > { %11897 = vst [vmem:[#allocation34_spill] sm:$0xff] %v10290_v59  ;;  %6950 = vmatprep.subr.mxu0 %v11898_v36  ;;  %6993 = vmatprep.subr.mxu1 %v9917_v41  ;;  %v10328_v41 = vsub.f32 %v10229_v7, %v11567_v5  ;;  %v11907_v32 = vand.u32 4294901760, %v10238_v22  ;;  %v10345_v5 = vsub.f32 %v2726_v9, %v10292_v8  ;;  %v4615_v39 = vand.u32 4294901760, %v10300_v38  ;;  %v2724_v9 = vld [vmem:[#allocation8 + $0x2b0] sm:$0xff] }
 0x511   : > { %11899 = vst [vmem:[#allocation25_spill] sm:$0xff] %v10304_v21  ;;  %6951 = vmatpush3.msra.mxu0 %v11900_v30  ;;  %v10315_v36 = vsub.f32 %v10220_v20, %v11901_v47  ;;  %6994 = vmatpush3.msra.mxu1 %v11903_v14  ;;  %v10332_v30 = vsub.f32 %v2711_v43, %v10278_v24  ;;  %v2725_v47 = vld [vmem:[#allocation8 + $0x2b8] sm:$0xff]  ;;  %v11911_v54 = vand.u32 4294901760, %v10247_v56  ;;  %v11915_v38 = vand.u32 4294901760, %v10262_v10  ;;  %v2706_v20 = vld [vmem:[#allocation8 + $0x220] sm:$0xff] }
 0x512   : > { %6952 = vmatprep.subr.mxu0 %v11904_v52  ;;  %6995 = vmatprep.subr.mxu1 %v9935_v35  ;;  %v10341_v52 = vsub.f32 %v10238_v22, %v11907_v32  ;;  %11908 = vst [vmem:[#allocation27_spill] sm:$0xff] %v10345_v5  ;;  %v2709_v43 = vld [vmem:[#allocation8 + $0x238] sm:$0xff]  ;;  %v11910_v35 = vand.u32 4294901760, %v9915_v4  ;;  %v10358_v14 = vsub.f32 %v2710_v60, %v10306_v62  ;;  %v10370_v27 = vand.u32 4294901760, %v2725_v47  ;;  %v2708_v32 = vld [vmem:[#allocation8 + $0x230] sm:$0xff] }
 0x513   : > { %11905 = vst [vmem:[#allocation15_spill] sm:$0xff] %v10332_v30  ;;  %6953 = vmatpush3.msra.mxu0 %v11906_v31  ;;  %6996 = vmatpush3.msra.mxu1 %v11909_v33  ;;  %v10354_v31 = vsub.f32 %v10247_v56, %v11911_v54  ;;  %v11914_v33 = vand.u32 4294901760, %v11913_v17  ;;  %v4734_v4 = vand.u32 4294901760, %v10315_v36  ;;  %v11916_v60 = vld [vmem:[#allocation38_spill] sm:$0xff]  ;;  %v11917_v56 = vld [vmem:[#allocation28_spill] sm:$0xff]  ;;  %v11919_v17 = vand.u32 4294901760, %v10276_v61 }
 0x514   : > { %6954 = vmatprep.subr.mxu0 %v11910_v35  ;;  %11912 = vst [vmem:[#allocation31_spill] sm:$0xff] %v10358_v14  ;;  %6997 = vmatprep.subr.mxu1 %v9955_v6  ;;  %v10367_v35 = vsub.f32 %v10262_v10, %v11915_v38  ;;  %v11918_v22 = vand.u32 4294901760, %v11917_v56  ;;  %v4622_v6 = vand.u32 4294901760, %v10328_v41  ;;  %v10382_v38 = vand.u32 4294901760, %v2709_v43  ;;  %v2723_v54 = vld [vmem:[#allocation8 + $0x2a8] sm:$0xff]  ;;  %v11920_v10 = vld [vmem:[#allocation42_spill] sm:$0xff] }
 0x515   : > { %6955 = vmatpush3.msra.mxu0 %v11914_v33  ;;  %6998 = vmatpush3.msra.mxu1 %v11916_v60  ;;  %v10379_v36 = vsub.f32 %v10276_v61, %v11919_v17  ;;  %v4741_v60 = vand.u32 4294901760, %v10341_v52  ;;  %v11921_v56 = vand.u32 4294901760, %v10290_v59  ;;  %v10392_v7 = vand.u32 4294901760, %v2724_v9  ;;  %v2707_v17 = vld [vmem:[#allocation8 + $0x228] sm:$0xff] }
 0x516   : > { %6956 = vmatprep.subr.mxu0 %v11918_v22  ;;  %4486 = vmatmul.mubr.f32.vlgmr.msra.gmra.mxu1 %v11920_v10  ;;  %v11922_v33 = vand.u32 4294901760, %v9943_v11  ;;  %v4629_v61 = vand.u32 4294901760, %v10354_v31  ;;  %v11924_v41 = vand.u32 4294901760, %v9953_v57  ;;  %v4748_v11 = vand.u32 4294901760, %v10367_v35 }
 0x517   : > { %7037 = vmatprep.subr.mxu1 %v4720_v55  ;;  %v10389_v22 = vsub.f32 %v10290_v59, %v11921_v56  ;;  %v11923_v55 = vand.u32 4294901760, %v10304_v21  ;;  %v10403_v56 = vand.u32 4294901760, %v2708_v32  ;;  %v2722_v59 = vld [vmem:[#allocation8 + $0x2a0] sm:$0xff]  ;;  %4828 = vmatprep.mubr.f32.mxu1 %v10141_v18  ;;  %v4636_v57 = vand.u32 4294901760, %v10379_v36 }
 0x518   : > { %6957 = vmatpush3.msra.mxu0 %v11922_v33  ;;  %7038 = vmatpush3.msra.mxu1 %v4608_v48  ;;  %v11925_v48 = vand.u32 4294901760, %v10319_v19  ;;  %v10415_v33 = vsub.f32 %v2725_v47, %v10370_v27  ;;  %v10430_v18 = vand.u32 4294901760, %v2707_v17  ;;  %v2721_v47 = vld [vmem:[#allocation8 + $0x298] sm:$0xff]  ;;  %v10441_v36 = vsub.f32 %v2724_v9, %v10392_v7  ;;  %v2720_v9 = vld [vmem:[#allocation8 + $0x290] sm:$0xff] }
 0x519   : > { %v10400_v52 = vsub.f32 %v10304_v21, %v11923_v55  ;;  %6958 = vmatprep.subr.mxu0 %v11924_v41  ;;  %v10417_v55 = vand.u32 4294901760, %v2723_v54  ;;  %7039 = vmatprep.subr.mxu1 %v4727_v63  ;;  %v11928_v21 = vand.u32 4294901760, %v9963_v15  ;;  %v11929_v41 = vand.u32 4294901760, %v10332_v30 }
 0x51a   : > { %v10412_v31 = vsub.f32 %v10319_v19, %v11925_v48  ;;  %11926 = vst [vmem:[#allocation36_spill] sm:$0xff] %v10415_v33  ;;  %v10428_v48 = vsub.f32 %v2709_v43, %v10382_v38  ;;  %7040 = vmatpush3.msra.mxu1 %v4615_v39  ;;  %v11931_v19 = vand.u32 4294901760, %v9973_v34  ;;  %v4755_v15 = vand.u32 4294901760, %v10389_v22  ;;  %11933 = vst [vmem:[#allocation39_spill] sm:$0xff] %v10441_v36  ;;  %v2705_v43 = vld [vmem:[#allocation8 + $0x218] sm:$0xff] }
 0x51b   : > { %11927 = vst [vmem:[#allocation16_spill] sm:$0xff] %v10417_v55  ;;  %6959 = vmatpush3.msra.mxu0 %v11928_v21  ;;  %v10425_v35 = vsub.f32 %v10332_v30, %v11929_v41  ;;  %v11932_v21 = vand.u32 4294901760, %v10345_v5  ;;  %v10443_v41 = vand.u32 4294901760, %v2722_v59  ;;  %7041 = vmatprep.subr.mxu1 %v4734_v4  ;;  %v11934_v30 = vand.u32 4294901760, %v9981_v16 }
 0x51c   : > { %11930 = vst [vmem:[#allocation22_spill] sm:$0xff] %v10428_v48  ;;  %6960 = vmatprep.subr.mxu0 %v11931_v19  ;;  %v4643_v34 = vand.u32 4294901760, %v10400_v52  ;;  %v11935_v19 = vand.u32 4294901760, %v10358_v14  ;;  %v10454_v22 = vsub.f32 %v2708_v32, %v10403_v56  ;;  %7042 = vmatpush3.msra.mxu1 %v4622_v6  ;;  %v4762_v16 = vand.u32 4294901760, %v10412_v31  ;;  %v2719_v31 = vld [vmem:[#allocation8 + $0x288] sm:$0xff] }
 0x51d   : > { %v10438_v63 = vsub.f32 %v10345_v5, %v11932_v21  ;;  %6961 = vmatpush3.msra.mxu0 %v11934_v30  ;;  %v10456_v21 = vand.u32 4294901760, %v2706_v20  ;;  %v11936_v5 = vand.u32 4294901760, %v9989_v29  ;;  %v11598_v30 = vand.u32 4294901760, %v10415_v33  ;;  %7043 = vmatprep.subr.mxu1 %v4741_v60 }
 0x51e   : > { %v10451_v39 = vsub.f32 %v10358_v14, %v11935_v19  ;;  %v10463_v4 = vsub.f32 %v2723_v54, %v10417_v55  ;;  %v10465_v52 = vand.u32 4294901760, %v2721_v47  ;;  %v2704_v19 = vld [vmem:[#allocation8 + $0x210] sm:$0xff]  ;;  %v11937_v32 = vand.u32 4294901760, %v9997_v3  ;;  %7044 = vmatpush3.msra.mxu1 %v4629_v61 }
 0x51f   : > { %6962 = vmatprep.subr.mxu0 %v11936_v5  ;;  %v4650_v14 = vand.u32 4294901760, %v10425_v35  ;;  %v10472_v29 = vsub.f32 %v2707_v17, %v10430_v18  ;;  %v10474_v5 = vand.u32 4294901760, %v2705_v43  ;;  %v4769_v54 = vand.u32 4294901760, %v10438_v63  ;;  %v2703_v35 = vld [vmem:[#allocation8 + $0x208] sm:$0xff]  ;;  %7045 = vmatprep.subr.mxu1 %v4748_v11  ;;  %v2718_v63 = vld [vmem:[#allocation8 + $0x280] sm:$0xff] }
 0x520   : > { %6963 = vmatpush3.msra.mxu0 %v11937_v32  ;;  %v10480_v3 = vsub.f32 %v2722_v59, %v10443_v41  ;;  %v10482_v32 = vand.u32 4294901760, %v2720_v9  ;;  %v4657_v17 = vand.u32 4294901760, %v10451_v39  ;;  %v10488_v61 = vsub.f32 %v2706_v20, %v10456_v21  ;;  %v2702_v20 = vld [vmem:[#allocation8 + $0x200] sm:$0xff]  ;;  %7046 = vmatpush3.msra.mxu1 %v4636_v57 }
 0x521   : > { %4382 = vmatmul.mubr.f32.vlgmr.msra.gmra.mxu0 %v11920_v10  ;;  %7002 = vmatprep.subr.mxu0 %v10160_v46  ;;  %v10490_v10 = vand.u32 4294901760, %v2704_v19  ;;  %v11940_v59 = vand.u32 4294901760, %v10213_v26  ;;  %v4775_v60 = vsub.f32 %v10415_v33, %v11598_v30  ;;  %v10500_v39 = vsub.f32 %v2721_v47, %v10465_v52 }
 0x522   : > { %11938 = vst [vmem:[#allocation35_spill] sm:$0xff] %v10488_v61  ;;  %7003 = vmatpush3.msra.mxu0 %v10165_v53  ;;  %v10502_v6 = vand.u32 4294901760, %v2719_v31  ;;  %v11942_v40 = vand.u32 4294901760, %v10428_v48  ;;  %v10510_v1 = vsub.f32 %v2705_v43, %v10474_v5  ;;  %v10512_v30 = vand.u32 4294901760, %v2703_v35  ;;  %7047 = vmatprep.subr.mxu1 %v4755_v15 }
 0x523   : > { %11939 = vst [vmem:[#allocation40_spill] sm:$0xff] %v10490_v10  ;;  %4592 = vmatprep.mubr.f32.mxu0 %v11940_v59  ;;  %11941 = vst [vmem:[#allocation33_spill] sm:$0xff] %v10500_v39  ;;  %7004 = vmatprep.subr.mxu0 %v10170_v58  ;;  %v11944_v47 = vand.u32 4294901760, %v10441_v36  ;;  %v10520_v33 = vsub.f32 %v2720_v9, %v10482_v32  ;;  %v11945_v43 = vand.u32 4294901760, %v10454_v22  ;;  %v4776_v9 = vand.u32 4294901760, %v4775_v60 }
 0x524   : > { %v4663_v26 = vsub.f32 %v10428_v48, %v11942_v40  ;;  %11943 = vst [vmem:[#allocation26_spill] sm:$0xff] %v10512_v30  ;;  %7005 = vmatpush3.msra.mxu0 %v10175_v23  ;;  %v10522_v40 = vand.u32 4294901760, %v2718_v63  ;;  %7048 = vmatpush3.msra.mxu1 %v4643_v34  ;;  %v10530_v48 = vsub.f32 %v2704_v19, %v10490_v10  ;;  %v11947_v11 = vand.u32 4294901760, %v10463_v4 }
 0x525   : > { %v4782_v57 = vsub.f32 %v10441_v36, %v11944_v47  ;;  %7006 = vmatprep.subr.mxu0 %v10184_v12  ;;  %v4670_v15 = vsub.f32 %v10454_v22, %v11945_v43  ;;  %v10532_v47 = vand.u32 4294901760, %v2702_v20  ;;  %7049 = vmatprep.subr.mxu1 %v4762_v16  ;;  %v10540_v50 = vsub.f32 %v2719_v31, %v10502_v6 }
 0x526   : > { %7007 = vmatpush3.msra.mxu0 %v10192_v42  ;;  %v4789_v34 = vsub.f32 %v10463_v4, %v11947_v11  ;;  %7050 = vmatpush3.msra.mxu1 %v4650_v14  ;;  %v4664_v19 = vand.u32 4294901760, %v4663_v26  ;;  %v11948_v43 = vand.u32 4294901760, %v10472_v29  ;;  %v10548_v60 = vsub.f32 %v2703_v35, %v10512_v30 }
 0x527   : > { %11946 = vst [vmem:[#allocation38_spill] sm:$0xff] %v10532_v47  ;;  %7008 = vmatprep.subr.mxu0 %v10200_v49  ;;  %7051 = vmatprep.subr.mxu1 %v4769_v54  ;;  %v4783_v11 = vand.u32 4294901760, %v4782_v57  ;;  %v11949_v31 = vand.u32 4294901760, %v10480_v3  ;;  %v10556_v26 = vsub.f32 %v2718_v63, %v10522_v40  ;;  %v11950_v35 = vand.u32 4294901760, %v10488_v61 }
 0x528   : > { %v4677_v16 = vsub.f32 %v10472_v29, %v11948_v43  ;;  %7009 = vmatpush3.msra.mxu0 %v10208_v44  ;;  %7052 = vmatpush3.msra.mxu1 %v4657_v17  ;;  %v4671_v43 = vand.u32 4294901760, %v4670_v15  ;;  %v10564_v57 = vsub.f32 %v2702_v20, %v10532_v47  ;;  %v11951_v63 = vand.u32 4294901760, %v10500_v39 }
 0x529   : > { %v4796_v14 = vsub.f32 %v10480_v3, %v11949_v31  ;;  %7010 = vmatprep.subr.mxu0 %v10222_v51  ;;  %v4684_v54 = vsub.f32 %v10488_v61, %v11950_v35  ;;  %7053 = vmatprep.subr.mxu1 %v4776_v9  ;;  %v4790_v31 = vand.u32 4294901760, %v4789_v34  ;;  %v11952_v35 = vand.u32 4294901760, %v10510_v1 }
 0x52a   : > { %7011 = vmatpush3.msra.mxu0 %v10231_v37  ;;  %v4803_v17 = vsub.f32 %v10500_v39, %v11951_v63  ;;  %7054 = vmatpush3.msra.mxu1 %v4664_v19  ;;  %v4678_v15 = vand.u32 4294901760, %v4677_v16  ;;  %v11953_v34 = vand.u32 4294901760, %v10520_v33  ;;  %v11954_v16 = vand.u32 4294901760, %v10530_v48 }
 0x52b   : > { %7012 = vmatprep.subr.mxu0 %v10240_v13  ;;  %v4691_v59 = vsub.f32 %v10510_v1, %v11952_v35  ;;  %7055 = vmatprep.subr.mxu1 %v4783_v11  ;;  %v4797_v9 = vand.u32 4294901760, %v4796_v14  ;;  %v4685_v19 = vand.u32 4294901760, %v4684_v54  ;;  %v11955_v14 = vand.u32 4294901760, %v10540_v50 }
 0x52c   : > { %7013 = vmatpush3.msra.mxu0 %v10250_v2  ;;  %v4810_v63 = vsub.f32 %v10520_v33, %v11953_v34  ;;  %7056 = vmatpush3.msra.mxu1 %v4671_v43  ;;  %v4698_v35 = vsub.f32 %v10530_v48, %v11954_v16  ;;  %v4804_v11 = vand.u32 4294901760, %v4803_v17  ;;  %v11956_v54 = vand.u32 4294901760, %v10548_v60 }
 0x52d   : > { %7014 = vmatprep.subr.mxu0 %v10264_v28  ;;  %7057 = vmatprep.subr.mxu1 %v4790_v31  ;;  %v4817_v34 = vsub.f32 %v10540_v50, %v11955_v14  ;;  %v4692_v43 = vand.u32 4294901760, %v4691_v59  ;;  %v11957_v31 = vand.u32 4294901760, %v10556_v26  ;;  %v10599_v20 = vand.u32 4294901760, %v11867_v0 }
 0x52e   : > { %7015 = vmatpush3.msra.mxu0 %v10278_v24  ;;  %7058 = vmatpush3.msra.mxu1 %v4678_v15  ;;  %v4705_v36 = vsub.f32 %v10548_v60, %v11956_v54  ;;  %v4811_v16 = vand.u32 4294901760, %v4810_v63  ;;  %v4699_v15 = vand.u32 4294901760, %v4698_v35  ;;  %v11959_v59 = vand.u32 4294901760, %v10564_v57 }
 0x52f   : > { %7016 = vmatprep.subr.mxu0 %v10292_v8  ;;  %7059 = vmatprep.subr.mxu1 %v4797_v9  ;;  %v4824_v17 = vsub.f32 %v10556_v26, %v11957_v31  ;;  %11958 = vst [vmem:[#allocation28_spill] sm:$0xff] %v10599_v20  ;;  %v4818_v9 = vand.u32 4294901760, %v4817_v34  ;;  %v11963_v31 = vld [vmem:[#allocation24_spill] sm:$0xff] }
 0x530   : > { %7017 = vmatpush3.msra.mxu0 %v10306_v62  ;;  %7060 = vmatpush3.msra.mxu1 %v4685_v19  ;;  %v4712_v14 = vsub.f32 %v10564_v57, %v11959_v59  ;;  %v4706_v63 = vand.u32 4294901760, %v4705_v36  ;;  %v10610_v19 = vsub.f32 %v11867_v0, %v10599_v20  ;;  %v11960_v0 = vand.u32 4294901760, %v10155_v45  ;;  %v11966_v59 = vld [vmem:[#allocation20_spill] sm:$0xff] }
 0x531   : > { %7018 = vmatprep.subr.mxu0 %v10370_v27  ;;  %7061 = vmatprep.subr.mxu1 %v4804_v11  ;;  %v4825_v54 = vand.u32 4294901760, %v4824_v17  ;;  %v11964_v17 = vld [vmem:[#allocation19_spill] sm:$0xff] }
 0x532   : > { %7019 = vmatpush3.msra.mxu0 %v10382_v38  ;;  %7062 = vmatpush3.msra.mxu1 %v4692_v43  ;;  %v4713_v35 = vand.u32 4294901760, %v4712_v14  ;;  %v11607_v36 = vand.u32 4294901760, %v10610_v19  ;;  %v11961_v43 = vld [vmem:[#allocation23_spill] sm:$0xff]  ;;  %v11968_v14 = vld [vmem:[#allocation21_spill] sm:$0xff] }
 0x533   : > { %7020 = vmatprep.subr.mxu0 %v10392_v7  ;;  %7063 = vmatprep.subr.mxu1 %v4811_v16  ;;  %v11962_v16 = vld [vmem:[#allocation18_spill] sm:$0xff] }
 0x534   : > { %7021 = vmatpush3.msra.mxu0 %v10403_v56  ;;  %7064 = vmatpush3.msra.mxu1 %v4699_v15  ;;  %v4596_v11 = vsub.f32 %v10610_v19, %v11607_v36  ;;  %v11965_v15 = vld [vmem:[#allocation29_spill] sm:$0xff]  ;;  %v11976_v36 = vld [vmem:[#allocation36_spill] sm:$0xff] }
 0x535   : > { %7022 = vmatprep.subr.mxu0 %v10417_v55  ;;  %7065 = vmatprep.subr.mxu1 %v4818_v9  ;;  %v11969_v9 = vld [vmem:[#allocation32_spill] sm:$0xff] }
 0x536   : > { %7023 = vmatpush3.msra.mxu0 %v10430_v18  ;;  %7066 = vmatpush3.msra.mxu1 %v4706_v63  ;;  %v4597_v34 = vand.u32 4294901760, %v4596_v11  ;;  %v11970_v63 = vld [vmem:[#allocation34_spill] sm:$0xff]  ;;  %v11974_v11 = vld [vmem:[#allocation27_spill] sm:$0xff] }
 0x537   : > { %7024 = vmatprep.subr.mxu0 %v10443_v41  ;;  %7067 = vmatprep.subr.mxu1 %v4825_v54  ;;  %v11971_v54 = vld [vmem:[#allocation25_spill] sm:$0xff] }
 0x538   : > { %7025 = vmatpush3.msra.mxu0 %v10456_v21  ;;  %7068 = vmatpush3.msra.mxu1 %v4713_v35  ;;  %v11972_v35 = vld [vmem:[#allocation37_spill] sm:$0xff] }
 0x539   : > { %7026 = vmatprep.subr.mxu0 %v10465_v52  ;;  %4830 = vmatmul.mubr.f32.vlgmr.msra.gmra.mxu1 %v10599_v20  ;;  %v11977_v20 = vld [vmem:[#allocation22_spill] sm:$0xff] }
 0x53a   : > { %7107 = vmatprep.subr.mxu1 %v10160_v46  ;;  %7027 = vmatpush3.msra.mxu0 %v10474_v5 }
 0x53b   : > { %7108 = vmatpush3.msra.mxu1 %v10165_v53  ;;  %5072 = vmatprep.mubr.f32.mxu1 %v11960_v0  ;;  %v11973_v0 = vld [vmem:[#allocation15_spill] sm:$0xff] }
 0x53c   : > { %7028 = vmatprep.subr.mxu0 %v10482_v32  ;;  %7109 = vmatprep.subr.mxu1 %v10170_v58 }
 0x53d   : > { %7029 = vmatpush3.msra.mxu0 %v10490_v10  ;;  %7110 = vmatpush3.msra.mxu1 %v10175_v23 }
 0x53e   : > { %7030 = vmatprep.subr.mxu0 %v10502_v6  ;;  %7111 = vmatprep.subr.mxu1 %v10184_v12 }
 0x53f   : > { %7031 = vmatpush3.msra.mxu0 %v10512_v30  ;;  %7112 = vmatpush3.msra.mxu1 %v10192_v42 }
 0x540   : > { %7032 = vmatprep.subr.mxu0 %v10522_v40  ;;  %7113 = vmatprep.subr.mxu1 %v10200_v49 }
 0x541   : > { %7033 = vmatpush3.msra.mxu0 %v10532_v47  ;;  %7114 = vmatpush3.msra.mxu1 %v10208_v44 }
 0x542   : > { %4598 = vmatmul.mubr.f32.vlgmr.msra.gmra.mxu0 %v4597_v34  ;;  %7072 = vmatprep.subr.mxu0 %v10182_v25  ;;  %v11975_v34 = vld [vmem:[#allocation31_spill] sm:$0xff] }
 0x543   : > { %7115 = vmatprep.subr.mxu1 %v10222_v51  ;;  %7073 = vmatpush3.msra.mxu0 %v11961_v43 }
 0x544   : > { %4965 = vmatprep.mubr.f32.mxu0 %v10155_v45  ;;  %7116 = vmatpush3.msra.mxu1 %v10231_v37  ;;  %v11967_v45 = vld [vmem:[#allocation30_spill] sm:$0xff] }
 0x545   : > { %7074 = vmatprep.subr.mxu0 %v11962_v16  ;;  %7117 = vmatprep.subr.mxu1 %v10240_v13 }
 0x546   : > { %7075 = vmatpush3.msra.mxu0 %v11963_v31  ;;  %7118 = vmatpush3.msra.mxu1 %v10250_v2 }
 0x547   : > { %7076 = vmatprep.subr.mxu0 %v11964_v17  ;;  %7119 = vmatprep.subr.mxu1 %v10264_v28 }
 0x548   : > { %7077 = vmatpush3.msra.mxu0 %v11965_v15  ;;  %7120 = vmatpush3.msra.mxu1 %v10278_v24 }
 0x549   : > { %7078 = vmatprep.subr.mxu0 %v11966_v59  ;;  %7121 = vmatprep.subr.mxu1 %v10292_v8 }
 0x54a   : > { %7079 = vmatpush3.msra.mxu0 %v11967_v45  ;;  %7122 = vmatpush3.msra.mxu1 %v10306_v62 }
 0x54b   : > { %7080 = vmatprep.subr.mxu0 %v11968_v14  ;;  %7123 = vmatprep.subr.mxu1 %v10370_v27 }
 0x54c   : > { %7081 = vmatpush3.msra.mxu0 %v11969_v9  ;;  %7124 = vmatpush3.msra.mxu1 %v10382_v38 }
 0x54d   : > { %7082 = vmatprep.subr.mxu0 %v11970_v63  ;;  %7125 = vmatprep.subr.mxu1 %v10392_v7 }
 0x54e   : > { %7083 = vmatpush3.msra.mxu0 %v11971_v54  ;;  %7126 = vmatpush3.msra.mxu1 %v10403_v56 }
 0x54f   : > { %7084 = vmatprep.subr.mxu0 %v11972_v35  ;;  %7127 = vmatprep.subr.mxu1 %v10417_v55  ;;  %v11978_v55 = vld [vmem:[#allocation39_spill] sm:$0xff] }
 0x550   : > { %7085 = vmatpush3.msra.mxu0 %v11973_v0  ;;  %7128 = vmatpush3.msra.mxu1 %v10430_v18 }
 0x551   : > { %7086 = vmatprep.subr.mxu0 %v11974_v11  ;;  %7129 = vmatprep.subr.mxu1 %v10443_v41 }
 0x552   : > { %7087 = vmatpush3.msra.mxu0 %v11975_v34  ;;  %7130 = vmatpush3.msra.mxu1 %v10456_v21 }
 0x553   : > { %7088 = vmatprep.subr.mxu0 %v11976_v36  ;;  %7131 = vmatprep.subr.mxu1 %v10465_v52 }
 0x554   : > { %7089 = vmatpush3.msra.mxu0 %v11977_v20  ;;  %7132 = vmatpush3.msra.mxu1 %v10474_v5 }
 0x555   : > { %7090 = vmatprep.subr.mxu0 %v11978_v55  ;;  %7133 = vmatprep.subr.mxu1 %v10482_v32 }
 0x556   : > { %7091 = vmatpush3.msra.mxu0 %v10454_v22  ;;  %7134 = vmatpush3.msra.mxu1 %v10490_v10  ;;  %v11979_v10 = vand.u32 4294901760, %v10610_v19 }
 0x557   : > { %7092 = vmatprep.subr.mxu0 %v10463_v4  ;;  %7135 = vmatprep.subr.mxu1 %v10502_v6 }
 0x558   : > { %7093 = vmatpush3.msra.mxu0 %v10472_v29  ;;  %7136 = vmatpush3.msra.mxu1 %v10512_v30  ;;  %v11980_v30 = vld [vmem:[#allocation17_spill] sm:$0xff] }
 0x559   : > { %7094 = vmatprep.subr.mxu0 %v10480_v3  ;;  %7137 = vmatprep.subr.mxu1 %v10522_v40 }
 0x55a   : > { %7095 = vmatpush3.msra.mxu0 %v10488_v61  ;;  %7138 = vmatpush3.msra.mxu1 %v10532_v47  ;;  %v11981_v47 = vmov 0.0   ;;  %v11982_v61 = vld [vmem:[#allocation41_spill] sm:$0xff] }
 0x55b   : > { %7096 = vmatprep.subr.mxu0 %v10500_v39  ;;  %5076 = vmatmul.mubr.f32.vlgmr.msra.gmra.mxu1 %v11979_v10  ;;  %v2637_v39 = vcombine.high %v11982_v61, %v11981_v47  ;;  %v2748_v10 = vld [vmem:[#allocation8 + $0x370] sm:$0xff]  ;;  %v2763_v47 = vld [vmem:[#allocation8 + $0x3e8] sm:$0xff] }
 0x55c   : > { %7177 = vmatprep.subr.mxu1 %v10160_v46  ;;  %7097 = vmatpush3.msra.mxu0 %v10510_v1 }
 0x55d   : > { %7178 = vmatpush3.msra.mxu1 %v10165_v53  ;;  %5346 = vmatprep.mubr.f32.mxu1 %v11980_v30  ;;  %v10708_v46 = vand.u32 4294901760, %v2637_v39  ;;  %v11984_v53 = vand.u32 4294901760, %v10182_v25  ;;  %v11987_v25 = vand.u32 4294901760, %v11963_v31 }
 0x55e   : > { %7098 = vmatprep.subr.mxu0 %v10520_v33  ;;  %7179 = vmatprep.subr.mxu1 %v10170_v58  ;;  %v2765_v58 = vld [vmem:[#allocation8 + $0x3f8] sm:$0xff] }
 0x55f   : > { %7099 = vmatpush3.msra.mxu0 %v10530_v48  ;;  %7180 = vmatpush3.msra.mxu1 %v10175_v23  ;;  %11983 = vst [vmem:[#allocation42_spill] sm:$0xff] %v10708_v46  ;;  %v11985_v23 = vand.u32 4294901760, %v11961_v43  ;;  %v11990_v43 = vand.u32 4294901760, %v11966_v59 }
 0x560   : > { %7100 = vmatprep.subr.mxu0 %v10540_v50  ;;  %7181 = vmatprep.subr.mxu1 %v10184_v12  ;;  %v2749_v12 = vld [vmem:[#allocation8 + $0x378] sm:$0xff] }
 0x561   : > { %7101 = vmatpush3.msra.mxu0 %v10548_v60  ;;  %7182 = vmatpush3.msra.mxu1 %v10192_v42  ;;  %v11986_v42 = vand.u32 4294901760, %v11962_v16  ;;  %v2762_v16 = vld [vmem:[#allocation8 + $0x3e0] sm:$0xff] }
 0x562   : > { %7102 = vmatprep.subr.mxu0 %v10556_v26  ;;  %7183 = vmatprep.subr.mxu1 %v10200_v49  ;;  %v2764_v49 = vld [vmem:[#allocation8 + $0x3f0] sm:$0xff] }
 0x563   : > { %7103 = vmatpush3.msra.mxu0 %v10564_v57  ;;  %7184 = vmatpush3.msra.mxu1 %v10208_v44  ;;  %v10722_v44 = vsub.f32 %v2637_v39, %v10708_v46  ;;  %v11989_v39 = vand.u32 4294901760, %v11965_v15  ;;  %v10751_v15 = vand.u32 4294901760, %v2763_v47 }
 0x564   : > { %4968 = vmatmul.mubr.f32.vlgmr.msra.gmra.mxu0 %v10610_v19  ;;  %7142 = vmatprep.subr.mxu0 %v11984_v53  ;;  %v2747_v19 = vld [vmem:[#allocation8 + $0x368] sm:$0xff]  ;;  %v2746_v53 = vld [vmem:[#allocation8 + $0x360] sm:$0xff] }
 0x565   : > { %7185 = vmatprep.subr.mxu1 %v10222_v51  ;;  %7143 = vmatpush3.msra.mxu0 %v11985_v23  ;;  %v10727_v51 = vand.u32 4294901760, %v2765_v58  ;;  %v11616_v31 = vand.u32 4294901760, %v10722_v44  ;;  %v10759_v23 = vand.u32 4294901760, %v2747_v19 }
 0x566   : > { %5242 = vmatprep.mubr.f32.mxu0 %v11980_v30  ;;  %7186 = vmatpush3.msra.mxu1 %v10231_v37  ;;  %v11988_v30 = vand.u32 4294901760, %v11964_v17  ;;  %v10732_v37 = vand.u32 4294901760, %v2749_v12 }
 0x567   : > { %7144 = vmatprep.subr.mxu0 %v11986_v42  ;;  %7187 = vmatprep.subr.mxu1 %v10240_v13  ;;  %v10737_v13 = vand.u32 4294901760, %v2764_v49  ;;  %v10749_v17 = vsub.f32 %v2765_v58, %v10727_v51  ;;  %v10767_v42 = vand.u32 4294901760, %v2762_v16 }
 0x568   : > { %7145 = vmatpush3.msra.mxu0 %v11987_v25  ;;  %7188 = vmatpush3.msra.mxu1 %v10250_v2  ;;  %v10742_v2 = vand.u32 4294901760, %v2748_v10  ;;  %v10757_v59 = vsub.f32 %v2749_v12, %v10732_v37  ;;  %v10775_v25 = vand.u32 4294901760, %v2746_v53 }
 0x569   : > { %7146 = vmatprep.subr.mxu0 %v11988_v30  ;;  %7189 = vmatprep.subr.mxu1 %v10264_v28  ;;  %v11991_v28 = vand.u32 4294901760, %v11967_v45  ;;  %v11994_v45 = vand.u32 4294901760, %v11969_v9  ;;  %v10765_v58 = vsub.f32 %v2764_v49, %v10737_v13  ;;  %v2760_v9 = vld [vmem:[#allocation8 + $0x3d0] sm:$0xff]  ;;  %v11998_v49 = vand.u32 4294901760, %v11971_v54 }
 0x56a   : > { %7147 = vmatpush3.msra.mxu0 %v11989_v39  ;;  %7190 = vmatpush3.msra.mxu1 %v10278_v24  ;;  %v11992_v24 = vand.u32 4294901760, %v11968_v14  ;;  %11993 = vst [vmem:[#allocation23_spill] sm:$0xff] %v10757_v59  ;;  %v11996_v14 = vand.u32 4294901760, %v11970_v63  ;;  %v10773_v12 = vsub.f32 %v2748_v10, %v10742_v2  ;;  %v10787_v63 = vsub.f32 %v2763_v47, %v10751_v15  ;;  %v2744_v30 = vld [vmem:[#allocation8 + $0x350] sm:$0xff] }
 0x56b   : > { %7148 = vmatprep.subr.mxu0 %v11990_v43  ;;  %7191 = vmatprep.subr.mxu1 %v10292_v8  ;;  %v2761_v8 = vld [vmem:[#allocation8 + $0x3d8] sm:$0xff]  ;;  %11995 = vst [vmem:[#allocation18_spill] sm:$0xff] %v10765_v58  ;;  %v12000_v39 = vand.u32 4294901760, %v11972_v35  ;;  %v11618_v43 = vand.u32 4294901760, %v10757_v59  ;;  %v12003_v47 = vand.u32 4294901760, %v11973_v0  ;;  %v10807_v35 = vand.u32 4294901760, %v2760_v9 }
 0x56c   : > { %7149 = vmatpush3.msra.mxu0 %v11991_v28  ;;  %7192 = vmatpush3.msra.mxu1 %v10306_v62  ;;  %v2745_v62 = vld [vmem:[#allocation8 + $0x358] sm:$0xff]  ;;  %11997 = vst [vmem:[#allocation24_spill] sm:$0xff] %v10773_v12  ;;  %11999 = vst [vmem:[#allocation19_spill] sm:$0xff] %v10787_v63  ;;  %v10789_v10 = vand.u32 4294901760, %v2761_v8  ;;  %v2759_v28 = vld [vmem:[#allocation8 + $0x3c8] sm:$0xff]  ;;  %v12011_v0 = vand.u32 4294901760, %v11977_v20 }
 0x56d   : > { %7150 = vmatprep.subr.mxu0 %v11992_v24  ;;  %7193 = vmatprep.subr.mxu1 %v10370_v27  ;;  %v10780_v27 = vsub.f32 %v10722_v44, %v11616_v31  ;;  %v10798_v54 = vand.u32 4294901760, %v2745_v62  ;;  %v12002_v24 = vld [vmem:[#allocation16_spill] sm:$0xff]  ;;  %v2742_v31 = vld [vmem:[#allocation8 + $0x340] sm:$0xff]  ;;  %v12018_v20 = vand.u32 4294901760, %v10463_v4 }
 0x56e   : > { %7151 = vmatpush3.msra.mxu0 %v11994_v45  ;;  %7194 = vmatpush3.msra.mxu1 %v10382_v38  ;;  %v11617_v38 = vand.u32 4294901760, %v10749_v17  ;;  %v11619_v45 = vand.u32 4294901760, %v10765_v58 }
 0x56f   : > { %7152 = vmatprep.subr.mxu0 %v11996_v14  ;;  %7195 = vmatprep.subr.mxu1 %v10392_v7  ;;  %v10796_v7 = vsub.f32 %v2747_v19, %v10759_v23  ;;  %v2743_v14 = vld [vmem:[#allocation8 + $0x348] sm:$0xff]  ;;  %v12005_v19 = vand.u32 4294901760, %v11974_v11  ;;  %v11621_v11 = vand.u32 4294901760, %v10787_v63 }
 0x570   : > { %7153 = vmatpush3.msra.mxu0 %v11998_v49  ;;  %7196 = vmatpush3.msra.mxu1 %v10403_v56  ;;  %v10805_v56 = vsub.f32 %v2762_v16, %v10767_v42  ;;  %v11620_v49 = vand.u32 4294901760, %v10773_v12  ;;  %v12007_v16 = vand.u32 4294901760, %v11975_v34  ;;  %v10839_v34 = vsub.f32 %v10757_v59, %v11618_v43 }
 0x571   : > { %7154 = vmatprep.subr.mxu0 %v12000_v39  ;;  %12001 = vst [vmem:[#allocation29_spill] sm:$0xff] %v10796_v7  ;;  %7197 = vmatprep.subr.mxu1 %v12002_v24  ;;  %v10814_v39 = vsub.f32 %v2746_v53, %v10775_v25  ;;  %v10817_v24 = vand.u32 4294901760, %v2744_v30  ;;  %v10829_v53 = vsub.f32 %v2761_v8, %v10789_v10  ;;  %v10845_v8 = vand.u32 4294901760, %v2743_v14 }
 0x572   : > { %7155 = vmatpush3.msra.mxu0 %v12003_v47  ;;  %12004 = vst [vmem:[#allocation20_spill] sm:$0xff] %v10805_v56  ;;  %7198 = vmatpush3.msra.mxu1 %v10430_v18  ;;  %v2758_v47 = vld [vmem:[#allocation8 + $0x3c0] sm:$0xff]  ;;  %v10825_v18 = vsub.f32 %v10749_v17, %v11617_v38  ;;  %v10843_v38 = vsub.f32 %v2745_v62, %v10798_v54  ;;  %v12013_v62 = vand.u32 4294901760, %v11978_v55 }
 0x573   : > { %7156 = vmatprep.subr.mxu0 %v12005_v19  ;;  %12006 = vst [vmem:[#allocation30_spill] sm:$0xff] %v10814_v39  ;;  %7199 = vmatprep.subr.mxu1 %v10443_v41  ;;  %12008 = vst [vmem:[#allocation21_spill] sm:$0xff] %v10829_v53  ;;  %v10831_v19 = vand.u32 4294901760, %v2759_v28  ;;  %v12009_v41 = vand.u32 4294901760, %v11976_v36  ;;  %v11623_v36 = vand.u32 4294901760, %v10805_v56  ;;  %v10859_v43 = vand.u32 4294901760, %v2758_v47 }
 0x574   : > { %7157 = vmatpush3.msra.mxu0 %v12007_v16  ;;  %7200 = vmatpush3.msra.mxu1 %v10456_v21  ;;  %v11622_v16 = vand.u32 4294901760, %v10796_v7  ;;  %12010 = vst [vmem:[#allocation32_spill] sm:$0xff] %v10843_v38  ;;  %v10853_v21 = vsub.f32 %v10765_v58, %v11619_v45  ;;  %v10873_v45 = vand.u32 4294901760, %v2742_v31  ;;  %v5582_v55 = vand.u32 4294901760, %v10825_v18  ;;  %v12026_v18 = vld [vmem:[#allocation35_spill] sm:$0xff] }
 0x575   : > { %7158 = vmatprep.subr.mxu0 %v12009_v41  ;;  %7201 = vmatprep.subr.mxu1 %v10465_v52  ;;  %v10857_v41 = vsub.f32 %v2760_v9, %v10807_v35  ;;  %v10867_v52 = vsub.f32 %v10773_v12, %v11620_v49  ;;  %v12015_v9 = vand.u32 4294901760, %v10454_v22  ;;  %v10886_v49 = vsub.f32 %v2759_v28, %v10831_v19 }
 0x576   : > { %7159 = vmatpush3.msra.mxu0 %v12011_v0  ;;  %7202 = vmatpush3.msra.mxu1 %v10474_v5  ;;  %v10871_v0 = vsub.f32 %v2744_v30, %v10817_v24  ;;  %v10882_v5 = vsub.f32 %v10787_v63, %v11621_v11  ;;  %v12017_v30 = vld [vmem:[#allocation40_spill] sm:$0xff]  ;;  %v5470_v22 = vand.u32 4294901760, %v10839_v34  ;;  %v2757_v11 = vld [vmem:[#allocation8 + $0x3b8] sm:$0xff]  ;;  %v12020_v28 = vand.u32 4294901760, %v10472_v29  ;;  %v2738_v63 = vld [vmem:[#allocation8 + $0x320] sm:$0xff] }
 0x577   : > { %12012 = vst [vmem:[#allocation34_spill] sm:$0xff] %v10857_v41  ;;  %7160 = vmatprep.subr.mxu0 %v12013_v62  ;;  %7203 = vmatprep.subr.mxu1 %v10482_v32  ;;  %v11628_v62 = vand.u32 4294901760, %v10829_v53  ;;  %12016 = vst [vmem:[#allocation37_spill] sm:$0xff] %v10886_v49  ;;  %v10895_v32 = vsub.f32 %v10796_v7, %v11622_v16  ;;  %v5589_v4 = vand.u32 4294901760, %v10853_v21  ;;  %v12022_v16 = vld [vmem:[#allocation26_spill] sm:$0xff]  ;;  %v5477_v29 = vand.u32 4294901760, %v10867_v52 }
 0x578   : > { %12014 = vst [vmem:[#allocation25_spill] sm:$0xff] %v10871_v0  ;;  %7161 = vmatpush3.msra.mxu0 %v12015_v9  ;;  %7204 = vmatpush3.msra.mxu1 %v12017_v30  ;;  %v10899_v9 = vsub.f32 %v2743_v14, %v10845_v8  ;;  %v10908_v34 = vsub.f32 %v10805_v56, %v11623_v36  ;;  %v2741_v14 = vld [vmem:[#allocation8 + $0x338] sm:$0xff]  ;;  %v12024_v21 = vand.u32 4294901760, %v10814_v39  ;;  %v2740_v36 = vld [vmem:[#allocation8 + $0x330] sm:$0xff] }
 0x579   : > { %7162 = vmatprep.subr.mxu0 %v12018_v20  ;;  %7205 = vmatprep.subr.mxu1 %v10502_v6  ;;  %v10912_v30 = vsub.f32 %v2758_v47, %v10859_v43  ;;  %v12023_v6 = vand.u32 4294901760, %v10480_v3  ;;  %v10925_v20 = vsub.f32 %v2742_v31, %v10873_v45  ;;  %v2756_v47 = vld [vmem:[#allocation8 + $0x3b0] sm:$0xff]  ;;  %v5596_v3 = vand.u32 4294901760, %v10882_v5  ;;  %v12028_v31 = vld [vmem:[#allocation38_spill] sm:$0xff] }
 0x57a   : > { %12019 = vst [vmem:[#allocation15_spill] sm:$0xff] %v10899_v9  ;;  %7163 = vmatpush3.msra.mxu0 %v12020_v28  ;;  %7206 = vmatpush3.msra.mxu1 %v12022_v16  ;;  %v10921_v28 = vsub.f32 %v10814_v39, %v12024_v21  ;;  %v12027_v16 = vand.u32 4294901760, %v12026_v18  ;;  %v10934_v52 = vsub.f32 %v10829_v53, %v11628_v62  ;;  %v10937_v21 = vand.u32 4294901760, %v2757_v11  ;;  %v12029_v39 = vld [vmem:[#allocation33_spill] sm:$0xff]  ;;  %v12032_v53 = vld [vmem:[#allocation28_spill] sm:$0xff] }
 0x57b   : > { %12021 = vst [vmem:[#allocation27_spill] sm:$0xff] %v10912_v30  ;;  %7164 = vmatprep.subr.mxu0 %v12023_v6  ;;  %12025 = vst [vmem:[#allocation31_spill] sm:$0xff] %v10925_v20  ;;  %7207 = vmatprep.subr.mxu1 %v10522_v40  ;;  %v12030_v56 = vand.u32 4294901760, %v12029_v39  ;;  %v5484_v40 = vand.u32 4294901760, %v10895_v32  ;;  %v12031_v18 = vand.u32 4294901760, %v10843_v38  ;;  %v10949_v62 = vand.u32 4294901760, %v2741_v14 }
 0x57c   : > { %7165 = vmatpush3.msra.mxu0 %v12027_v16  ;;  %7208 = vmatpush3.msra.mxu1 %v12028_v31  ;;  %v2755_v6 = vld [vmem:[#allocation8 + $0x3a8] sm:$0xff]  ;;  %v5603_v31 = vand.u32 4294901760, %v10908_v34  ;;  %v12033_v39 = vand.u32 4294901760, %v10857_v41  ;;  %v10959_v7 = vand.u32 4294901760, %v2756_v47  ;;  %v12034_v16 = vand.u32 4294901760, %v10510_v1 }
 0x57d   : > { %7166 = vmatprep.subr.mxu0 %v12030_v56  ;;  %v10946_v5 = vsub.f32 %v10843_v38, %v12031_v18  ;;  %5348 = vmatmul.mubr.f32.vlgmr.msra.gmra.mxu1 %v12032_v53  ;;  %v2739_v18 = vld [vmem:[#allocation8 + $0x328] sm:$0xff]  ;;  %v5491_v38 = vand.u32 4294901760, %v10921_v28  ;;  %v12036_v32 = vand.u32 4294901760, %v10520_v33  ;;  %v5610_v1 = vand.u32 4294901760, %v10934_v52 }
 0x57e   : > { %7247 = vmatprep.subr.mxu1 %v5582_v55  ;;  %v10956_v56 = vsub.f32 %v10857_v41, %v12033_v39  ;;  %7167 = vmatpush3.msra.mxu0 %v12034_v16  ;;  %v12035_v55 = vand.u32 4294901760, %v10871_v0  ;;  %v10970_v39 = vand.u32 4294901760, %v2740_v36  ;;  %v2754_v41 = vld [vmem:[#allocation8 + $0x3a0] sm:$0xff]  ;;  %v10982_v16 = vsub.f32 %v2757_v11, %v10937_v21  ;;  %v2753_v11 = vld [vmem:[#allocation8 + $0x398] sm:$0xff] }
 0x57f   : > { %7248 = vmatpush3.msra.mxu1 %v5470_v22  ;;  %5690 = vmatprep.mubr.f32.mxu1 %v10708_v46  ;;  %v12037_v22 = vand.u32 4294901760, %v10886_v49  ;;  %v5498_v33 = vand.u32 4294901760, %v10946_v5  ;;  %v10997_v46 = vand.u32 4294901760, %v2739_v18  ;;  %v11008_v5 = vsub.f32 %v2756_v47, %v10959_v7  ;;  %v2752_v47 = vld [vmem:[#allocation8 + $0x390] sm:$0xff] }
 0x580   : > { %v10967_v34 = vsub.f32 %v10871_v0, %v12035_v55  ;;  %7168 = vmatprep.subr.mxu0 %v12036_v32  ;;  %12038 = vst [vmem:[#allocation36_spill] sm:$0xff] %v10982_v16  ;;  %v10984_v55 = vand.u32 4294901760, %v2755_v6  ;;  %7249 = vmatprep.subr.mxu1 %v5589_v4  ;;  %v12040_v0 = vand.u32 4294901760, %v10530_v48  ;;  %v12041_v32 = vand.u32 4294901760, %v10899_v9 }
 0x581   : > { %v10979_v28 = vsub.f32 %v10886_v49, %v12037_v22  ;;  %v10995_v22 = vsub.f32 %v2741_v14, %v10949_v62  ;;  %7250 = vmatpush3.msra.mxu1 %v5477_v29  ;;  %v12043_v49 = vand.u32 4294901760, %v10540_v50  ;;  %v5617_v48 = vand.u32 4294901760, %v10956_v56  ;;  %12045 = vst [vmem:[#allocation17_spill] sm:$0xff] %v11008_v5  ;;  %v2737_v14 = vld [vmem:[#allocation8 + $0x318] sm:$0xff] }
 0x582   : > { %12039 = vst [vmem:[#allocation22_spill] sm:$0xff] %v10984_v55  ;;  %7169 = vmatpush3.msra.mxu0 %v12040_v0  ;;  %v10992_v52 = vsub.f32 %v10899_v9, %v12041_v32  ;;  %v12044_v0 = vand.u32 4294901760, %v10912_v30  ;;  %v11010_v32 = vand.u32 4294901760, %v2754_v41  ;;  %7251 = vmatprep.subr.mxu1 %v5596_v3  ;;  %v12046_v9 = vand.u32 4294901760, %v10548_v60 }
 0x583   : > { %12042 = vst [vmem:[#allocation39_spill] sm:$0xff] %v10995_v22  ;;  %7170 = vmatprep.subr.mxu0 %v12043_v49  ;;  %v5505_v50 = vand.u32 4294901760, %v10967_v34  ;;  %v12047_v49 = vand.u32 4294901760, %v10925_v20  ;;  %v11021_v56 = vsub.f32 %v2740_v36, %v10970_v39  ;;  %7252 = vmatpush3.msra.mxu1 %v5484_v40  ;;  %v5624_v60 = vand.u32 4294901760, %v10979_v28  ;;  %v2751_v28 = vld [vmem:[#allocation8 + $0x388] sm:$0xff] }
 0x584   : > { %v11005_v4 = vsub.f32 %v10912_v30, %v12044_v0  ;;  %7171 = vmatpush3.msra.mxu0 %v12046_v9  ;;  %v11023_v0 = vand.u32 4294901760, %v2738_v63  ;;  %v12048_v30 = vand.u32 4294901760, %v10556_v26  ;;  %v11655_v9 = vand.u32 4294901760, %v10982_v16  ;;  %7253 = vmatprep.subr.mxu1 %v5603_v31 }
 0x585   : > { %v11018_v29 = vsub.f32 %v10925_v20, %v12047_v49  ;;  %v11030_v3 = vsub.f32 %v2755_v6, %v10984_v55  ;;  %v11032_v34 = vand.u32 4294901760, %v2753_v11  ;;  %v2736_v49 = vld [vmem:[#allocation8 + $0x310] sm:$0xff]  ;;  %v12049_v36 = vand.u32 4294901760, %v10564_v57  ;;  %7254 = vmatpush3.msra.mxu1 %v5491_v38 }
 0x586   : > { %7172 = vmatprep.subr.mxu0 %v12048_v30  ;;  %v5512_v20 = vand.u32 4294901760, %v10992_v52  ;;  %v11039_v26 = vsub.f32 %v2739_v18, %v10997_v46  ;;  %v11041_v30 = vand.u32 4294901760, %v2737_v14  ;;  %v5631_v6 = vand.u32 4294901760, %v11005_v4  ;;  %v2735_v52 = vld [vmem:[#allocation8 + $0x308] sm:$0xff]  ;;  %7255 = vmatprep.subr.mxu1 %v5610_v1  ;;  %v2750_v4 = vld [vmem:[#allocation8 + $0x380] sm:$0xff] }
 0x587   : > { %7173 = vmatpush3.msra.mxu0 %v12049_v36  ;;  %v11047_v57 = vsub.f32 %v2754_v41, %v11010_v32  ;;  %v11049_v36 = vand.u32 4294901760, %v2752_v47  ;;  %v5519_v18 = vand.u32 4294901760, %v11018_v29  ;;  %v11055_v38 = vsub.f32 %v2738_v63, %v11023_v0  ;;  %v2734_v63 = vld [vmem:[#allocation8 + $0x300] sm:$0xff]  ;;  %7256 = vmatpush3.msra.mxu1 %v5498_v33 }
 0x588   : > { %5244 = vmatmul.mubr.f32.vlgmr.msra.gmra.mxu0 %v12032_v53  ;;  %7212 = vmatprep.subr.mxu0 %v10727_v51  ;;  %v11057_v53 = vand.u32 4294901760, %v2736_v49  ;;  %v12051_v41 = vand.u32 4294901760, %v10780_v27  ;;  %v5637_v31 = vsub.f32 %v10982_v16, %v11655_v9  ;;  %v11067_v29 = vsub.f32 %v2753_v11, %v11032_v34 }
 0x589   : > { %7213 = vmatpush3.msra.mxu0 %v10732_v37  ;;  %v11069_v40 = vand.u32 4294901760, %v2751_v28  ;;  %v12052_v12 = vand.u32 4294901760, %v10995_v22  ;;  %v11077_v58 = vsub.f32 %v2737_v14, %v11041_v30  ;;  %v11079_v9 = vand.u32 4294901760, %v2735_v52  ;;  %7257 = vmatprep.subr.mxu1 %v5617_v48 }
 0x58a   : > { %12050 = vst [vmem:[#allocation41_spill] sm:$0xff] %v11057_v53  ;;  %5454 = vmatprep.mubr.f32.mxu0 %v12051_v41  ;;  %7214 = vmatprep.subr.mxu0 %v10737_v13  ;;  %v12054_v11 = vand.u32 4294901760, %v11008_v5  ;;  %v11087_v16 = vsub.f32 %v2752_v47, %v11049_v36  ;;  %v12055_v14 = vand.u32 4294901760, %v11021_v56  ;;  %v5638_v47 = vand.u32 4294901760, %v5637_v31 }
 0x58b   : > { %v5525_v27 = vsub.f32 %v10995_v22, %v12052_v12  ;;  %12053 = vst [vmem:[#allocation16_spill] sm:$0xff] %v11079_v9  ;;  %7215 = vmatpush3.msra.mxu0 %v10742_v2  ;;  %v11089_v12 = vand.u32 4294901760, %v2750_v4  ;;  %7258 = vmatpush3.msra.mxu1 %v5505_v50  ;;  %v11097_v22 = vsub.f32 %v2736_v49, %v11057_v53  ;;  %v12056_v1 = vand.u32 4294901760, %v11030_v3 }
 0x58c   : > { %v5644_v33 = vsub.f32 %v11008_v5, %v12054_v11  ;;  %7216 = vmatprep.subr.mxu0 %v10751_v15  ;;  %v5532_v48 = vsub.f32 %v11021_v56, %v12055_v14  ;;  %v11099_v11 = vand.u32 4294901760, %v2734_v63  ;;  %7259 = vmatprep.subr.mxu1 %v5624_v60  ;;  %v11107_v59 = vsub.f32 %v2751_v28, %v11069_v40 }
 0x58d   : > { %7217 = vmatpush3.msra.mxu0 %v10759_v23  ;;  %v5651_v50 = vsub.f32 %v11030_v3, %v12056_v1  ;;  %7260 = vmatpush3.msra.mxu1 %v5512_v20  ;;  %v5526_v49 = vand.u32 4294901760, %v5525_v27  ;;  %v12057_v14 = vand.u32 4294901760, %v11039_v26  ;;  %v11115_v31 = vsub.f32 %v2735_v52, %v11079_v9 }
 0x58e   : > { %7218 = vmatprep.subr.mxu0 %v10767_v42  ;;  %7261 = vmatprep.subr.mxu1 %v5631_v6  ;;  %v5645_v1 = vand.u32 4294901760, %v5644_v33  ;;  %v12058_v28 = vand.u32 4294901760, %v11047_v57  ;;  %v11123_v27 = vsub.f32 %v2750_v4, %v11089_v12  ;;  %v12059_v52 = vand.u32 4294901760, %v11055_v38 }
 0x58f   : > { %v5539_v60 = vsub.f32 %v11039_v26, %v12057_v14  ;;  %7219 = vmatpush3.msra.mxu0 %v10775_v25  ;;  %7262 = vmatpush3.msra.mxu1 %v5519_v18  ;;  %v5533_v14 = vand.u32 4294901760, %v5532_v48  ;;  %v11131_v33 = vsub.f32 %v2734_v63, %v11099_v11  ;;  %v12060_v4 = vand.u32 4294901760, %v11067_v29 }
 0x590   : > { %v5658_v20 = vsub.f32 %v11047_v57, %v12058_v28  ;;  %7220 = vmatprep.subr.mxu0 %v10789_v10  ;;  %v5546_v6 = vsub.f32 %v11055_v38, %v12059_v52  ;;  %7263 = vmatprep.subr.mxu1 %v5638_v47  ;;  %v5652_v28 = vand.u32 4294901760, %v5651_v50  ;;  %v12061_v52 = vand.u32 4294901760, %v11077_v58 }
 0x591   : > { %7221 = vmatpush3.msra.mxu0 %v10798_v54  ;;  %v5665_v18 = vsub.f32 %v11067_v29, %v12060_v4  ;;  %7264 = vmatpush3.msra.mxu1 %v5526_v49  ;;  %v5540_v48 = vand.u32 4294901760, %v5539_v60  ;;  %v12062_v50 = vand.u32 4294901760, %v11087_v16  ;;  %v12063_v60 = vand.u32 4294901760, %v11097_v22 }
 0x592   : > { %7222 = vmatprep.subr.mxu0 %v10807_v35  ;;  %v5553_v41 = vsub.f32 %v11077_v58, %v12061_v52  ;;  %7265 = vmatprep.subr.mxu1 %v5645_v1  ;;  %v5659_v47 = vand.u32 4294901760, %v5658_v20  ;;  %v5547_v49 = vand.u32 4294901760, %v5546_v6  ;;  %v12064_v20 = vand.u32 4294901760, %v11107_v59 }
 0x593   : > { %7223 = vmatpush3.msra.mxu0 %v10817_v24  ;;  %v5672_v4 = vsub.f32 %v11087_v16, %v12062_v50  ;;  %7266 = vmatpush3.msra.mxu1 %v5533_v14  ;;  %v5560_v52 = vsub.f32 %v11097_v22, %v12063_v60  ;;  %v5666_v1 = vand.u32 4294901760, %v5665_v18  ;;  %v12065_v6 = vand.u32 4294901760, %v11115_v31 }
 0x594   : > { %7224 = vmatprep.subr.mxu0 %v10831_v19  ;;  %7267 = vmatprep.subr.mxu1 %v5652_v28  ;;  %v5679_v50 = vsub.f32 %v11107_v59, %v12064_v20  ;;  %v5554_v14 = vand.u32 4294901760, %v5553_v41  ;;  %v12066_v28 = vand.u32 4294901760, %v11123_v27  ;;  %v11166_v63 = vand.u32 4294901760, %v11982_v61 }
 0x595   : > { %7225 = vmatpush3.msra.mxu0 %v10845_v8  ;;  %7268 = vmatpush3.msra.mxu1 %v5540_v48  ;;  %v5567_v5 = vsub.f32 %v11115_v31, %v12065_v6  ;;  %v5673_v60 = vand.u32 4294901760, %v5672_v4  ;;  %v5561_v48 = vand.u32 4294901760, %v5560_v52  ;;  %v12068_v41 = vand.u32 4294901760, %v11131_v33 }
 0x596   : > { %7226 = vmatprep.subr.mxu0 %v10859_v43  ;;  %7269 = vmatprep.subr.mxu1 %v5659_v47  ;;  %v5686_v18 = vsub.f32 %v11123_v27, %v12066_v28  ;;  %12067 = vst [vmem:[#allocation40_spill] sm:$0xff] %v11166_v63  ;;  %v5680_v47 = vand.u32 4294901760, %v5679_v50  ;;  %v12072_v28 = vld [vmem:[#allocation24_spill] sm:$0xff] }
 0x597   : > { %7227 = vmatpush3.msra.mxu0 %v10873_v45  ;;  %7270 = vmatpush3.msra.mxu1 %v5547_v49  ;;  %v5574_v20 = vsub.f32 %v11131_v33, %v12068_v41  ;;  %v5568_v4 = vand.u32 4294901760, %v5567_v5  ;;  %v11177_v49 = vsub.f32 %v11982_v61, %v11166_v63  ;;  %v12069_v61 = vand.u32 4294901760, %v10722_v44  ;;  %v12075_v41 = vld [vmem:[#allocation20_spill] sm:$0xff] }
 0x598   : > { %7228 = vmatprep.subr.mxu0 %v10937_v21  ;;  %7271 = vmatprep.subr.mxu1 %v5666_v1  ;;  %v5687_v6 = vand.u32 4294901760, %v5686_v18  ;;  %v12073_v18 = vld [vmem:[#allocation19_spill] sm:$0xff] }
 0x599   : > { %7229 = vmatpush3.msra.mxu0 %v10949_v62  ;;  %7272 = vmatpush3.msra.mxu1 %v5554_v14  ;;  %v5575_v52 = vand.u32 4294901760, %v5574_v20  ;;  %v11664_v5 = vand.u32 4294901760, %v11177_v49  ;;  %v12070_v14 = vld [vmem:[#allocation23_spill] sm:$0xff]  ;;  %v12077_v20 = vld [vmem:[#allocation21_spill] sm:$0xff] }
 0x59a   : > { %7230 = vmatprep.subr.mxu0 %v10959_v7  ;;  %7273 = vmatprep.subr.mxu1 %v5673_v60  ;;  %v12071_v60 = vld [vmem:[#allocation18_spill] sm:$0xff] }
 0x59b   : > { %7231 = vmatpush3.msra.mxu0 %v10970_v39  ;;  %7274 = vmatpush3.msra.mxu1 %v5561_v48  ;;  %v5458_v1 = vsub.f32 %v11177_v49, %v11664_v5  ;;  %v12074_v48 = vld [vmem:[#allocation29_spill] sm:$0xff]  ;;  %v12085_v5 = vld [vmem:[#allocation36_spill] sm:$0xff] }
 0x59c   : > { %7232 = vmatprep.subr.mxu0 %v10984_v55  ;;  %7275 = vmatprep.subr.mxu1 %v5680_v47  ;;  %v12078_v47 = vld [vmem:[#allocation32_spill] sm:$0xff] }
 0x59d   : > { %7233 = vmatpush3.msra.mxu0 %v10997_v46  ;;  %7276 = vmatpush3.msra.mxu1 %v5568_v4  ;;  %v5459_v50 = vand.u32 4294901760, %v5458_v1  ;;  %v12079_v4 = vld [vmem:[#allocation34_spill] sm:$0xff]  ;;  %v12083_v1 = vld [vmem:[#allocation27_spill] sm:$0xff] }
 0x59e   : > { %7234 = vmatprep.subr.mxu0 %v11010_v32  ;;  %7277 = vmatprep.subr.mxu1 %v5687_v6  ;;  %v12080_v6 = vld [vmem:[#allocation25_spill] sm:$0xff] }
 0x59f   : > { %7235 = vmatpush3.msra.mxu0 %v11023_v0  ;;  %7278 = vmatpush3.msra.mxu1 %v5575_v52  ;;  %v12081_v52 = vld [vmem:[#allocation37_spill] sm:$0xff] }
 0x5a0   : > { %7236 = vmatprep.subr.mxu0 %v11032_v34  ;;  %5692 = vmatmul.mubr.f32.vlgmr.msra.gmra.mxu1 %v11166_v63  ;;  %v12086_v63 = vld [vmem:[#allocation39_spill] sm:$0xff] }
 0x5a1   : > { %7317 = vmatprep.subr.mxu1 %v10727_v51  ;;  %7237 = vmatpush3.msra.mxu0 %v11041_v30 }
 0x5a2   : > { %7318 = vmatpush3.msra.mxu1 %v10732_v37  ;;  %5934 = vmatprep.mubr.f32.mxu1 %v12069_v61  ;;  %v12082_v61 = vld [vmem:[#allocation15_spill] sm:$0xff] }
 0x5a3   : > { %7238 = vmatprep.subr.mxu0 %v11049_v36  ;;  %7319 = vmatprep.subr.mxu1 %v10737_v13 }
 0x5a4   : > { %7239 = vmatpush3.msra.mxu0 %v11057_v53  ;;  %7320 = vmatpush3.msra.mxu1 %v10742_v2 }
 0x5a5   : > { %7240 = vmatprep.subr.mxu0 %v11069_v40  ;;  %7321 = vmatprep.subr.mxu1 %v10751_v15 }
 0x5a6   : > { %7241 = vmatpush3.msra.mxu0 %v11079_v9  ;;  %7322 = vmatpush3.msra.mxu1 %v10759_v23 }
 0x5a7   : > { %7242 = vmatprep.subr.mxu0 %v11089_v12  ;;  %7323 = vmatprep.subr.mxu1 %v10767_v42 }
 0x5a8   : > { %7243 = vmatpush3.msra.mxu0 %v11099_v11  ;;  %7324 = vmatpush3.msra.mxu1 %v10775_v25 }
 0x5a9   : > { %5460 = vmatmul.mubr.f32.vlgmr.msra.gmra.mxu0 %v5459_v50  ;;  %7282 = vmatprep.subr.mxu0 %v10749_v17  ;;  %v12084_v50 = vld [vmem:[#allocation31_spill] sm:$0xff] }
 0x5aa   : > { %7325 = vmatprep.subr.mxu1 %v10789_v10  ;;  %7283 = vmatpush3.msra.mxu0 %v12070_v14 }
 0x5ab   : > { %5827 = vmatprep.mubr.f32.mxu0 %v10722_v44  ;;  %7326 = vmatpush3.msra.mxu1 %v10798_v54  ;;  %v12076_v44 = vld [vmem:[#allocation30_spill] sm:$0xff] }
 0x5ac   : > { %7284 = vmatprep.subr.mxu0 %v12071_v60  ;;  %7327 = vmatprep.subr.mxu1 %v10807_v35 }
 0x5ad   : > { %7285 = vmatpush3.msra.mxu0 %v12072_v28  ;;  %7328 = vmatpush3.msra.mxu1 %v10817_v24 }
 0x5ae   : > { %7286 = vmatprep.subr.mxu0 %v12073_v18  ;;  %7329 = vmatprep.subr.mxu1 %v10831_v19 }
 0x5af   : > { %7287 = vmatpush3.msra.mxu0 %v12074_v48  ;;  %7330 = vmatpush3.msra.mxu1 %v10845_v8 }
 0x5b0   : > { %7288 = vmatprep.subr.mxu0 %v12075_v41  ;;  %7331 = vmatprep.subr.mxu1 %v10859_v43 }
 0x5b1   : > { %7289 = vmatpush3.msra.mxu0 %v12076_v44  ;;  %7332 = vmatpush3.msra.mxu1 %v10873_v45 }
 0x5b2   : > { %7290 = vmatprep.subr.mxu0 %v12077_v20  ;;  %7333 = vmatprep.subr.mxu1 %v10937_v21 }
 0x5b3   : > { %7291 = vmatpush3.msra.mxu0 %v12078_v47  ;;  %7334 = vmatpush3.msra.mxu1 %v10949_v62 }
 0x5b4   : > { %7292 = vmatprep.subr.mxu0 %v12079_v4  ;;  %7335 = vmatprep.subr.mxu1 %v10959_v7 }
 0x5b5   : > { %7293 = vmatpush3.msra.mxu0 %v12080_v6  ;;  %7336 = vmatpush3.msra.mxu1 %v10970_v39 }
 0x5b6   : > { %7294 = vmatprep.subr.mxu0 %v12081_v52  ;;  %7337 = vmatprep.subr.mxu1 %v10984_v55  ;;  %v12087_v55 = vld [vmem:[#allocation17_spill] sm:$0xff] }
 0x5b7   : > { %7295 = vmatpush3.msra.mxu0 %v12082_v61  ;;  %7338 = vmatpush3.msra.mxu1 %v10997_v46 }
 0x5b8   : > { %7296 = vmatprep.subr.mxu0 %v12083_v1  ;;  %7339 = vmatprep.subr.mxu1 %v11010_v32 }
 0x5b9   : > { %7297 = vmatpush3.msra.mxu0 %v12084_v50  ;;  %7340 = vmatpush3.msra.mxu1 %v11023_v0 }
 0x5ba   : > { %7298 = vmatprep.subr.mxu0 %v12085_v5  ;;  %7341 = vmatprep.subr.mxu1 %v11032_v34 }
 0x5bb   : > { %7299 = vmatpush3.msra.mxu0 %v12086_v63  ;;  %7342 = vmatpush3.msra.mxu1 %v11041_v30 }
 0x5bc   : > { %7300 = vmatprep.subr.mxu0 %v12087_v55  ;;  %7343 = vmatprep.subr.mxu1 %v11049_v36 }
 0x5bd   : > { %7301 = vmatpush3.msra.mxu0 %v11021_v56  ;;  %7344 = vmatpush3.msra.mxu1 %v11057_v53  ;;  %v12088_v53 = vand.u32 4294901760, %v11177_v49 }
 0x5be   : > { %7302 = vmatprep.subr.mxu0 %v11030_v3  ;;  %7345 = vmatprep.subr.mxu1 %v11069_v40 }
 0x5bf   : > { %7303 = vmatpush3.msra.mxu0 %v11039_v26  ;;  %7346 = vmatpush3.msra.mxu1 %v11079_v9  ;;  %v12089_v9 = vld [vmem:[#allocation42_spill] sm:$0xff] }
 0x5c0   : > { %7304 = vmatprep.subr.mxu0 %v11047_v57  ;;  %7347 = vmatprep.subr.mxu1 %v11089_v12 }
 0x5c1   : > { %7305 = vmatpush3.msra.mxu0 %v11055_v38  ;;  %7348 = vmatpush3.msra.mxu1 %v11099_v11 }
 0x5c2   : > { %7306 = vmatprep.subr.mxu0 %v11067_v29  ;;  %5938 = vmatmul.mubr.f32.vlgmr.msra.gmra.mxu1 %v12088_v53  ;;  %v12125_v53 = vand.u32 4294901760, %v11131_v33 }
 0x5c3   : > { %7387 = vmatprep.subr.mxu1 %v10727_v51  ;;  %7307 = vmatpush3.msra.mxu0 %v11077_v58  ;;  %v12090_v51 = vand.u32 4294901760, %v10749_v17  ;;  %v12094_v17 = vand.u32 4294901760, %v12073_v18 }
 0x5c4   : > { %7388 = vmatpush3.msra.mxu1 %v10732_v37  ;;  %6208 = vmatprep.mubr.f32.mxu1 %v12089_v9  ;;  %v12091_v37 = vand.u32 4294901760, %v12070_v14 }
 0x5c5   : > { %7308 = vmatprep.subr.mxu0 %v11087_v16  ;;  %7389 = vmatprep.subr.mxu1 %v10737_v13  ;;  %v12092_v13 = vand.u32 4294901760, %v12071_v60 }
 0x5c6   : > { %7309 = vmatpush3.msra.mxu0 %v11097_v22  ;;  %7390 = vmatpush3.msra.mxu1 %v10742_v2  ;;  %v12093_v2 = vand.u32 4294901760, %v12072_v28 }
 0x5c7   : > { %7310 = vmatprep.subr.mxu0 %v11107_v59  ;;  %7391 = vmatprep.subr.mxu1 %v10751_v15  ;;  %v12095_v15 = vand.u32 4294901760, %v12074_v48 }
 0x5c8   : > { %7311 = vmatpush3.msra.mxu0 %v11115_v31  ;;  %7392 = vmatpush3.msra.mxu1 %v10759_v23  ;;  %v12096_v23 = vand.u32 4294901760, %v12075_v41 }
 0x5c9   : > { %7312 = vmatprep.subr.mxu0 %v11123_v27  ;;  %7393 = vmatprep.subr.mxu1 %v10767_v42  ;;  %v12097_v42 = vand.u32 4294901760, %v12076_v44 }
 0x5ca   : > { %7313 = vmatpush3.msra.mxu0 %v11131_v33  ;;  %7394 = vmatpush3.msra.mxu1 %v10775_v25  ;;  %v12098_v25 = vand.u32 4294901760, %v12077_v20 }
 0x5cb   : > { %5830 = vmatmul.mubr.f32.vlgmr.msra.gmra.mxu0 %v11177_v49  ;;  %7352 = vmatprep.subr.mxu0 %v12090_v51 }
 0x5cc   : > { %7395 = vmatprep.subr.mxu1 %v10789_v10  ;;  %7353 = vmatpush3.msra.mxu0 %v12091_v37  ;;  %v12099_v10 = vand.u32 4294901760, %v12078_v47 }
 0x5cd   : > { %6104 = vmatprep.mubr.f32.mxu0 %v12089_v9  ;;  %7396 = vmatpush3.msra.mxu1 %v10798_v54  ;;  %v12100_v54 = vand.u32 4294901760, %v12079_v4  ;;  %v12114_v9 = vld [vmem:[#allocation16_spill] sm:$0xff] }
 0x5ce   : > { %7354 = vmatprep.subr.mxu0 %v12092_v13  ;;  %7397 = vmatprep.subr.mxu1 %v10807_v35  ;;  %v12103_v35 = vld [vmem:[#allocation22_spill] sm:$0xff] }
 0x5cf   : > { %7355 = vmatpush3.msra.mxu0 %v12093_v2  ;;  %7398 = vmatpush3.msra.mxu1 %v10817_v24  ;;  %v12104_v24 = vand.u32 4294901760, %v12082_v61 }
 0x5d0   : > { %7356 = vmatprep.subr.mxu0 %v12094_v17  ;;  %7399 = vmatprep.subr.mxu1 %v10831_v19  ;;  %v12105_v19 = vand.u32 4294901760, %v12083_v1 }
 0x5d1   : > { %7357 = vmatpush3.msra.mxu0 %v12095_v15  ;;  %7400 = vmatpush3.msra.mxu1 %v10845_v8  ;;  %v12107_v8 = vand.u32 4294901760, %v12085_v5 }
 0x5d2   : > { %7358 = vmatprep.subr.mxu0 %v12096_v23  ;;  %7401 = vmatprep.subr.mxu1 %v10859_v43  ;;  %v12101_v43 = vand.u32 4294901760, %v12080_v6 }
 0x5d3   : > { %7359 = vmatpush3.msra.mxu0 %v12097_v42  ;;  %7402 = vmatpush3.msra.mxu1 %v10873_v45  ;;  %v12102_v45 = vand.u32 4294901760, %v12081_v52 }
 0x5d4   : > { %7360 = vmatprep.subr.mxu0 %v12098_v25  ;;  %7403 = vmatprep.subr.mxu1 %v10937_v21  ;;  %v12110_v21 = vand.u32 4294901760, %v11021_v56  ;;  %v12116_v56 = vand.u32 4294901760, %v11055_v38  ;;  %v12124_v38 = vand.u32 4294901760, %v11123_v27 }
 0x5d5   : > { %7361 = vmatpush3.msra.mxu0 %v12099_v10  ;;  %7404 = vmatpush3.msra.mxu1 %v10949_v62  ;;  %v12108_v62 = vand.u32 4294901760, %v12086_v63 }
 0x5d6   : > { %7362 = vmatprep.subr.mxu0 %v12100_v54  ;;  %7405 = vmatprep.subr.mxu1 %v10959_v7  ;;  %v12106_v7 = vand.u32 4294901760, %v12084_v50 }
 0x5d7   : > { %7363 = vmatpush3.msra.mxu0 %v12101_v43  ;;  %7406 = vmatpush3.msra.mxu1 %v10970_v39  ;;  %v12111_v39 = vld [vmem:[#allocation41_spill] sm:$0xff] }
 0x5d8   : > { %7364 = vmatprep.subr.mxu0 %v12102_v45  ;;  %7407 = vmatprep.subr.mxu1 %v12103_v35 }
 0x5d9   : > { %7365 = vmatpush3.msra.mxu0 %v12104_v24  ;;  %7408 = vmatpush3.msra.mxu1 %v10997_v46  ;;  %v12109_v46 = vand.u32 4294901760, %v12087_v55  ;;  %v12115_v55 = vand.u32 4294901760, %v11047_v57  ;;  %v12122_v57 = vand.u32 4294901760, %v11107_v59  ;;  %v2766_v59 = vld [vmem:[%s11411_s6] sm:$0x1] }
 0x5da   : > { %7366 = vmatprep.subr.mxu0 %v12105_v19  ;;  %7409 = vmatprep.subr.mxu1 %v11010_v32  ;;  %v12112_v32 = vand.u32 4294901760, %v11030_v3  ;;  %v12117_v3 = vand.u32 4294901760, %v11067_v29 }
 0x5db   : > { %7367 = vmatpush3.msra.mxu0 %v12106_v7  ;;  %7410 = vmatpush3.msra.mxu1 %v11023_v0  ;;  %v12113_v0 = vand.u32 4294901760, %v11039_v26  ;;  %v12120_v26 = vand.u32 4294901760, %v11087_v16  ;;  %v6649_v16 = vpop.f32.mrf.mxu1 }
 0x5dc   : > { %7368 = vmatprep.subr.mxu0 %v12107_v8  ;;  %7411 = vmatprep.subr.mxu1 %v11032_v34  ;;  %v12118_v34 = vld [vmem:[#allocation40_spill] sm:$0xff] }
 0x5dd   : > { %7369 = vmatpush3.msra.mxu0 %v12108_v62  ;;  %7412 = vmatpush3.msra.mxu1 %v11041_v30  ;;  %v12121_v30 = vand.u32 4294901760, %v11097_v22 }
 0x5de   : > { %7370 = vmatprep.subr.mxu0 %v12109_v46  ;;  %7413 = vmatprep.subr.mxu1 %v11049_v36  ;;  %v12123_v36 = vand.u32 4294901760, %v11115_v31 }
 0x5df   : > { %7371 = vmatpush3.msra.mxu0 %v12110_v21  ;;  %7414 = vmatpush3.msra.mxu1 %v12111_v39 }
 0x5e0   : > { %7372 = vmatprep.subr.mxu0 %v12112_v32  ;;  %7415 = vmatprep.subr.mxu1 %v11069_v40  ;;  %v12119_v40 = vand.u32 4294901760, %v11077_v58  ;;  %v6614_v58 = vpop.f32.mrf.mxu0 }
 0x5e1   : > { %7373 = vmatpush3.msra.mxu0 %v12113_v0  ;;  %7416 = vmatpush3.msra.mxu1 %v12114_v9 }
 0x5e2   : > { %7374 = vmatprep.subr.mxu0 %v12115_v55  ;;  %7417 = vmatprep.subr.mxu1 %v11089_v12  ;;  %v6615_v29 = vpop.f32.mrf.mxu0 }
 0x5e3   : > { %7375 = vmatpush3.msra.mxu0 %v12116_v56  ;;  %7418 = vmatpush3.msra.mxu1 %v11099_v11  ;;  %v6616_v22 = vadd.f32 %v6615_v29, %v6614_v58  ;;  %v6650_v11 = vpop.f32.mrf.mxu1 }
 0x5e4   : > { %7376 = vmatprep.subr.mxu0 %v12117_v3  ;;  %6210 = vmatmul.mubr.f32.vlgmr.msra.gmra.mxu1 %v12118_v34  ;;  %v6684_v12 = vpop.f32.mrf.mxu0  ;;  %v6651_v5 = vadd.f32 %v6650_v11, %v6649_v16 }
 0x5e5   : > { %7377 = vmatpush3.msra.mxu0 %v12119_v40  ;;  %v6719_v31 = vpop.f32.mrf.mxu1  ;;  %v2876_v49 = vadd.f32 %v6616_v22, %v2766_v59 }
 0x5e6   : > { %7378 = vmatprep.subr.mxu0 %v12120_v26  ;;  %v6685_v63 = vpop.f32.mrf.mxu0 }
 0x5e7   : > { %7379 = vmatpush3.msra.mxu0 %v12121_v30  ;;  %v6686_v14 = vadd.f32 %v6685_v63, %v6684_v12  ;;  %v6720_v33 = vpop.f32.mrf.mxu1  ;;  %v3108_v60 = vadd.f32 %v6651_v5, %v2876_v49 }
 0x5e8   : > { %7380 = vmatprep.subr.mxu0 %v12122_v57  ;;  %v6754_v27 = vpop.f32.mrf.mxu0  ;;  %v6721_v44 = vadd.f32 %v6720_v33, %v6719_v31 }
 0x5e9   : > { %7381 = vmatpush3.msra.mxu0 %v12123_v36  ;;  %v6789_v28 = vpop.f32.mrf.mxu1  ;;  %v3246_v48 = vadd.f32 %v6686_v14, %v3108_v60 }
 0x5ea   : > { %7382 = vmatprep.subr.mxu0 %v12124_v38  ;;  %v6755_v18 = vpop.f32.mrf.mxu0 }
 0x5eb   : > { %7383 = vmatpush3.msra.mxu0 %v12125_v53  ;;  %v6756_v20 = vadd.f32 %v6755_v18, %v6754_v27  ;;  %v6790_v47 = vpop.f32.mrf.mxu1  ;;  %v3354_v4 = vadd.f32 %v6721_v44, %v3246_v48 }
 0x5ec   : > { %6106 = vmatmul.mubr.f32.vlgmr.msra.gmra.mxu0 %v12118_v34  ;;  %v6824_v41 = vpop.f32.mrf.mxu0  ;;  %v6791_v50 = vadd.f32 %v6790_v47, %v6789_v28 }
 0x5ed   : > { %v6859_v6 = vpop.f32.mrf.mxu1  ;;  %v3522_v61 = vadd.f32 %v6756_v20, %v3354_v4 }
 0x5ee   : > { %v6825_v52 = vpop.f32.mrf.mxu0 }
 0x5ef   : > { %v6826_v51 = vadd.f32 %v6825_v52, %v6824_v41  ;;  %v6860_v37 = vpop.f32.mrf.mxu1  ;;  %v3626_v13 = vadd.f32 %v6791_v50, %v3522_v61 }
 0x5f0   : > { %v6894_v1 = vpop.f32.mrf.mxu0  ;;  %v6861_v42 = vadd.f32 %v6860_v37, %v6859_v6 }
 0x5f1   : > { %v6929_v2 = vpop.f32.mrf.mxu1  ;;  %v3738_v15 = vadd.f32 %v6826_v51, %v3626_v13 }
 0x5f2   : > { %v6895_v17 = vpop.f32.mrf.mxu0 }
 0x5f3   : > { %v6896_v25 = vadd.f32 %v6895_v17, %v6894_v1  ;;  %v6930_v10 = vpop.f32.mrf.mxu1  ;;  %v3970_v54 = vadd.f32 %v6861_v42, %v3738_v15 }
 0x5f4   : > { %v6964_v23 = vpop.f32.mrf.mxu0  ;;  %v6931_v19 = vadd.f32 %v6930_v10, %v6929_v2 }
 0x5f5   : > { %v6999_v43 = vpop.f32.mrf.mxu1  ;;  %v4108_v35 = vadd.f32 %v6896_v25, %v3970_v54 }
 0x5f6   : > { %v6965_v45 = vpop.f32.mrf.mxu0 }
 0x5f7   : > { %v6966_v7 = vadd.f32 %v6965_v45, %v6964_v23  ;;  %v7000_v8 = vpop.f32.mrf.mxu1  ;;  %v4216_v62 = vadd.f32 %v6931_v19, %v4108_v35 }
 0x5f8   : > { %v7001_v0 = vadd.f32 %v7000_v8, %v6999_v43 }
 0x5f9   : > { %v7069_v46 = vpop.f32.mrf.mxu1  ;;  %v4384_v39 = vadd.f32 %v6966_v7, %v4216_v62 }
 0x5fb   : > { %v7070_v55 = vpop.f32.mrf.mxu1  ;;  %v4488_v56 = vadd.f32 %v7001_v0, %v4384_v39 }
 0x5fc   : > { %v7071_v30 = vadd.f32 %v7070_v55, %v7069_v46 }
 0x602   : > { %v7034_v24 = vpop.f32.mrf.mxu0 }
 0x604   : > { %v7035_v21 = vpop.f32.mrf.mxu0 }
 0x605   : > { %v7036_v9 = vadd.f32 %v7035_v21, %v7034_v24 }
 0x607   : > { %v4600_v40 = vadd.f32 %v7036_v9, %v4488_v56 }
 0x609   : > { %v4832_v38 = vadd.f32 %v7071_v30, %v4600_v40 }
 0x61b   : > { %v7139_v3 = vpop.f32.mrf.mxu1 }
 0x61d   : > { %v7140_v36 = vpop.f32.mrf.mxu1 }
 0x61e   : > { %v7141_v12 = vadd.f32 %v7140_v36, %v7139_v3 }
 0x624   : > { %v7104_v32 = vpop.f32.mrf.mxu0 }
 0x626   : > { %v7105_v34 = vpop.f32.mrf.mxu0 }
 0x627   : > { %v7106_v57 = vadd.f32 %v7105_v34, %v7104_v32 }
 0x629   : > { %v4970_v16 = vadd.f32 %v7106_v57, %v4832_v38 }
 0x62b   : > { %v5078_v59 = vadd.f32 %v7141_v12, %v4970_v16 }
 0x63d   : > { %v7209_v53 = vpop.f32.mrf.mxu1 }
 0x63f   : > { %v7210_v11 = vpop.f32.mrf.mxu1 }
 0x640   : > { %v7211_v5 = vadd.f32 %v7210_v11, %v7209_v53 }
 0x648   : > { %v7174_v26 = vpop.f32.mrf.mxu0 }
 0x64a   : > { %v7175_v58 = vpop.f32.mrf.mxu0 }
 0x64b   : > { %v7176_v22 = vadd.f32 %v7175_v58, %v7174_v26 }
 0x64d   : > { %v5246_v49 = vadd.f32 %v7176_v22, %v5078_v59 }
 0x64f   : > { %v5350_v60 = vadd.f32 %v7211_v5, %v5246_v49 }
 0x660   : > { %v7279_v31 = vpop.f32.mrf.mxu1 }
 0x662   : > { %v7280_v33 = vpop.f32.mrf.mxu1 }
 0x663   : > { %v7281_v41 = vadd.f32 %v7280_v33, %v7279_v31 }
 0x669   : > { %v7244_v29 = vpop.f32.mrf.mxu0 }
 0x66b   : > { %v7245_v63 = vpop.f32.mrf.mxu0 }
 0x66c   : > { %v7246_v14 = vadd.f32 %v7245_v63, %v7244_v29 }
 0x66e   : > { %v5462_v48 = vadd.f32 %v7246_v14, %v5350_v60 }
 0x670   : > { %v5694_v47 = vadd.f32 %v7281_v41, %v5462_v48 }
 0x682   : > { %v7349_v28 = vpop.f32.mrf.mxu1 }
 0x684   : > { %v7350_v20 = vpop.f32.mrf.mxu1 }
 0x685   : > { %v7351_v61 = vadd.f32 %v7350_v20, %v7349_v28 }
 0x68b   : > { %v7314_v27 = vpop.f32.mrf.mxu0 }
 0x68d   : > { %v7315_v18 = vpop.f32.mrf.mxu0 }
 0x68e   : > { %v7316_v44 = vadd.f32 %v7315_v18, %v7314_v27 }
 0x690   : > { %v5832_v6 = vadd.f32 %v7316_v44, %v5694_v47 }
 0x692   : > { %v5940_v51 = vadd.f32 %v7351_v61, %v5832_v6 }
 0x6a4   : > { %v7419_v4 = vpop.f32.mrf.mxu1 }
 0x6a6   : > { %v7420_v1 = vpop.f32.mrf.mxu1 }
 0x6a7   : > { %v7421_v13 = vadd.f32 %v7420_v1, %v7419_v4 }
 0x6ac   : > { %v7384_v52 = vpop.f32.mrf.mxu0 }
 0x6ae   : > { %v7385_v50 = vpop.f32.mrf.mxu0 }
 0x6af   : > { %v7386_v37 = vadd.f32 %v7385_v50, %v7384_v52 }
 0x6b1   : > { %v6108_v2 = vadd.f32 %v7386_v37, %v5940_v51 }
 0x6b3   : > { %v6212_v17 = vadd.f32 %v7421_v13, %v6108_v2 }
 0x6b5   : > { %6215 = vst [vmem:[%s349_s12] sm:$0x1] %v6212_v17 }
 0x6b6   : > { %8106 = shalt.err (!%p8103_p13)
}
 0x6b7   : > { %s8107_s13 = scalar_lea.hbm %s6227_s30, 16  ;;  %s8111_s19 = scalar_lea.hbm %s11412_s7, 32 }
 0x6b8   : > { %p8108_p1 = scmp.ne.s32.totalorder %s6227_s30, %s8107_s13  ;;  %p8112_p11 = scmp.lt.s32.totalorder %s6227_s30, %s11412_s7 }
 0x6b9   : > { %p8113_p2 = scmp.lt.s32.totalorder %s8111_s19, %s8107_s13 }
 0x6ba   : > { %p8109_p8 = pnand %p8108_p1, %p12126_p12 }
 0x6bb   : > { %p8114_p4 = por %p8113_p2, %p8112_p11 }
 0x6bc   : > { %p8110_p10 = pneg %p8109_p8 }
 0x6be   : > { %p8115_p6 = pnand %p8114_p4, %p8110_p10 }
 0x6c0   : > { %8118 = shalt.err (!%p8115_p6)
}
 0x6c1   : > { %7916 = dma.vmem_to_hbm [thread:$0]  (%p12126_p12), %s6230_s22, 16, %s6227_s30, %s6217_s9  }
 0x6c2 PF: > { %s6241_s21 = sand.u32 1, %s8153_s24   ;;  %p12127_p0 = scmp.ne.s32.totalorder %s11673_s8, 0 }
 0x6c3   : > { %p12128_p5 = scmp.ge.s32.totalorder %s8165_s27, 2  ;;  %s6242_s12 = scalar_lea.sflag [#allocation4], %s6241_s21 }
 0x6c5   : > { %p7933_p3 = pnand %p12128_p5, %p12127_p0 }
 0x6c7   : > { %p7934_p7 = pneg %p7933_p3 }
 0x6c9   : > { %8148 = dma.done.wait (%p7934_p7), %s6242_s12, 16  }
 0x6ca   : > { %8150 = vsyncadd (%p7934_p7), %s6242_s12, 4294967280  ;;  %p22_p9 = scmp.ge.s32.totalorder %s8299_s14, 4   ;;  %s12129_s24 = smov %s8157_s25 }
 0x6cb   : > { %s12130_s25 = smov %s8161_s26  ;;  %s12131_s26 = smov %s8309_s17 }
 0x6cc   : > { %s12132_s27 = smov %s8299_s14  ;;  %24 = sbr.rel (!%p22_p9) target bundleno = 10 (0xa), region = 111 }
 0x6d1   :  { %6246 = vsyncpa [#allocation3], 1 }
 0x6d2   :  { %6248 = vsyncpa [#allocation3 + $0x1], 1 }
 0x6d3   :  { %6249 = vsyncpa [#allocation6], 1 }
 0x6d4   :  { %6250 = vsyncpa [#allocation9], 1 }
 0x6d5   :  { %6251 = vsyncpa [#allocation4], 1 }
 0x6d6   :  { %6253 = vsyncpa [#allocation4 + $0x1], 1 }

</bundles_post_ra>
